<compile_context>
chip_gen: v5e
topology: v5e:2x2
jax: 0.10.0
libtpu: 0.0.40
codegen_flags: <defaults>
</compile_context>

<pallas_src>
import functools

import jax
import jax.numpy as jnp
from jax import lax
from jax.experimental import pallas as pl
from jax.experimental.pallas import tpu as pltpu

_EPS = 6.0 / 29.0
_NKNOTS = 16          # knots per curve; 10 curves total (3 LAB + 3 RGB + 4 HSV)
_NSEG = _NKNOTS - 1   # 15 piecewise-linear segments per curve


# -------------------- colour space helpers (traced inside kernel) ----------

def _rgb_to_lab(r, g, b):
    def srgb2lin(c):
        return jnp.where(c <= 0.04045,
                         c * (1.0 / 12.92),
                         ((jnp.maximum(c, 1e-4) + 0.055) * (1.0 / 1.055)) ** 2.4)

    r, g, b = srgb2lin(r), srgb2lin(g), srgb2lin(b)
    x = 0.412453 * r + 0.357580 * g + 0.180423 * b
    y = 0.212671 * r + 0.715160 * g + 0.072169 * b
    z = 0.019334 * r + 0.119193 * g + 0.950227 * b
    x = x * (1.0 / 0.950456)
    z = z * (1.0 / 1.088754)

    def f(t):
        return jnp.where(t <= _EPS ** 3,
                         t * (1.0 / (3.0 * _EPS ** 2)) + 4.0 / 29.0,
                         jnp.maximum(t, 1e-4) ** (1.0 / 3.0))

    fx, fy, fz = f(x), f(y), f(z)
    L = (116.0 * fy - 16.0) * 0.01
    a = (500.0 * (fx - fy) * (1.0 / 110.0) + 1.0) * 0.5
    bb = (200.0 * (fy - fz) * (1.0 / 110.0) + 1.0) * 0.5
    return L, a, bb


def _lab_to_rgb(L, a, b):
    L = L * 100.0
    a = (a * 2.0 - 1.0) * 110.0
    b = (b * 2.0 - 1.0) * 110.0
    fy = (L + 16.0) * (1.0 / 116.0)
    fx = fy + a * (1.0 / 500.0)
    fz = fy - b * (1.0 / 200.0)

    def finv(t):
        return jnp.where(t <= _EPS,
                         3.0 * _EPS ** 2 * (t - 4.0 / 29.0),
                         jnp.maximum(t, 1e-4) ** 3.0)

    x = finv(fx) * 0.950456
    y = finv(fy)
    z = finv(fz) * 1.088754
    r = 3.2404542 * x - 1.5371385 * y - 0.4985314 * z
    g = -0.9692660 * x + 1.8760108 * y + 0.0415560 * z
    bb = 0.0556434 * x - 0.2040259 * y + 1.0572252 * z

    def lin2srgb(c):
        return jnp.where(c <= 0.0031308,
                         c * 12.92,
                         1.055 * jnp.maximum(c, 1e-4) ** (1.0 / 2.4) - 0.055)

    return lin2srgb(r), lin2srgb(g), lin2srgb(bb)


def _rgb_to_hsv(r, g, b):
    # Inputs are already clipped to [0,1] and masked upstream -> only the
    # lower guard is needed (reference clamps to [1e-9, 1]).
    r = jnp.maximum(r, 1e-9)
    g = jnp.maximum(g, 1e-9)
    b = jnp.maximum(b, 1e-9)
    mx = jnp.maximum(jnp.maximum(r, g), b)
    mn = jnp.minimum(jnp.minimum(r, g), b)
    df = mx - mn + 1e-10
    inv_df = pl.reciprocal(df, approx=True)      # EUP (slack slot)
    inv_mx = pl.reciprocal(mx, approx=True)      # mx >= 1e-9 > 0
    # Additive (non-exclusive) channel==max masks, as in the reference CURL
    # code; the *60 and /360 of the reference are folded into a single *(1/6).
    h = ((g - b) * inv_df * (r == mx).astype(jnp.float32)
         + (2.0 + (b - r) * inv_df) * (g == mx).astype(jnp.float32)
         + (4.0 + (r - g) * inv_df) * (b == mx).astype(jnp.float32)) * (1.0 / 6.0)
    h = jnp.where(h < 0.0, h + 1.0, h)
    s = df * inv_mx
    return jnp.clip(h, 0.0, 1.0), jnp.clip(s, 0.0, 1.0), mx


def _hsv_to_rgb(h, s, v):
    # Inputs already clipped to [0,1] and masked upstream -> no input clamps.
    h360 = h * 360.0
    base = v * (1.0 - s)
    mr = (base - v) * (1.0 / 60.0)          # negative slope (m2 in CURL)
    mg = -mr                                # (v - base)/60  (m4 in CURL)
    r = v + jnp.clip(h360 - 60.0, 0.0, 60.0) * mr \
          - jnp.clip(h360 - 240.0, 0.0, 60.0) * mr
    g = base + jnp.clip(h360, 0.0, 60.0) * mg \
             - jnp.clip(h360 - 180.0, 0.0, 60.0) * mg
    b = base + jnp.clip(h360 - 120.0, 0.0, 60.0) * mg \
             - jnp.clip(h360 - 300.0, 0.0, 60.0) * mg
    return (jnp.clip(r, 0.0, 1.0),
            jnp.clip(g, 0.0, 1.0),
            jnp.clip(b, 0.0, 1.0))


# -------------------------------- kernel -----------------------------------

def _curl_kernel(base_ref, slope_ref, img_ref, mask_ref, out_ref, *, chunk_rows):
    """base_ref: SMEM (B,10); slope_ref: SMEM (B,150); img block (1,3,sub,lane)."""
    b = pl.program_id(0)
    n_chunks = img_ref.shape[2] // chunk_rows   # static

    def scale(x, ci):
        """Piecewise-linear scaling curve ci evaluated at x (unrolled FMAs).

        base_ref already contains k0 - sum_i(i * s_i), so each segment is
        only clip + mul + add (4 VALU ops incl. the 2-op clip)."""
        u = x * float(_NSEG)
        acc = base_ref[b, ci] + slope_ref[b, ci * _NSEG] * jnp.clip(u, 0.0, 1.0)
        for i in range(1, _NSEG):
            s = slope_ref[b, ci * _NSEG + i]             # SMEM scalar splat
            acc = acc + s * jnp.clip(u, float(i), float(i + 1))
        return acc

    def chunk_body(ck, carry):
        row0 = pl.multiple_of(ck * chunk_rows, chunk_rows)
        rs = pl.ds(row0, chunk_rows)
        r0 = img_ref[0, 0, rs, :]                 # (chunk_rows, lane)
        g0 = img_ref[0, 1, rs, :]
        b0 = img_ref[0, 2, rs, :]
        m = mask_ref[0, 0, rs, :]

        # ----- LAB branch (curves 0..2): each channel scaled by itself -----
        lL, la, lb = _rgb_to_lab(r0, g0, b0)
        lL = jnp.clip(lL * scale(lL, 0), 0.0, 1.0) * m
        la = jnp.clip(la * scale(la, 1), 0.0, 1.0) * m
        lb = jnp.clip(lb * scale(lb, 2), 0.0, 1.0) * m

        # ----- RGB branch (curves 3..5): each channel scaled by itself -----
        r1, g1, b1 = _lab_to_rgb(lL, la, lb)
        r1 = jnp.clip(r1 * scale(r1, 3), 0.0, 1.0) * m
        g1 = jnp.clip(g1 * scale(g1, 4), 0.0, 1.0) * m
        b1 = jnp.clip(b1 * scale(b1, 5), 0.0, 1.0) * m

        # ----- HSV branch (curves 6..9), reference CURL ordering -----
        hh, ss, vv = _rgb_to_hsv(r1, g1, b1)
        hh2 = hh * scale(hh, 6)            # hue  adjusted by hue
        ss2 = ss * scale(hh2, 7)           # sat  adjusted by (new) hue
        ss2 = ss2 * scale(ss2, 8)          # sat  adjusted by (current) sat
        vv2 = vv * scale(vv, 9)            # value adjusted by value
        hh2 = jnp.clip(hh2, 0.0, 1.0) * m
        ss2 = jnp.clip(ss2, 0.0, 1.0) * m
        vv2 = jnp.clip(vv2, 0.0, 1.0) * m

        # ----- residual + final clamp: per-channel lane-dense stores -----
        rr, gr, br = _hsv_to_rgb(hh2, ss2, vv2)
        out_ref[0, 0, rs, :] = jnp.clip(r0 + rr, 0.0, 1.0) * m
        out_ref[0, 1, rs, :] = jnp.clip(g0 + gr, 0.0, 1.0) * m
        out_ref[0, 2, rs, :] = jnp.clip(b0 + br, 0.0, 1.0) * m
        return carry

    lax.fori_loop(0, n_chunks, chunk_body, 0)


# ------------------------------ wrapper -------------------------------------

def _choose_tiling(p):
    """Pick (lane, rows, sub, chunk).

    Prefers a lane width that makes rows a multiple of 8 (sublane-dense vregs)
    with a moderate lane (512) so each 8-row chunk is a (8,512) slab; `sub` is
    the BlockSpec row count (up to 64, amortising per-grid-step overhead) and
    `chunk` the per-iteration working-slab rows inside the kernel."""
    choice = None
    for lane in (512, 1024, 256, 128):
        if p % lane:
            continue
        rows = p // lane
        if rows % 8 == 0:
            choice = (lane, rows)
            break
        if choice is None:
            choice = (lane, rows)
    if choice is None:
        raise ValueError("H*W must be a multiple of 128")
    lane, rows = choice
    if rows % 8 == 0:
        chunk = 8
        sub = 8
        for cand in (64, 32, 16):
            if rows % cand == 0:
                sub = cand
                break
    else:
        # small-image fallback: full-extent second-minor block dim
        chunk = rows
        sub = rows
    return lane, rows, sub, chunk


@jax.jit
def curl_forward(img, mask, L, R, H):
    """img: (B,3,H,W), mask: (B,1,H,W), L:(B,>=48), R:(B,>=48), H:(B,>=64)."""
    bsz, c, hh, ww = img.shape
    assert c == 3
    p = hh * ww
    lane, rows, sub, chunk = _choose_tiling(p)

    img_f = img.reshape(bsz, 3, rows, lane).astype(jnp.float32)
    mask_f = mask.reshape(bsz, 1, rows, lane).astype(jnp.float32)

    # exp of the predicted knot points; precompute (adjusted) base + slopes.
    lk = jnp.exp(L[:, :48].astype(jnp.float32))
    rk = jnp.exp(R[:, :48].astype(jnp.float32))
    hk = jnp.exp(H[:, :64].astype(jnp.float32))
    knots = jnp.concatenate([lk, rk, hk], axis=1).reshape(bsz, 10, _NKNOTS)
    slopes = knots[:, :, 1:] - knots[:, :, :-1]               # (B, 10, 15)
    seg_idx = jnp.arange(_NSEG, dtype=jnp.float32)
    # Fold -sum_i(i*s_i) into the base so the kernel uses clip(u, i, i+1).
    bases = knots[:, :, 0] - jnp.sum(seg_idx * slopes, axis=-1)   # (B, 10)
    slopes_flat = slopes.reshape(bsz, 10 * _NSEG)                 # (B, 150)

    grid = (bsz, rows // sub)
    out = pl.pallas_call(
        functools.partial(_curl_kernel, chunk_rows=chunk),
        out_shape=jax.ShapeDtypeStruct((bsz, 3, rows, lane), jnp.float32),
        grid_spec=pltpu.PrefetchScalarGridSpec(
            num_scalar_prefetch=2,
            grid=grid,
            in_specs=[
                pl.BlockSpec((1, 3, sub, lane), lambda bi, ti, *_: (bi, 0, ti, 0)),
                pl.BlockSpec((1, 1, sub, lane), lambda bi, ti, *_: (bi, 0, ti, 0)),
            ],
            out_specs=pl.BlockSpec((1, 3, sub, lane),
                                   lambda bi, ti, *_: (bi, 0, ti, 0)),
        ),
        compiler_params=pltpu.CompilerParams(
            dimension_semantics=("parallel", "parallel")),
    )(bases, slopes_flat, img_f, mask_f)

    out = out.reshape(bsz, 3, hh, ww)
    # gradient regulariser: sum of squared second differences of exp'd knots
    grad_reg = jnp.sum((slopes[:, :, 1:] - slopes[:, :, :-1]) ** 2, axis=(1, 2))
    return out, grad_reg


if __name__ == "__main__":
    key = jax.random.PRNGKey(0)
    k1, k2, k3, k4, k5 = jax.random.split(key, 5)
    B, Himg, Wimg = 2, 16, 16
    img = jax.random.uniform(k1, (B, 3, Himg, Wimg), jnp.float32)
    mask = (jax.random.uniform(k2, (B, 1, Himg, Wimg)) > 0.2).astype(jnp.float32)
    L = 0.1 * jax.random.normal(k3, (B, 48), jnp.float32)
    R = 0.1 * jax.random.normal(k4, (B, 48), jnp.float32)
    Hc = 0.1 * jax.random.normal(k5, (B, 64), jnp.float32)

    out_img, grad_reg = curl_forward(img, mask, L, R, Hc)
    jax.block_until_ready((out_img, grad_reg))
    assert out_img.shape == (B, 3, Himg, Wimg)
    assert grad_reg.shape == (B,)
    assert bool(jnp.all(jnp.isfinite(out_img)))
    assert bool(jnp.all((out_img >= 0.0) & (out_img <= 1.0)))
    print("KERNEL_OK")
</pallas_src>

<mosaic_0001>
module attributes {stable_mosaic.version = 11 : i64} {
  func.func @_curl_kernel(%arg0: i32, %arg1: i32, %arg2: memref<2x10xf32, #tpu.memory_space<smem>>, %arg3: memref<2x150xf32, #tpu.memory_space<smem>>, %arg4: memref<1x3x1x256xf32, #tpu.memory_space<vmem>>, %arg5: memref<1x1x1x256xf32, #tpu.memory_space<vmem>>, %arg6: memref<1x3x1x256xf32, #tpu.memory_space<vmem>>) attributes {dimension_semantics = [#tpu.dimension_semantics<parallel>, #tpu.dimension_semantics<parallel>], iteration_bounds = array<i64: 2, 1>, scalar_prefetch = 2 : i64, scratch_operands = 0 : i64, tpu.core_type = #tpu.core_type<tc>, window_params = [{transform_indices = @transform_0, window_bounds = array<i64: 1, 3, 1, 256>}, {transform_indices = @transform_1, window_bounds = array<i64: 1, 1, 1, 256>}, {transform_indices = @transform_2, window_bounds = array<i64: 1, 3, 1, 256>}]} {
    %c0_i32 = arith.constant 0 : i32
    %c1_i32 = arith.constant 1 : i32
    %0 = arith.muli %c0_i32, %c1_i32 : i32
    %1 = tpu.assume_multiple %0, 1 : i32
    %c0 = arith.constant 0 : index
    %c0_0 = arith.constant 0 : index
    %2 = arith.index_cast %1 : i32 to index
    %c0_1 = arith.constant 0 : index
    %3 = vector.load %arg4[%c0, %c0_0, %2, %c0_1] : memref<1x3x1x256xf32, #tpu.memory_space<vmem>>, vector<1x1x1x256xf32>
    %4 = vector.shape_cast %3 : vector<1x1x1x256xf32> to vector<1x256xf32>
    %c0_2 = arith.constant 0 : index
    %c1 = arith.constant 1 : index
    %5 = arith.index_cast %1 : i32 to index
    %c0_3 = arith.constant 0 : index
    %6 = vector.load %arg4[%c0_2, %c1, %5, %c0_3] : memref<1x3x1x256xf32, #tpu.memory_space<vmem>>, vector<1x1x1x256xf32>
    %7 = vector.shape_cast %6 : vector<1x1x1x256xf32> to vector<1x256xf32>
    %c0_4 = arith.constant 0 : index
    %c2 = arith.constant 2 : index
    %8 = arith.index_cast %1 : i32 to index
    %c0_5 = arith.constant 0 : index
    %9 = vector.load %arg4[%c0_4, %c2, %8, %c0_5] : memref<1x3x1x256xf32, #tpu.memory_space<vmem>>, vector<1x1x1x256xf32>
    %10 = vector.shape_cast %9 : vector<1x1x1x256xf32> to vector<1x256xf32>
    %c0_6 = arith.constant 0 : index
    %c0_7 = arith.constant 0 : index
    %11 = arith.index_cast %1 : i32 to index
    %c0_8 = arith.constant 0 : index
    %12 = vector.load %arg5[%c0_6, %c0_7, %11, %c0_8] : memref<1x1x1x256xf32, #tpu.memory_space<vmem>>, vector<1x1x1x256xf32>
    %13 = vector.shape_cast %12 : vector<1x1x1x256xf32> to vector<1x256xf32>
    %cst = arith.constant 4.045000e-02 : f32
    %14 = vector.broadcast %cst : f32 to vector<1x256xf32>
    %15 = arith.cmpf ole, %4, %14 : vector<1x256xf32>
    %cst_9 = arith.constant 0.0773993805 : f32
    %16 = vector.broadcast %cst_9 : f32 to vector<1x256xf32>
    %17 = arith.mulf %4, %16 : vector<1x256xf32>
    %cst_10 = arith.constant 9.99999974E-5 : f32
    %18 = vector.broadcast %cst_10 : f32 to vector<1x256xf32>
    %19 = arith.maximumf %4, %18 : vector<1x256xf32>
    %cst_11 = arith.constant 5.500000e-02 : f32
    %20 = vector.broadcast %cst_11 : f32 to vector<1x256xf32>
    %21 = arith.addf %19, %20 : vector<1x256xf32>
    %cst_12 = arith.constant 0.947867274 : f32
    %22 = vector.broadcast %cst_12 : f32 to vector<1x256xf32>
    %23 = arith.mulf %21, %22 : vector<1x256xf32>
    %cst_13 = arith.constant 2.400000e+00 : f32
    %24 = vector.broadcast %cst_13 : f32 to vector<1x256xf32>
    %25 = math.powf %23, %24 : vector<1x256xf32>
    %26 = arith.select %15, %17, %25 : vector<1x256xi1>, vector<1x256xf32>
    %cst_14 = arith.constant 4.045000e-02 : f32
    %27 = vector.broadcast %cst_14 : f32 to vector<1x256xf32>
    %28 = arith.cmpf ole, %7, %27 : vector<1x256xf32>
    %cst_15 = arith.constant 0.0773993805 : f32
    %29 = vector.broadcast %cst_15 : f32 to vector<1x256xf32>
    %30 = arith.mulf %7, %29 : vector<1x256xf32>
    %cst_16 = arith.constant 9.99999974E-5 : f32
    %31 = vector.broadcast %cst_16 : f32 to vector<1x256xf32>
    %32 = arith.maximumf %7, %31 : vector<1x256xf32>
    %cst_17 = arith.constant 5.500000e-02 : f32
    %33 = vector.broadcast %cst_17 : f32 to vector<1x256xf32>
    %34 = arith.addf %32, %33 : vector<1x256xf32>
    %cst_18 = arith.constant 0.947867274 : f32
    %35 = vector.broadcast %cst_18 : f32 to vector<1x256xf32>
    %36 = arith.mulf %34, %35 : vector<1x256xf32>
    %cst_19 = arith.constant 2.400000e+00 : f32
    %37 = vector.broadcast %cst_19 : f32 to vector<1x256xf32>
    %38 = math.powf %36, %37 : vector<1x256xf32>
    %39 = arith.select %28, %30, %38 : vector<1x256xi1>, vector<1x256xf32>
    %cst_20 = arith.constant 4.045000e-02 : f32
    %40 = vector.broadcast %cst_20 : f32 to vector<1x256xf32>
    %41 = arith.cmpf ole, %10, %40 : vector<1x256xf32>
    %cst_21 = arith.constant 0.0773993805 : f32
    %42 = vector.broadcast %cst_21 : f32 to vector<1x256xf32>
    %43 = arith.mulf %10, %42 : vector<1x256xf32>
    %cst_22 = arith.constant 9.99999974E-5 : f32
    %44 = vector.broadcast %cst_22 : f32 to vector<1x256xf32>
    %45 = arith.maximumf %10, %44 : vector<1x256xf32>
    %cst_23 = arith.constant 5.500000e-02 : f32
    %46 = vector.broadcast %cst_23 : f32 to vector<1x256xf32>
    %47 = arith.addf %45, %46 : vector<1x256xf32>
    %cst_24 = arith.constant 0.947867274 : f32
    %48 = vector.broadcast %cst_24 : f32 to vector<1x256xf32>
    %49 = arith.mulf %47, %48 : vector<1x256xf32>
    %cst_25 = arith.constant 2.400000e+00 : f32
    %50 = vector.broadcast %cst_25 : f32 to vector<1x256xf32>
    %51 = math.powf %49, %50 : vector<1x256xf32>
    %52 = arith.select %41, %43, %51 : vector<1x256xi1>, vector<1x256xf32>
    %cst_26 = arith.constant 4.124530e-01 : f32
    %53 = vector.broadcast %cst_26 : f32 to vector<1x256xf32>
    %54 = arith.mulf %53, %26 : vector<1x256xf32>
    %cst_27 = arith.constant 3.575800e-01 : f32
    %55 = vector.broadcast %cst_27 : f32 to vector<1x256xf32>
    %56 = arith.mulf %55, %39 : vector<1x256xf32>
    %57 = arith.addf %54, %56 : vector<1x256xf32>
    %cst_28 = arith.constant 1.804230e-01 : f32
    %58 = vector.broadcast %cst_28 : f32 to vector<1x256xf32>
    %59 = arith.mulf %58, %52 : vector<1x256xf32>
    %60 = arith.addf %57, %59 : vector<1x256xf32>
    %cst_29 = arith.constant 2.126710e-01 : f32
    %61 = vector.broadcast %cst_29 : f32 to vector<1x256xf32>
    %62 = arith.mulf %61, %26 : vector<1x256xf32>
    %cst_30 = arith.constant 7.151600e-01 : f32
    %63 = vector.broadcast %cst_30 : f32 to vector<1x256xf32>
    %64 = arith.mulf %63, %39 : vector<1x256xf32>
    %65 = arith.addf %62, %64 : vector<1x256xf32>
    %cst_31 = arith.constant 7.216900e-02 : f32
    %66 = vector.broadcast %cst_31 : f32 to vector<1x256xf32>
    %67 = arith.mulf %66, %52 : vector<1x256xf32>
    %68 = arith.addf %65, %67 : vector<1x256xf32>
    %cst_32 = arith.constant 1.933400e-02 : f32
    %69 = vector.broadcast %cst_32 : f32 to vector<1x256xf32>
    %70 = arith.mulf %69, %26 : vector<1x256xf32>
    %cst_33 = arith.constant 1.191930e-01 : f32
    %71 = vector.broadcast %cst_33 : f32 to vector<1x256xf32>
    %72 = arith.mulf %71, %39 : vector<1x256xf32>
    %73 = arith.addf %70, %72 : vector<1x256xf32>
    %cst_34 = arith.constant 9.502270e-01 : f32
    %74 = vector.broadcast %cst_34 : f32 to vector<1x256xf32>
    %75 = arith.mulf %74, %52 : vector<1x256xf32>
    %76 = arith.addf %73, %75 : vector<1x256xf32>
    %cst_35 = arith.constant 1.05212653 : f32
    %77 = vector.broadcast %cst_35 : f32 to vector<1x256xf32>
    %78 = arith.mulf %60, %77 : vector<1x256xf32>
    %cst_36 = arith.constant 0.918481112 : f32
    %79 = vector.broadcast %cst_36 : f32 to vector<1x256xf32>
    %80 = arith.mulf %76, %79 : vector<1x256xf32>
    %cst_37 = arith.constant 0.00885645207 : f32
    %81 = vector.broadcast %cst_37 : f32 to vector<1x256xf32>
    %82 = arith.cmpf ole, %78, %81 : vector<1x256xf32>
    %cst_38 = arith.constant 7.7870369 : f32
    %83 = vector.broadcast %cst_38 : f32 to vector<1x256xf32>
    %84 = arith.mulf %78, %83 : vector<1x256xf32>
    %cst_39 = arith.constant 0.137931034 : f32
    %85 = vector.broadcast %cst_39 : f32 to vector<1x256xf32>
    %86 = arith.addf %84, %85 : vector<1x256xf32>
    %cst_40 = arith.constant 9.99999974E-5 : f32
    %87 = vector.broadcast %cst_40 : f32 to vector<1x256xf32>
    %88 = arith.maximumf %78, %87 : vector<1x256xf32>
    %cst_41 = arith.constant 0.333333343 : f32
    %89 = vector.broadcast %cst_41 : f32 to vector<1x256xf32>
    %90 = math.powf %88, %89 : vector<1x256xf32>
    %91 = arith.select %82, %86, %90 : vector<1x256xi1>, vector<1x256xf32>
    %cst_42 = arith.constant 0.00885645207 : f32
    %92 = vector.broadcast %cst_42 : f32 to vector<1x256xf32>
    %93 = arith.cmpf ole, %68, %92 : vector<1x256xf32>
    %cst_43 = arith.constant 7.7870369 : f32
    %94 = vector.broadcast %cst_43 : f32 to vector<1x256xf32>
    %95 = arith.mulf %68, %94 : vector<1x256xf32>
    %cst_44 = arith.constant 0.137931034 : f32
    %96 = vector.broadcast %cst_44 : f32 to vector<1x256xf32>
    %97 = arith.addf %95, %96 : vector<1x256xf32>
    %cst_45 = arith.constant 9.99999974E-5 : f32
    %98 = vector.broadcast %cst_45 : f32 to vector<1x256xf32>
    %99 = arith.maximumf %68, %98 : vector<1x256xf32>
    %cst_46 = arith.constant 0.333333343 : f32
    %100 = vector.broadcast %cst_46 : f32 to vector<1x256xf32>
    %101 = math.powf %99, %100 : vector<1x256xf32>
    %102 = arith.select %93, %97, %101 : vector<1x256xi1>, vector<1x256xf32>
    %cst_47 = arith.constant 0.00885645207 : f32
    %103 = vector.broadcast %cst_47 : f32 to vector<1x256xf32>
    %104 = arith.cmpf ole, %80, %103 : vector<1x256xf32>
    %cst_48 = arith.constant 7.7870369 : f32
    %105 = vector.broadcast %cst_48 : f32 to vector<1x256xf32>
    %106 = arith.mulf %80, %105 : vector<1x256xf32>
    %cst_49 = arith.constant 0.137931034 : f32
    %107 = vector.broadcast %cst_49 : f32 to vector<1x256xf32>
    %108 = arith.addf %106, %107 : vector<1x256xf32>
    %cst_50 = arith.constant 9.99999974E-5 : f32
    %109 = vector.broadcast %cst_50 : f32 to vector<1x256xf32>
    %110 = arith.maximumf %80, %109 : vector<1x256xf32>
    %cst_51 = arith.constant 0.333333343 : f32
    %111 = vector.broadcast %cst_51 : f32 to vector<1x256xf32>
    %112 = math.powf %110, %111 : vector<1x256xf32>
    %113 = arith.select %104, %108, %112 : vector<1x256xi1>, vector<1x256xf32>
    %cst_52 = arith.constant 1.160000e+02 : f32
    %114 = vector.broadcast %cst_52 : f32 to vector<1x256xf32>
    %115 = arith.mulf %114, %102 : vector<1x256xf32>
    %cst_53 = arith.constant 1.600000e+01 : f32
    %116 = vector.broadcast %cst_53 : f32 to vector<1x256xf32>
    %117 = arith.subf %115, %116 : vector<1x256xf32>
    %cst_54 = arith.constant 0.00999999977 : f32
    %118 = vector.broadcast %cst_54 : f32 to vector<1x256xf32>
    %119 = arith.mulf %117, %118 : vector<1x256xf32>
    %120 = arith.subf %91, %102 : vector<1x256xf32>
    %cst_55 = arith.constant 5.000000e+02 : f32
    %121 = vector.broadcast %cst_55 : f32 to vector<1x256xf32>
    %122 = arith.mulf %121, %120 : vector<1x256xf32>
    %cst_56 = arith.constant 0.0090909088 : f32
    %123 = vector.broadcast %cst_56 : f32 to vector<1x256xf32>
    %124 = arith.mulf %122, %123 : vector<1x256xf32>
    %cst_57 = arith.constant 1.000000e+00 : f32
    %125 = vector.broadcast %cst_57 : f32 to vector<1x256xf32>
    %126 = arith.addf %124, %125 : vector<1x256xf32>
    %cst_58 = arith.constant 5.000000e-01 : f32
    %127 = vector.broadcast %cst_58 : f32 to vector<1x256xf32>
    %128 = arith.mulf %126, %127 : vector<1x256xf32>
    %129 = arith.subf %102, %113 : vector<1x256xf32>
    %cst_59 = arith.constant 2.000000e+02 : f32
    %130 = vector.broadcast %cst_59 : f32 to vector<1x256xf32>
    %131 = arith.mulf %130, %129 : vector<1x256xf32>
    %cst_60 = arith.constant 0.0090909088 : f32
    %132 = vector.broadcast %cst_60 : f32 to vector<1x256xf32>
    %133 = arith.mulf %131, %132 : vector<1x256xf32>
    %cst_61 = arith.constant 1.000000e+00 : f32
    %134 = vector.broadcast %cst_61 : f32 to vector<1x256xf32>
    %135 = arith.addf %133, %134 : vector<1x256xf32>
    %cst_62 = arith.constant 5.000000e-01 : f32
    %136 = vector.broadcast %cst_62 : f32 to vector<1x256xf32>
    %137 = arith.mulf %135, %136 : vector<1x256xf32>
    %cst_63 = arith.constant 1.500000e+01 : f32
    %138 = vector.broadcast %cst_63 : f32 to vector<1x256xf32>
    %139 = arith.mulf %119, %138 : vector<1x256xf32>
    %140 = arith.index_cast %arg0 : i32 to index
    %c0_64 = arith.constant 0 : index
    %141 = memref.load %arg2[%140, %c0_64] : memref<2x10xf32, #tpu.memory_space<smem>>
    %142 = arith.index_cast %arg0 : i32 to index
    %c0_65 = arith.constant 0 : index
    %143 = memref.load %arg3[%142, %c0_65] : memref<2x150xf32, #tpu.memory_space<smem>>
    %cst_66 = arith.constant 0.000000e+00 : f32
    %cst_67 = arith.constant 1.000000e+00 : f32
    %144 = vector.broadcast %cst_66 : f32 to vector<1x256xf32>
    %145 = arith.maximumf %144, %139 : vector<1x256xf32>
    %146 = vector.broadcast %cst_67 : f32 to vector<1x256xf32>
    %147 = arith.minimumf %146, %145 : vector<1x256xf32>
    %148 = vector.broadcast %143 : f32 to vector<1x256xf32>
    %149 = arith.mulf %148, %147 : vector<1x256xf32>
    %150 = vector.broadcast %141 : f32 to vector<1x256xf32>
    %151 = arith.addf %150, %149 : vector<1x256xf32>
    %152 = arith.index_cast %arg0 : i32 to index
    %c1_68 = arith.constant 1 : index
    %153 = memref.load %arg3[%152, %c1_68] : memref<2x150xf32, #tpu.memory_space<smem>>
    %cst_69 = arith.constant 1.000000e+00 : f32
    %cst_70 = arith.constant 2.000000e+00 : f32
    %154 = vector.broadcast %cst_69 : f32 to vector<1x256xf32>
    %155 = arith.maximumf %154, %139 : vector<1x256xf32>
    %156 = vector.broadcast %cst_70 : f32 to vector<1x256xf32>
    %157 = arith.minimumf %156, %155 : vector<1x256xf32>
    %158 = vector.broadcast %153 : f32 to vector<1x256xf32>
    %159 = arith.mulf %158, %157 : vector<1x256xf32>
    %160 = arith.addf %151, %159 : vector<1x256xf32>
    %161 = arith.index_cast %arg0 : i32 to index
    %c2_71 = arith.constant 2 : index
    %162 = memref.load %arg3[%161, %c2_71] : memref<2x150xf32, #tpu.memory_space<smem>>
    %cst_72 = arith.constant 2.000000e+00 : f32
    %cst_73 = arith.constant 3.000000e+00 : f32
    %163 = vector.broadcast %cst_72 : f32 to vector<1x256xf32>
    %164 = arith.maximumf %163, %139 : vector<1x256xf32>
    %165 = vector.broadcast %cst_73 : f32 to vector<1x256xf32>
    %166 = arith.minimumf %165, %164 : vector<1x256xf32>
    %167 = vector.broadcast %162 : f32 to vector<1x256xf32>
    %168 = arith.mulf %167, %166 : vector<1x256xf32>
    %169 = arith.addf %160, %168 : vector<1x256xf32>
    %170 = arith.index_cast %arg0 : i32 to index
    %c3 = arith.constant 3 : index
    %171 = memref.load %arg3[%170, %c3] : memref<2x150xf32, #tpu.memory_space<smem>>
    %cst_74 = arith.constant 3.000000e+00 : f32
    %cst_75 = arith.constant 4.000000e+00 : f32
    %172 = vector.broadcast %cst_74 : f32 to vector<1x256xf32>
    %173 = arith.maximumf %172, %139 : vector<1x256xf32>
    %174 = vector.broadcast %cst_75 : f32 to vector<1x256xf32>
    %175 = arith.minimumf %174, %173 : vector<1x256xf32>
    %176 = vector.broadcast %171 : f32 to vector<1x256xf32>
    %177 = arith.mulf %176, %175 : vector<1x256xf32>
    %178 = arith.addf %169, %177 : vector<1x256xf32>
    %179 = arith.index_cast %arg0 : i32 to index
    %c4 = arith.constant 4 : index
    %180 = memref.load %arg3[%179, %c4] : memref<2x150xf32, #tpu.memory_space<smem>>
    %cst_76 = arith.constant 4.000000e+00 : f32
    %cst_77 = arith.constant 5.000000e+00 : f32
    %181 = vector.broadcast %cst_76 : f32 to vector<1x256xf32>
    %182 = arith.maximumf %181, %139 : vector<1x256xf32>
    %183 = vector.broadcast %cst_77 : f32 to vector<1x256xf32>
    %184 = arith.minimumf %183, %182 : vector<1x256xf32>
    %185 = vector.broadcast %180 : f32 to vector<1x256xf32>
    %186 = arith.mulf %185, %184 : vector<1x256xf32>
    %187 = arith.addf %178, %186 : vector<1x256xf32>
    %188 = arith.index_cast %arg0 : i32 to index
    %c5 = arith.constant 5 : index
    %189 = memref.load %arg3[%188, %c5] : memref<2x150xf32, #tpu.memory_space<smem>>
    %cst_78 = arith.constant 5.000000e+00 : f32
    %cst_79 = arith.constant 6.000000e+00 : f32
    %190 = vector.broadcast %cst_78 : f32 to vector<1x256xf32>
    %191 = arith.maximumf %190, %139 : vector<1x256xf32>
    %192 = vector.broadcast %cst_79 : f32 to vector<1x256xf32>
    %193 = arith.minimumf %192, %191 : vector<1x256xf32>
    %194 = vector.broadcast %189 : f32 to vector<1x256xf32>
    %195 = arith.mulf %194, %193 : vector<1x256xf32>
    %196 = arith.addf %187, %195 : vector<1x256xf32>
    %197 = arith.index_cast %arg0 : i32 to index
    %c6 = arith.constant 6 : index
    %198 = memref.load %arg3[%197, %c6] : memref<2x150xf32, #tpu.memory_space<smem>>
    %cst_80 = arith.constant 6.000000e+00 : f32
    %cst_81 = arith.constant 7.000000e+00 : f32
    %199 = vector.broadcast %cst_80 : f32 to vector<1x256xf32>
    %200 = arith.maximumf %199, %139 : vector<1x256xf32>
    %201 = vector.broadcast %cst_81 : f32 to vector<1x256xf32>
    %202 = arith.minimumf %201, %200 : vector<1x256xf32>
    %203 = vector.broadcast %198 : f32 to vector<1x256xf32>
    %204 = arith.mulf %203, %202 : vector<1x256xf32>
    %205 = arith.addf %196, %204 : vector<1x256xf32>
    %206 = arith.index_cast %arg0 : i32 to index
    %c7 = arith.constant 7 : index
    %207 = memref.load %arg3[%206, %c7] : memref<2x150xf32, #tpu.memory_space<smem>>
    %cst_82 = arith.constant 7.000000e+00 : f32
    %cst_83 = arith.constant 8.000000e+00 : f32
    %208 = vector.broadcast %cst_82 : f32 to vector<1x256xf32>
    %209 = arith.maximumf %208, %139 : vector<1x256xf32>
    %210 = vector.broadcast %cst_83 : f32 to vector<1x256xf32>
    %211 = arith.minimumf %210, %209 : vector<1x256xf32>
    %212 = vector.broadcast %207 : f32 to vector<1x256xf32>
    %213 = arith.mulf %212, %211 : vector<1x256xf32>
    %214 = arith.addf %205, %213 : vector<1x256xf32>
    %215 = arith.index_cast %arg0 : i32 to index
    %c8 = arith.constant 8 : index
    %216 = memref.load %arg3[%215, %c8] : memref<2x150xf32, #tpu.memory_space<smem>>
    %cst_84 = arith.constant 8.000000e+00 : f32
    %cst_85 = arith.constant 9.000000e+00 : f32
    %217 = vector.broadcast %cst_84 : f32 to vector<1x256xf32>
    %218 = arith.maximumf %217, %139 : vector<1x256xf32>
    %219 = vector.broadcast %cst_85 : f32 to vector<1x256xf32>
    %220 = arith.minimumf %219, %218 : vector<1x256xf32>
    %221 = vector.broadcast %216 : f32 to vector<1x256xf32>
    %222 = arith.mulf %221, %220 : vector<1x256xf32>
    %223 = arith.addf %214, %222 : vector<1x256xf32>
    %224 = arith.index_cast %arg0 : i32 to index
    %c9 = arith.constant 9 : index
    %225 = memref.load %arg3[%224, %c9] : memref<2x150xf32, #tpu.memory_space<smem>>
    %cst_86 = arith.constant 9.000000e+00 : f32
    %cst_87 = arith.constant 1.000000e+01 : f32
    %226 = vector.broadcast %cst_86 : f32 to vector<1x256xf32>
    %227 = arith.maximumf %226, %139 : vector<1x256xf32>
    %228 = vector.broadcast %cst_87 : f32 to vector<1x256xf32>
    %229 = arith.minimumf %228, %227 : vector<1x256xf32>
    %230 = vector.broadcast %225 : f32 to vector<1x256xf32>
    %231 = arith.mulf %230, %229 : vector<1x256xf32>
    %232 = arith.addf %223, %231 : vector<1x256xf32>
    %233 = arith.index_cast %arg0 : i32 to index
    %c10 = arith.constant 10 : index
    %234 = memref.load %arg3[%233, %c10] : memref<2x150xf32, #tpu.memory_space<smem>>
    %cst_88 = arith.constant 1.000000e+01 : f32
    %cst_89 = arith.constant 1.100000e+01 : f32
    %235 = vector.broadcast %cst_88 : f32 to vector<1x256xf32>
    %236 = arith.maximumf %235, %139 : vector<1x256xf32>
    %237 = vector.broadcast %cst_89 : f32 to vector<1x256xf32>
    %238 = arith.minimumf %237, %236 : vector<1x256xf32>
    %239 = vector.broadcast %234 : f32 to vector<1x256xf32>
    %240 = arith.mulf %239, %238 : vector<1x256xf32>
    %241 = arith.addf %232, %240 : vector<1x256xf32>
    %242 = arith.index_cast %arg0 : i32 to index
    %c11 = arith.constant 11 : index
    %243 = memref.load %arg3[%242, %c11] : memref<2x150xf32, #tpu.memory_space<smem>>
    %cst_90 = arith.constant 1.100000e+01 : f32
    %cst_91 = arith.constant 1.200000e+01 : f32
    %244 = vector.broadcast %cst_90 : f32 to vector<1x256xf32>
    %245 = arith.maximumf %244, %139 : vector<1x256xf32>
    %246 = vector.broadcast %cst_91 : f32 to vector<1x256xf32>
    %247 = arith.minimumf %246, %245 : vector<1x256xf32>
    %248 = vector.broadcast %243 : f32 to vector<1x256xf32>
    %249 = arith.mulf %248, %247 : vector<1x256xf32>
    %250 = arith.addf %241, %249 : vector<1x256xf32>
    %251 = arith.index_cast %arg0 : i32 to index
    %c12 = arith.constant 12 : index
    %252 = memref.load %arg3[%251, %c12] : memref<2x150xf32, #tpu.memory_space<smem>>
    %cst_92 = arith.constant 1.200000e+01 : f32
    %cst_93 = arith.constant 1.300000e+01 : f32
    %253 = vector.broadcast %cst_92 : f32 to vector<1x256xf32>
    %254 = arith.maximumf %253, %139 : vector<1x256xf32>
    %255 = vector.broadcast %cst_93 : f32 to vector<1x256xf32>
    %256 = arith.minimumf %255, %254 : vector<1x256xf32>
    %257 = vector.broadcast %252 : f32 to vector<1x256xf32>
    %258 = arith.mulf %257, %256 : vector<1x256xf32>
    %259 = arith.addf %250, %258 : vector<1x256xf32>
    %260 = arith.index_cast %arg0 : i32 to index
    %c13 = arith.constant 13 : index
    %261 = memref.load %arg3[%260, %c13] : memref<2x150xf32, #tpu.memory_space<smem>>
    %cst_94 = arith.constant 1.300000e+01 : f32
    %cst_95 = arith.constant 1.400000e+01 : f32
    %262 = vector.broadcast %cst_94 : f32 to vector<1x256xf32>
    %263 = arith.maximumf %262, %139 : vector<1x256xf32>
    %264 = vector.broadcast %cst_95 : f32 to vector<1x256xf32>
    %265 = arith.minimumf %264, %263 : vector<1x256xf32>
    %266 = vector.broadcast %261 : f32 to vector<1x256xf32>
    %267 = arith.mulf %266, %265 : vector<1x256xf32>
    %268 = arith.addf %259, %267 : vector<1x256xf32>
    %269 = arith.index_cast %arg0 : i32 to index
    %c14 = arith.constant 14 : index
    %270 = memref.load %arg3[%269, %c14] : memref<2x150xf32, #tpu.memory_space<smem>>
    %cst_96 = arith.constant 1.400000e+01 : f32
    %cst_97 = arith.constant 1.500000e+01 : f32
    %271 = vector.broadcast %cst_96 : f32 to vector<1x256xf32>
    %272 = arith.maximumf %271, %139 : vector<1x256xf32>
    %273 = vector.broadcast %cst_97 : f32 to vector<1x256xf32>
    %274 = arith.minimumf %273, %272 : vector<1x256xf32>
    %275 = vector.broadcast %270 : f32 to vector<1x256xf32>
    %276 = arith.mulf %275, %274 : vector<1x256xf32>
    %277 = arith.addf %268, %276 : vector<1x256xf32>
    %278 = arith.mulf %119, %277 : vector<1x256xf32>
    %cst_98 = arith.constant 0.000000e+00 : f32
    %cst_99 = arith.constant 1.000000e+00 : f32
    %279 = vector.broadcast %cst_98 : f32 to vector<1x256xf32>
    %280 = arith.maximumf %279, %278 : vector<1x256xf32>
    %281 = vector.broadcast %cst_99 : f32 to vector<1x256xf32>
    %282 = arith.minimumf %281, %280 : vector<1x256xf32>
    %283 = arith.mulf %282, %13 : vector<1x256xf32>
    %cst_100 = arith.constant 1.500000e+01 : f32
    %284 = vector.broadcast %cst_100 : f32 to vector<1x256xf32>
    %285 = arith.mulf %128, %284 : vector<1x256xf32>
    %286 = arith.index_cast %arg0 : i32 to index
    %c1_101 = arith.constant 1 : index
    %287 = memref.load %arg2[%286, %c1_101] : memref<2x10xf32, #tpu.memory_space<smem>>
    %288 = arith.index_cast %arg0 : i32 to index
    %c15 = arith.constant 15 : index
    %289 = memref.load %arg3[%288, %c15] : memref<2x150xf32, #tpu.memory_space<smem>>
    %cst_102 = arith.constant 0.000000e+00 : f32
    %cst_103 = arith.constant 1.000000e+00 : f32
    %290 = vector.broadcast %cst_102 : f32 to vector<1x256xf32>
    %291 = arith.maximumf %290, %285 : vector<1x256xf32>
    %292 = vector.broadcast %cst_103 : f32 to vector<1x256xf32>
    %293 = arith.minimumf %292, %291 : vector<1x256xf32>
    %294 = vector.broadcast %289 : f32 to vector<1x256xf32>
    %295 = arith.mulf %294, %293 : vector<1x256xf32>
    %296 = vector.broadcast %287 : f32 to vector<1x256xf32>
    %297 = arith.addf %296, %295 : vector<1x256xf32>
    %298 = arith.index_cast %arg0 : i32 to index
    %c16 = arith.constant 16 : index
    %299 = memref.load %arg3[%298, %c16] : memref<2x150xf32, #tpu.memory_space<smem>>
    %cst_104 = arith.constant 1.000000e+00 : f32
    %cst_105 = arith.constant 2.000000e+00 : f32
    %300 = vector.broadcast %cst_104 : f32 to vector<1x256xf32>
    %301 = arith.maximumf %300, %285 : vector<1x256xf32>
    %302 = vector.broadcast %cst_105 : f32 to vector<1x256xf32>
    %303 = arith.minimumf %302, %301 : vector<1x256xf32>
    %304 = vector.broadcast %299 : f32 to vector<1x256xf32>
    %305 = arith.mulf %304, %303 : vector<1x256xf32>
    %306 = arith.addf %297, %305 : vector<1x256xf32>
    %307 = arith.index_cast %arg0 : i32 to index
    %c17 = arith.constant 17 : index
    %308 = memref.load %arg3[%307, %c17] : memref<2x150xf32, #tpu.memory_space<smem>>
    %cst_106 = arith.constant 2.000000e+00 : f32
    %cst_107 = arith.constant 3.000000e+00 : f32
    %309 = vector.broadcast %cst_106 : f32 to vector<1x256xf32>
    %310 = arith.maximumf %309, %285 : vector<1x256xf32>
    %311 = vector.broadcast %cst_107 : f32 to vector<1x256xf32>
    %312 = arith.minimumf %311, %310 : vector<1x256xf32>
    %313 = vector.broadcast %308 : f32 to vector<1x256xf32>
    %314 = arith.mulf %313, %312 : vector<1x256xf32>
    %315 = arith.addf %306, %314 : vector<1x256xf32>
    %316 = arith.index_cast %arg0 : i32 to index
    %c18 = arith.constant 18 : index
    %317 = memref.load %arg3[%316, %c18] : memref<2x150xf32, #tpu.memory_space<smem>>
    %cst_108 = arith.constant 3.000000e+00 : f32
    %cst_109 = arith.constant 4.000000e+00 : f32
    %318 = vector.broadcast %cst_108 : f32 to vector<1x256xf32>
    %319 = arith.maximumf %318, %285 : vector<1x256xf32>
    %320 = vector.broadcast %cst_109 : f32 to vector<1x256xf32>
    %321 = arith.minimumf %320, %319 : vector<1x256xf32>
    %322 = vector.broadcast %317 : f32 to vector<1x256xf32>
    %323 = arith.mulf %322, %321 : vector<1x256xf32>
    %324 = arith.addf %315, %323 : vector<1x256xf32>
    %325 = arith.index_cast %arg0 : i32 to index
    %c19 = arith.constant 19 : index
    %326 = memref.load %arg3[%325, %c19] : memref<2x150xf32, #tpu.memory_space<smem>>
    %cst_110 = arith.constant 4.000000e+00 : f32
    %cst_111 = arith.constant 5.000000e+00 : f32
    %327 = vector.broadcast %cst_110 : f32 to vector<1x256xf32>
    %328 = arith.maximumf %327, %285 : vector<1x256xf32>
    %329 = vector.broadcast %cst_111 : f32 to vector<1x256xf32>
    %330 = arith.minimumf %329, %328 : vector<1x256xf32>
    %331 = vector.broadcast %326 : f32 to vector<1x256xf32>
    %332 = arith.mulf %331, %330 : vector<1x256xf32>
    %333 = arith.addf %324, %332 : vector<1x256xf32>
    %334 = arith.index_cast %arg0 : i32 to index
    %c20 = arith.constant 20 : index
    %335 = memref.load %arg3[%334, %c20] : memref<2x150xf32, #tpu.memory_space<smem>>
    %cst_112 = arith.constant 5.000000e+00 : f32
    %cst_113 = arith.constant 6.000000e+00 : f32
    %336 = vector.broadcast %cst_112 : f32 to vector<1x256xf32>
    %337 = arith.maximumf %336, %285 : vector<1x256xf32>
    %338 = vector.broadcast %cst_113 : f32 to vector<1x256xf32>
    %339 = arith.minimumf %338, %337 : vector<1x256xf32>
    %340 = vector.broadcast %335 : f32 to vector<1x256xf32>
    %341 = arith.mulf %340, %339 : vector<1x256xf32>
    %342 = arith.addf %333, %341 : vector<1x256xf32>
    %343 = arith.index_cast %arg0 : i32 to index
    %c21 = arith.constant 21 : index
    %344 = memref.load %arg3[%343, %c21] : memref<2x150xf32, #tpu.memory_space<smem>>
    %cst_114 = arith.constant 6.000000e+00 : f32
    %cst_115 = arith.constant 7.000000e+00 : f32
    %345 = vector.broadcast %cst_114 : f32 to vector<1x256xf32>
    %346 = arith.maximumf %345, %285 : vector<1x256xf32>
    %347 = vector.broadcast %cst_115 : f32 to vector<1x256xf32>
    %348 = arith.minimumf %347, %346 : vector<1x256xf32>
    %349 = vector.broadcast %344 : f32 to vector<1x256xf32>
    %350 = arith.mulf %349, %348 : vector<1x256xf32>
    %351 = arith.addf %342, %350 : vector<1x256xf32>
    %352 = arith.index_cast %arg0 : i32 to index
    %c22 = arith.constant 22 : index
    %353 = memref.load %arg3[%352, %c22] : memref<2x150xf32, #tpu.memory_space<smem>>
    %cst_116 = arith.constant 7.000000e+00 : f32
    %cst_117 = arith.constant 8.000000e+00 : f32
    %354 = vector.broadcast %cst_116 : f32 to vector<1x256xf32>
    %355 = arith.maximumf %354, %285 : vector<1x256xf32>
    %356 = vector.broadcast %cst_117 : f32 to vector<1x256xf32>
    %357 = arith.minimumf %356, %355 : vector<1x256xf32>
    %358 = vector.broadcast %353 : f32 to vector<1x256xf32>
    %359 = arith.mulf %358, %357 : vector<1x256xf32>
    %360 = arith.addf %351, %359 : vector<1x256xf32>
    %361 = arith.index_cast %arg0 : i32 to index
    %c23 = arith.constant 23 : index
    %362 = memref.load %arg3[%361, %c23] : memref<2x150xf32, #tpu.memory_space<smem>>
    %cst_118 = arith.constant 8.000000e+00 : f32
    %cst_119 = arith.constant 9.000000e+00 : f32
    %363 = vector.broadcast %cst_118 : f32 to vector<1x256xf32>
    %364 = arith.maximumf %363, %285 : vector<1x256xf32>
    %365 = vector.broadcast %cst_119 : f32 to vector<1x256xf32>
    %366 = arith.minimumf %365, %364 : vector<1x256xf32>
    %367 = vector.broadcast %362 : f32 to vector<1x256xf32>
    %368 = arith.mulf %367, %366 : vector<1x256xf32>
    %369 = arith.addf %360, %368 : vector<1x256xf32>
    %370 = arith.index_cast %arg0 : i32 to index
    %c24 = arith.constant 24 : index
    %371 = memref.load %arg3[%370, %c24] : memref<2x150xf32, #tpu.memory_space<smem>>
    %cst_120 = arith.constant 9.000000e+00 : f32
    %cst_121 = arith.constant 1.000000e+01 : f32
    %372 = vector.broadcast %cst_120 : f32 to vector<1x256xf32>
    %373 = arith.maximumf %372, %285 : vector<1x256xf32>
    %374 = vector.broadcast %cst_121 : f32 to vector<1x256xf32>
    %375 = arith.minimumf %374, %373 : vector<1x256xf32>
    %376 = vector.broadcast %371 : f32 to vector<1x256xf32>
    %377 = arith.mulf %376, %375 : vector<1x256xf32>
    %378 = arith.addf %369, %377 : vector<1x256xf32>
    %379 = arith.index_cast %arg0 : i32 to index
    %c25 = arith.constant 25 : index
    %380 = memref.load %arg3[%379, %c25] : memref<2x150xf32, #tpu.memory_space<smem>>
    %cst_122 = arith.constant 1.000000e+01 : f32
    %cst_123 = arith.constant 1.100000e+01 : f32
    %381 = vector.broadcast %cst_122 : f32 to vector<1x256xf32>
    %382 = arith.maximumf %381, %285 : vector<1x256xf32>
    %383 = vector.broadcast %cst_123 : f32 to vector<1x256xf32>
    %384 = arith.minimumf %383, %382 : vector<1x256xf32>
    %385 = vector.broadcast %380 : f32 to vector<1x256xf32>
    %386 = arith.mulf %385, %384 : vector<1x256xf32>
    %387 = arith.addf %378, %386 : vector<1x256xf32>
    %388 = arith.index_cast %arg0 : i32 to index
    %c26 = arith.constant 26 : index
    %389 = memref.load %arg3[%388, %c26] : memref<2x150xf32, #tpu.memory_space<smem>>
    %cst_124 = arith.constant 1.100000e+01 : f32
    %cst_125 = arith.constant 1.200000e+01 : f32
    %390 = vector.broadcast %cst_124 : f32 to vector<1x256xf32>
    %391 = arith.maximumf %390, %285 : vector<1x256xf32>
    %392 = vector.broadcast %cst_125 : f32 to vector<1x256xf32>
    %393 = arith.minimumf %392, %391 : vector<1x256xf32>
    %394 = vector.broadcast %389 : f32 to vector<1x256xf32>
    %395 = arith.mulf %394, %393 : vector<1x256xf32>
    %396 = arith.addf %387, %395 : vector<1x256xf32>
    %397 = arith.index_cast %arg0 : i32 to index
    %c27 = arith.constant 27 : index
    %398 = memref.load %arg3[%397, %c27] : memref<2x150xf32, #tpu.memory_space<smem>>
    %cst_126 = arith.constant 1.200000e+01 : f32
    %cst_127 = arith.constant 1.300000e+01 : f32
    %399 = vector.broadcast %cst_126 : f32 to vector<1x256xf32>
    %400 = arith.maximumf %399, %285 : vector<1x256xf32>
    %401 = vector.broadcast %cst_127 : f32 to vector<1x256xf32>
    %402 = arith.minimumf %401, %400 : vector<1x256xf32>
    %403 = vector.broadcast %398 : f32 to vector<1x256xf32>
    %404 = arith.mulf %403, %402 : vector<1x256xf32>
    %405 = arith.addf %396, %404 : vector<1x256xf32>
    %406 = arith.index_cast %arg0 : i32 to index
    %c28 = arith.constant 28 : index
    %407 = memref.load %arg3[%406, %c28] : memref<2x150xf32, #tpu.memory_space<smem>>
    %cst_128 = arith.constant 1.300000e+01 : f32
    %cst_129 = arith.constant 1.400000e+01 : f32
    %408 = vector.broadcast %cst_128 : f32 to vector<1x256xf32>
    %409 = arith.maximumf %408, %285 : vector<1x256xf32>
    %410 = vector.broadcast %cst_129 : f32 to vector<1x256xf32>
    %411 = arith.minimumf %410, %409 : vector<1x256xf32>
    %412 = vector.broadcast %407 : f32 to vector<1x256xf32>
    %413 = arith.mulf %412, %411 : vector<1x256xf32>
    %414 = arith.addf %405, %413 : vector<1x256xf32>
    %415 = arith.index_cast %arg0 : i32 to index
    %c29 = arith.constant 29 : index
    %416 = memref.load %arg3[%415, %c29] : memref<2x150xf32, #tpu.memory_space<smem>>
    %cst_130 = arith.constant 1.400000e+01 : f32
    %cst_131 = arith.constant 1.500000e+01 : f32
    %417 = vector.broadcast %cst_130 : f32 to vector<1x256xf32>
    %418 = arith.maximumf %417, %285 : vector<1x256xf32>
    %419 = vector.broadcast %cst_131 : f32 to vector<1x256xf32>
    %420 = arith.minimumf %419, %418 : vector<1x256xf32>
    %421 = vector.broadcast %416 : f32 to vector<1x256xf32>
    %422 = arith.mulf %421, %420 : vector<1x256xf32>
    %423 = arith.addf %414, %422 : vector<1x256xf32>
    %424 = arith.mulf %128, %423 : vector<1x256xf32>
    %cst_132 = arith.constant 0.000000e+00 : f32
    %cst_133 = arith.constant 1.000000e+00 : f32
    %425 = vector.broadcast %cst_132 : f32 to vector<1x256xf32>
    %426 = arith.maximumf %425, %424 : vector<1x256xf32>
    %427 = vector.broadcast %cst_133 : f32 to vector<1x256xf32>
    %428 = arith.minimumf %427, %426 : vector<1x256xf32>
    %429 = arith.mulf %428, %13 : vector<1x256xf32>
    %cst_134 = arith.constant 1.500000e+01 : f32
    %430 = vector.broadcast %cst_134 : f32 to vector<1x256xf32>
    %431 = arith.mulf %137, %430 : vector<1x256xf32>
    %432 = arith.index_cast %arg0 : i32 to index
    %c2_135 = arith.constant 2 : index
    %433 = memref.load %arg2[%432, %c2_135] : memref<2x10xf32, #tpu.memory_space<smem>>
    %434 = arith.index_cast %arg0 : i32 to index
    %c30 = arith.constant 30 : index
    %435 = memref.load %arg3[%434, %c30] : memref<2x150xf32, #tpu.memory_space<smem>>
    %cst_136 = arith.constant 0.000000e+00 : f32
    %cst_137 = arith.constant 1.000000e+00 : f32
    %436 = vector.broadcast %cst_136 : f32 to vector<1x256xf32>
    %437 = arith.maximumf %436, %431 : vector<1x256xf32>
    %438 = vector.broadcast %cst_137 : f32 to vector<1x256xf32>
    %439 = arith.minimumf %438, %437 : vector<1x256xf32>
    %440 = vector.broadcast %435 : f32 to vector<1x256xf32>
    %441 = arith.mulf %440, %439 : vector<1x256xf32>
    %442 = vector.broadcast %433 : f32 to vector<1x256xf32>
    %443 = arith.addf %442, %441 : vector<1x256xf32>
    %444 = arith.index_cast %arg0 : i32 to index
    %c31 = arith.constant 31 : index
    %445 = memref.load %arg3[%444, %c31] : memref<2x150xf32, #tpu.memory_space<smem>>
    %cst_138 = arith.constant 1.000000e+00 : f32
    %cst_139 = arith.constant 2.000000e+00 : f32
    %446 = vector.broadcast %cst_138 : f32 to vector<1x256xf32>
    %447 = arith.maximumf %446, %431 : vector<1x256xf32>
    %448 = vector.broadcast %cst_139 : f32 to vector<1x256xf32>
    %449 = arith.minimumf %448, %447 : vector<1x256xf32>
    %450 = vector.broadcast %445 : f32 to vector<1x256xf32>
    %451 = arith.mulf %450, %449 : vector<1x256xf32>
    %452 = arith.addf %443, %451 : vector<1x256xf32>
    %453 = arith.index_cast %arg0 : i32 to index
    %c32 = arith.constant 32 : index
    %454 = memref.load %arg3[%453, %c32] : memref<2x150xf32, #tpu.memory_space<smem>>
    %cst_140 = arith.constant 2.000000e+00 : f32
    %cst_141 = arith.constant 3.000000e+00 : f32
    %455 = vector.broadcast %cst_140 : f32 to vector<1x256xf32>
    %456 = arith.maximumf %455, %431 : vector<1x256xf32>
    %457 = vector.broadcast %cst_141 : f32 to vector<1x256xf32>
    %458 = arith.minimumf %457, %456 : vector<1x256xf32>
    %459 = vector.broadcast %454 : f32 to vector<1x256xf32>
    %460 = arith.mulf %459, %458 : vector<1x256xf32>
    %461 = arith.addf %452, %460 : vector<1x256xf32>
    %462 = arith.index_cast %arg0 : i32 to index
    %c33 = arith.constant 33 : index
    %463 = memref.load %arg3[%462, %c33] : memref<2x150xf32, #tpu.memory_space<smem>>
    %cst_142 = arith.constant 3.000000e+00 : f32
    %cst_143 = arith.constant 4.000000e+00 : f32
    %464 = vector.broadcast %cst_142 : f32 to vector<1x256xf32>
    %465 = arith.maximumf %464, %431 : vector<1x256xf32>
    %466 = vector.broadcast %cst_143 : f32 to vector<1x256xf32>
    %467 = arith.minimumf %466, %465 : vector<1x256xf32>
    %468 = vector.broadcast %463 : f32 to vector<1x256xf32>
    %469 = arith.mulf %468, %467 : vector<1x256xf32>
    %470 = arith.addf %461, %469 : vector<1x256xf32>
    %471 = arith.index_cast %arg0 : i32 to index
    %c34 = arith.constant 34 : index
    %472 = memref.load %arg3[%471, %c34] : memref<2x150xf32, #tpu.memory_space<smem>>
    %cst_144 = arith.constant 4.000000e+00 : f32
    %cst_145 = arith.constant 5.000000e+00 : f32
    %473 = vector.broadcast %cst_144 : f32 to vector<1x256xf32>
    %474 = arith.maximumf %473, %431 : vector<1x256xf32>
    %475 = vector.broadcast %cst_145 : f32 to vector<1x256xf32>
    %476 = arith.minimumf %475, %474 : vector<1x256xf32>
    %477 = vector.broadcast %472 : f32 to vector<1x256xf32>
    %478 = arith.mulf %477, %476 : vector<1x256xf32>
    %479 = arith.addf %470, %478 : vector<1x256xf32>
    %480 = arith.index_cast %arg0 : i32 to index
    %c35 = arith.constant 35 : index
    %481 = memref.load %arg3[%480, %c35] : memref<2x150xf32, #tpu.memory_space<smem>>
    %cst_146 = arith.constant 5.000000e+00 : f32
    %cst_147 = arith.constant 6.000000e+00 : f32
    %482 = vector.broadcast %cst_146 : f32 to vector<1x256xf32>
    %483 = arith.maximumf %482, %431 : vector<1x256xf32>
    %484 = vector.broadcast %cst_147 : f32 to vector<1x256xf32>
    %485 = arith.minimumf %484, %483 : vector<1x256xf32>
    %486 = vector.broadcast %481 : f32 to vector<1x256xf32>
    %487 = arith.mulf %486, %485 : vector<1x256xf32>
    %488 = arith.addf %479, %487 : vector<1x256xf32>
    %489 = arith.index_cast %arg0 : i32 to index
    %c36 = arith.constant 36 : index
    %490 = memref.load %arg3[%489, %c36] : memref<2x150xf32, #tpu.memory_space<smem>>
    %cst_148 = arith.constant 6.000000e+00 : f32
    %cst_149 = arith.constant 7.000000e+00 : f32
    %491 = vector.broadcast %cst_148 : f32 to vector<1x256xf32>
    %492 = arith.maximumf %491, %431 : vector<1x256xf32>
    %493 = vector.broadcast %cst_149 : f32 to vector<1x256xf32>
    %494 = arith.minimumf %493, %492 : vector<1x256xf32>
    %495 = vector.broadcast %490 : f32 to vector<1x256xf32>
    %496 = arith.mulf %495, %494 : vector<1x256xf32>
    %497 = arith.addf %488, %496 : vector<1x256xf32>
    %498 = arith.index_cast %arg0 : i32 to index
    %c37 = arith.constant 37 : index
    %499 = memref.load %arg3[%498, %c37] : memref<2x150xf32, #tpu.memory_space<smem>>
    %cst_150 = arith.constant 7.000000e+00 : f32
    %cst_151 = arith.constant 8.000000e+00 : f32
    %500 = vector.broadcast %cst_150 : f32 to vector<1x256xf32>
    %501 = arith.maximumf %500, %431 : vector<1x256xf32>
    %502 = vector.broadcast %cst_151 : f32 to vector<1x256xf32>
    %503 = arith.minimumf %502, %501 : vector<1x256xf32>
    %504 = vector.broadcast %499 : f32 to vector<1x256xf32>
    %505 = arith.mulf %504, %503 : vector<1x256xf32>
    %506 = arith.addf %497, %505 : vector<1x256xf32>
    %507 = arith.index_cast %arg0 : i32 to index
    %c38 = arith.constant 38 : index
    %508 = memref.load %arg3[%507, %c38] : memref<2x150xf32, #tpu.memory_space<smem>>
    %cst_152 = arith.constant 8.000000e+00 : f32
    %cst_153 = arith.constant 9.000000e+00 : f32
    %509 = vector.broadcast %cst_152 : f32 to vector<1x256xf32>
    %510 = arith.maximumf %509, %431 : vector<1x256xf32>
    %511 = vector.broadcast %cst_153 : f32 to vector<1x256xf32>
    %512 = arith.minimumf %511, %510 : vector<1x256xf32>
    %513 = vector.broadcast %508 : f32 to vector<1x256xf32>
    %514 = arith.mulf %513, %512 : vector<1x256xf32>
    %515 = arith.addf %506, %514 : vector<1x256xf32>
    %516 = arith.index_cast %arg0 : i32 to index
    %c39 = arith.constant 39 : index
    %517 = memref.load %arg3[%516, %c39] : memref<2x150xf32, #tpu.memory_space<smem>>
    %cst_154 = arith.constant 9.000000e+00 : f32
    %cst_155 = arith.constant 1.000000e+01 : f32
    %518 = vector.broadcast %cst_154 : f32 to vector<1x256xf32>
    %519 = arith.maximumf %518, %431 : vector<1x256xf32>
    %520 = vector.broadcast %cst_155 : f32 to vector<1x256xf32>
    %521 = arith.minimumf %520, %519 : vector<1x256xf32>
    %522 = vector.broadcast %517 : f32 to vector<1x256xf32>
    %523 = arith.mulf %522, %521 : vector<1x256xf32>
    %524 = arith.addf %515, %523 : vector<1x256xf32>
    %525 = arith.index_cast %arg0 : i32 to index
    %c40 = arith.constant 40 : index
    %526 = memref.load %arg3[%525, %c40] : memref<2x150xf32, #tpu.memory_space<smem>>
    %cst_156 = arith.constant 1.000000e+01 : f32
    %cst_157 = arith.constant 1.100000e+01 : f32
    %527 = vector.broadcast %cst_156 : f32 to vector<1x256xf32>
    %528 = arith.maximumf %527, %431 : vector<1x256xf32>
    %529 = vector.broadcast %cst_157 : f32 to vector<1x256xf32>
    %530 = arith.minimumf %529, %528 : vector<1x256xf32>
    %531 = vector.broadcast %526 : f32 to vector<1x256xf32>
    %532 = arith.mulf %531, %530 : vector<1x256xf32>
    %533 = arith.addf %524, %532 : vector<1x256xf32>
    %534 = arith.index_cast %arg0 : i32 to index
    %c41 = arith.constant 41 : index
    %535 = memref.load %arg3[%534, %c41] : memref<2x150xf32, #tpu.memory_space<smem>>
    %cst_158 = arith.constant 1.100000e+01 : f32
    %cst_159 = arith.constant 1.200000e+01 : f32
    %536 = vector.broadcast %cst_158 : f32 to vector<1x256xf32>
    %537 = arith.maximumf %536, %431 : vector<1x256xf32>
    %538 = vector.broadcast %cst_159 : f32 to vector<1x256xf32>
    %539 = arith.minimumf %538, %537 : vector<1x256xf32>
    %540 = vector.broadcast %535 : f32 to vector<1x256xf32>
    %541 = arith.mulf %540, %539 : vector<1x256xf32>
    %542 = arith.addf %533, %541 : vector<1x256xf32>
    %543 = arith.index_cast %arg0 : i32 to index
    %c42 = arith.constant 42 : index
    %544 = memref.load %arg3[%543, %c42] : memref<2x150xf32, #tpu.memory_space<smem>>
    %cst_160 = arith.constant 1.200000e+01 : f32
    %cst_161 = arith.constant 1.300000e+01 : f32
    %545 = vector.broadcast %cst_160 : f32 to vector<1x256xf32>
    %546 = arith.maximumf %545, %431 : vector<1x256xf32>
    %547 = vector.broadcast %cst_161 : f32 to vector<1x256xf32>
    %548 = arith.minimumf %547, %546 : vector<1x256xf32>
    %549 = vector.broadcast %544 : f32 to vector<1x256xf32>
    %550 = arith.mulf %549, %548 : vector<1x256xf32>
    %551 = arith.addf %542, %550 : vector<1x256xf32>
    %552 = arith.index_cast %arg0 : i32 to index
    %c43 = arith.constant 43 : index
    %553 = memref.load %arg3[%552, %c43] : memref<2x150xf32, #tpu.memory_space<smem>>
    %cst_162 = arith.constant 1.300000e+01 : f32
    %cst_163 = arith.constant 1.400000e+01 : f32
    %554 = vector.broadcast %cst_162 : f32 to vector<1x256xf32>
    %555 = arith.maximumf %554, %431 : vector<1x256xf32>
    %556 = vector.broadcast %cst_163 : f32 to vector<1x256xf32>
    %557 = arith.minimumf %556, %555 : vector<1x256xf32>
    %558 = vector.broadcast %553 : f32 to vector<1x256xf32>
    %559 = arith.mulf %558, %557 : vector<1x256xf32>
    %560 = arith.addf %551, %559 : vector<1x256xf32>
    %561 = arith.index_cast %arg0 : i32 to index
    %c44 = arith.constant 44 : index
    %562 = memref.load %arg3[%561, %c44] : memref<2x150xf32, #tpu.memory_space<smem>>
    %cst_164 = arith.constant 1.400000e+01 : f32
    %cst_165 = arith.constant 1.500000e+01 : f32
    %563 = vector.broadcast %cst_164 : f32 to vector<1x256xf32>
    %564 = arith.maximumf %563, %431 : vector<1x256xf32>
    %565 = vector.broadcast %cst_165 : f32 to vector<1x256xf32>
    %566 = arith.minimumf %565, %564 : vector<1x256xf32>
    %567 = vector.broadcast %562 : f32 to vector<1x256xf32>
    %568 = arith.mulf %567, %566 : vector<1x256xf32>
    %569 = arith.addf %560, %568 : vector<1x256xf32>
    %570 = arith.mulf %137, %569 : vector<1x256xf32>
    %cst_166 = arith.constant 0.000000e+00 : f32
    %cst_167 = arith.constant 1.000000e+00 : f32
    %571 = vector.broadcast %cst_166 : f32 to vector<1x256xf32>
    %572 = arith.maximumf %571, %570 : vector<1x256xf32>
    %573 = vector.broadcast %cst_167 : f32 to vector<1x256xf32>
    %574 = arith.minimumf %573, %572 : vector<1x256xf32>
    %575 = arith.mulf %574, %13 : vector<1x256xf32>
    %cst_168 = arith.constant 1.000000e+02 : f32
    %576 = vector.broadcast %cst_168 : f32 to vector<1x256xf32>
    %577 = arith.mulf %283, %576 : vector<1x256xf32>
    %cst_169 = arith.constant 2.000000e+00 : f32
    %578 = vector.broadcast %cst_169 : f32 to vector<1x256xf32>
    %579 = arith.mulf %429, %578 : vector<1x256xf32>
    %cst_170 = arith.constant 1.000000e+00 : f32
    %580 = vector.broadcast %cst_170 : f32 to vector<1x256xf32>
    %581 = arith.subf %579, %580 : vector<1x256xf32>
    %cst_171 = arith.constant 1.100000e+02 : f32
    %582 = vector.broadcast %cst_171 : f32 to vector<1x256xf32>
    %583 = arith.mulf %581, %582 : vector<1x256xf32>
    %cst_172 = arith.constant 2.000000e+00 : f32
    %584 = vector.broadcast %cst_172 : f32 to vector<1x256xf32>
    %585 = arith.mulf %575, %584 : vector<1x256xf32>
    %cst_173 = arith.constant 1.000000e+00 : f32
    %586 = vector.broadcast %cst_173 : f32 to vector<1x256xf32>
    %587 = arith.subf %585, %586 : vector<1x256xf32>
    %cst_174 = arith.constant 1.100000e+02 : f32
    %588 = vector.broadcast %cst_174 : f32 to vector<1x256xf32>
    %589 = arith.mulf %587, %588 : vector<1x256xf32>
    %cst_175 = arith.constant 1.600000e+01 : f32
    %590 = vector.broadcast %cst_175 : f32 to vector<1x256xf32>
    %591 = arith.addf %577, %590 : vector<1x256xf32>
    %cst_176 = arith.constant 8.620690e-03 : f32
    %592 = vector.broadcast %cst_176 : f32 to vector<1x256xf32>
    %593 = arith.mulf %591, %592 : vector<1x256xf32>
    %cst_177 = arith.constant 2.000000e-03 : f32
    %594 = vector.broadcast %cst_177 : f32 to vector<1x256xf32>
    %595 = arith.mulf %583, %594 : vector<1x256xf32>
    %596 = arith.addf %593, %595 : vector<1x256xf32>
    %cst_178 = arith.constant 5.000000e-03 : f32
    %597 = vector.broadcast %cst_178 : f32 to vector<1x256xf32>
    %598 = arith.mulf %589, %597 : vector<1x256xf32>
    %599 = arith.subf %593, %598 : vector<1x256xf32>
    %cst_179 = arith.constant 0.206896558 : f32
    %600 = vector.broadcast %cst_179 : f32 to vector<1x256xf32>
    %601 = arith.cmpf ole, %596, %600 : vector<1x256xf32>
    %cst_180 = arith.constant 0.137931034 : f32
    %602 = vector.broadcast %cst_180 : f32 to vector<1x256xf32>
    %603 = arith.subf %596, %602 : vector<1x256xf32>
    %cst_181 = arith.constant 0.12841855 : f32
    %604 = vector.broadcast %cst_181 : f32 to vector<1x256xf32>
    %605 = arith.mulf %604, %603 : vector<1x256xf32>
    %cst_182 = arith.constant 9.99999974E-5 : f32
    %606 = vector.broadcast %cst_182 : f32 to vector<1x256xf32>
    %607 = arith.maximumf %596, %606 : vector<1x256xf32>
    %cst_183 = arith.constant 3.000000e+00 : f32
    %608 = vector.broadcast %cst_183 : f32 to vector<1x256xf32>
    %609 = math.powf %607, %608 : vector<1x256xf32>
    %610 = arith.select %601, %605, %609 : vector<1x256xi1>, vector<1x256xf32>
    %cst_184 = arith.constant 9.504560e-01 : f32
    %611 = vector.broadcast %cst_184 : f32 to vector<1x256xf32>
    %612 = arith.mulf %610, %611 : vector<1x256xf32>
    %cst_185 = arith.constant 0.206896558 : f32
    %613 = vector.broadcast %cst_185 : f32 to vector<1x256xf32>
    %614 = arith.cmpf ole, %593, %613 : vector<1x256xf32>
    %cst_186 = arith.constant 0.137931034 : f32
    %615 = vector.broadcast %cst_186 : f32 to vector<1x256xf32>
    %616 = arith.subf %593, %615 : vector<1x256xf32>
    %cst_187 = arith.constant 0.12841855 : f32
    %617 = vector.broadcast %cst_187 : f32 to vector<1x256xf32>
    %618 = arith.mulf %617, %616 : vector<1x256xf32>
    %cst_188 = arith.constant 9.99999974E-5 : f32
    %619 = vector.broadcast %cst_188 : f32 to vector<1x256xf32>
    %620 = arith.maximumf %593, %619 : vector<1x256xf32>
    %cst_189 = arith.constant 3.000000e+00 : f32
    %621 = vector.broadcast %cst_189 : f32 to vector<1x256xf32>
    %622 = math.powf %620, %621 : vector<1x256xf32>
    %623 = arith.select %614, %618, %622 : vector<1x256xi1>, vector<1x256xf32>
    %cst_190 = arith.constant 0.206896558 : f32
    %624 = vector.broadcast %cst_190 : f32 to vector<1x256xf32>
    %625 = arith.cmpf ole, %599, %624 : vector<1x256xf32>
    %cst_191 = arith.constant 0.137931034 : f32
    %626 = vector.broadcast %cst_191 : f32 to vector<1x256xf32>
    %627 = arith.subf %599, %626 : vector<1x256xf32>
    %cst_192 = arith.constant 0.12841855 : f32
    %628 = vector.broadcast %cst_192 : f32 to vector<1x256xf32>
    %629 = arith.mulf %628, %627 : vector<1x256xf32>
    %cst_193 = arith.constant 9.99999974E-5 : f32
    %630 = vector.broadcast %cst_193 : f32 to vector<1x256xf32>
    %631 = arith.maximumf %599, %630 : vector<1x256xf32>
    %cst_194 = arith.constant 3.000000e+00 : f32
    %632 = vector.broadcast %cst_194 : f32 to vector<1x256xf32>
    %633 = math.powf %631, %632 : vector<1x256xf32>
    %634 = arith.select %625, %629, %633 : vector<1x256xi1>, vector<1x256xf32>
    %cst_195 = arith.constant 1.08875406 : f32
    %635 = vector.broadcast %cst_195 : f32 to vector<1x256xf32>
    %636 = arith.mulf %634, %635 : vector<1x256xf32>
    %cst_196 = arith.constant 3.2404542 : f32
    %637 = vector.broadcast %cst_196 : f32 to vector<1x256xf32>
    %638 = arith.mulf %637, %612 : vector<1x256xf32>
    %cst_197 = arith.constant 1.53713846 : f32
    %639 = vector.broadcast %cst_197 : f32 to vector<1x256xf32>
    %640 = arith.mulf %639, %623 : vector<1x256xf32>
    %641 = arith.subf %638, %640 : vector<1x256xf32>
    %cst_198 = arith.constant 0.498531401 : f32
    %642 = vector.broadcast %cst_198 : f32 to vector<1x256xf32>
    %643 = arith.mulf %642, %636 : vector<1x256xf32>
    %644 = arith.subf %641, %643 : vector<1x256xf32>
    %cst_199 = arith.constant -0.969265997 : f32
    %645 = vector.broadcast %cst_199 : f32 to vector<1x256xf32>
    %646 = arith.mulf %645, %612 : vector<1x256xf32>
    %cst_200 = arith.constant 1.87601078 : f32
    %647 = vector.broadcast %cst_200 : f32 to vector<1x256xf32>
    %648 = arith.mulf %647, %623 : vector<1x256xf32>
    %649 = arith.addf %646, %648 : vector<1x256xf32>
    %cst_201 = arith.constant 4.155600e-02 : f32
    %650 = vector.broadcast %cst_201 : f32 to vector<1x256xf32>
    %651 = arith.mulf %650, %636 : vector<1x256xf32>
    %652 = arith.addf %649, %651 : vector<1x256xf32>
    %cst_202 = arith.constant 5.564340e-02 : f32
    %653 = vector.broadcast %cst_202 : f32 to vector<1x256xf32>
    %654 = arith.mulf %653, %612 : vector<1x256xf32>
    %cst_203 = arith.constant 0.204025894 : f32
    %655 = vector.broadcast %cst_203 : f32 to vector<1x256xf32>
    %656 = arith.mulf %655, %623 : vector<1x256xf32>
    %657 = arith.subf %654, %656 : vector<1x256xf32>
    %cst_204 = arith.constant 1.05722523 : f32
    %658 = vector.broadcast %cst_204 : f32 to vector<1x256xf32>
    %659 = arith.mulf %658, %636 : vector<1x256xf32>
    %660 = arith.addf %657, %659 : vector<1x256xf32>
    %cst_205 = arith.constant 3.130800e-03 : f32
    %661 = vector.broadcast %cst_205 : f32 to vector<1x256xf32>
    %662 = arith.cmpf ole, %644, %661 : vector<1x256xf32>
    %cst_206 = arith.constant 1.292000e+01 : f32
    %663 = vector.broadcast %cst_206 : f32 to vector<1x256xf32>
    %664 = arith.mulf %644, %663 : vector<1x256xf32>
    %cst_207 = arith.constant 9.99999974E-5 : f32
    %665 = vector.broadcast %cst_207 : f32 to vector<1x256xf32>
    %666 = arith.maximumf %644, %665 : vector<1x256xf32>
    %cst_208 = arith.constant 0.416666657 : f32
    %667 = vector.broadcast %cst_208 : f32 to vector<1x256xf32>
    %668 = math.powf %666, %667 : vector<1x256xf32>
    %cst_209 = arith.constant 1.055000e+00 : f32
    %669 = vector.broadcast %cst_209 : f32 to vector<1x256xf32>
    %670 = arith.mulf %669, %668 : vector<1x256xf32>
    %cst_210 = arith.constant 5.500000e-02 : f32
    %671 = vector.broadcast %cst_210 : f32 to vector<1x256xf32>
    %672 = arith.subf %670, %671 : vector<1x256xf32>
    %673 = arith.select %662, %664, %672 : vector<1x256xi1>, vector<1x256xf32>
    %cst_211 = arith.constant 3.130800e-03 : f32
    %674 = vector.broadcast %cst_211 : f32 to vector<1x256xf32>
    %675 = arith.cmpf ole, %652, %674 : vector<1x256xf32>
    %cst_212 = arith.constant 1.292000e+01 : f32
    %676 = vector.broadcast %cst_212 : f32 to vector<1x256xf32>
    %677 = arith.mulf %652, %676 : vector<1x256xf32>
    %cst_213 = arith.constant 9.99999974E-5 : f32
    %678 = vector.broadcast %cst_213 : f32 to vector<1x256xf32>
    %679 = arith.maximumf %652, %678 : vector<1x256xf32>
    %cst_214 = arith.constant 0.416666657 : f32
    %680 = vector.broadcast %cst_214 : f32 to vector<1x256xf32>
    %681 = math.powf %679, %680 : vector<1x256xf32>
    %cst_215 = arith.constant 1.055000e+00 : f32
    %682 = vector.broadcast %cst_215 : f32 to vector<1x256xf32>
    %683 = arith.mulf %682, %681 : vector<1x256xf32>
    %cst_216 = arith.constant 5.500000e-02 : f32
    %684 = vector.broadcast %cst_216 : f32 to vector<1x256xf32>
    %685 = arith.subf %683, %684 : vector<1x256xf32>
    %686 = arith.select %675, %677, %685 : vector<1x256xi1>, vector<1x256xf32>
    %cst_217 = arith.constant 3.130800e-03 : f32
    %687 = vector.broadcast %cst_217 : f32 to vector<1x256xf32>
    %688 = arith.cmpf ole, %660, %687 : vector<1x256xf32>
    %cst_218 = arith.constant 1.292000e+01 : f32
    %689 = vector.broadcast %cst_218 : f32 to vector<1x256xf32>
    %690 = arith.mulf %660, %689 : vector<1x256xf32>
    %cst_219 = arith.constant 9.99999974E-5 : f32
    %691 = vector.broadcast %cst_219 : f32 to vector<1x256xf32>
    %692 = arith.maximumf %660, %691 : vector<1x256xf32>
    %cst_220 = arith.constant 0.416666657 : f32
    %693 = vector.broadcast %cst_220 : f32 to vector<1x256xf32>
    %694 = math.powf %692, %693 : vector<1x256xf32>
    %cst_221 = arith.constant 1.055000e+00 : f32
    %695 = vector.broadcast %cst_221 : f32 to vector<1x256xf32>
    %696 = arith.mulf %695, %694 : vector<1x256xf32>
    %cst_222 = arith.constant 5.500000e-02 : f32
    %697 = vector.broadcast %cst_222 : f32 to vector<1x256xf32>
    %698 = arith.subf %696, %697 : vector<1x256xf32>
    %699 = arith.select %688, %690, %698 : vector<1x256xi1>, vector<1x256xf32>
    %cst_223 = arith.constant 1.500000e+01 : f32
    %700 = vector.broadcast %cst_223 : f32 to vector<1x256xf32>
    %701 = arith.mulf %673, %700 : vector<1x256xf32>
    %702 = arith.index_cast %arg0 : i32 to index
    %c3_224 = arith.constant 3 : index
    %703 = memref.load %arg2[%702, %c3_224] : memref<2x10xf32, #tpu.memory_space<smem>>
    %704 = arith.index_cast %arg0 : i32 to index
    %c45 = arith.constant 45 : index
    %705 = memref.load %arg3[%704, %c45] : memref<2x150xf32, #tpu.memory_space<smem>>
    %cst_225 = arith.constant 0.000000e+00 : f32
    %cst_226 = arith.constant 1.000000e+00 : f32
    %706 = vector.broadcast %cst_225 : f32 to vector<1x256xf32>
    %707 = arith.maximumf %706, %701 : vector<1x256xf32>
    %708 = vector.broadcast %cst_226 : f32 to vector<1x256xf32>
    %709 = arith.minimumf %708, %707 : vector<1x256xf32>
    %710 = vector.broadcast %705 : f32 to vector<1x256xf32>
    %711 = arith.mulf %710, %709 : vector<1x256xf32>
    %712 = vector.broadcast %703 : f32 to vector<1x256xf32>
    %713 = arith.addf %712, %711 : vector<1x256xf32>
    %714 = arith.index_cast %arg0 : i32 to index
    %c46 = arith.constant 46 : index
    %715 = memref.load %arg3[%714, %c46] : memref<2x150xf32, #tpu.memory_space<smem>>
    %cst_227 = arith.constant 1.000000e+00 : f32
    %cst_228 = arith.constant 2.000000e+00 : f32
    %716 = vector.broadcast %cst_227 : f32 to vector<1x256xf32>
    %717 = arith.maximumf %716, %701 : vector<1x256xf32>
    %718 = vector.broadcast %cst_228 : f32 to vector<1x256xf32>
    %719 = arith.minimumf %718, %717 : vector<1x256xf32>
    %720 = vector.broadcast %715 : f32 to vector<1x256xf32>
    %721 = arith.mulf %720, %719 : vector<1x256xf32>
    %722 = arith.addf %713, %721 : vector<1x256xf32>
    %723 = arith.index_cast %arg0 : i32 to index
    %c47 = arith.constant 47 : index
    %724 = memref.load %arg3[%723, %c47] : memref<2x150xf32, #tpu.memory_space<smem>>
    %cst_229 = arith.constant 2.000000e+00 : f32
    %cst_230 = arith.constant 3.000000e+00 : f32
    %725 = vector.broadcast %cst_229 : f32 to vector<1x256xf32>
    %726 = arith.maximumf %725, %701 : vector<1x256xf32>
    %727 = vector.broadcast %cst_230 : f32 to vector<1x256xf32>
    %728 = arith.minimumf %727, %726 : vector<1x256xf32>
    %729 = vector.broadcast %724 : f32 to vector<1x256xf32>
    %730 = arith.mulf %729, %728 : vector<1x256xf32>
    %731 = arith.addf %722, %730 : vector<1x256xf32>
    %732 = arith.index_cast %arg0 : i32 to index
    %c48 = arith.constant 48 : index
    %733 = memref.load %arg3[%732, %c48] : memref<2x150xf32, #tpu.memory_space<smem>>
    %cst_231 = arith.constant 3.000000e+00 : f32
    %cst_232 = arith.constant 4.000000e+00 : f32
    %734 = vector.broadcast %cst_231 : f32 to vector<1x256xf32>
    %735 = arith.maximumf %734, %701 : vector<1x256xf32>
    %736 = vector.broadcast %cst_232 : f32 to vector<1x256xf32>
    %737 = arith.minimumf %736, %735 : vector<1x256xf32>
    %738 = vector.broadcast %733 : f32 to vector<1x256xf32>
    %739 = arith.mulf %738, %737 : vector<1x256xf32>
    %740 = arith.addf %731, %739 : vector<1x256xf32>
    %741 = arith.index_cast %arg0 : i32 to index
    %c49 = arith.constant 49 : index
    %742 = memref.load %arg3[%741, %c49] : memref<2x150xf32, #tpu.memory_space<smem>>
    %cst_233 = arith.constant 4.000000e+00 : f32
    %cst_234 = arith.constant 5.000000e+00 : f32
    %743 = vector.broadcast %cst_233 : f32 to vector<1x256xf32>
    %744 = arith.maximumf %743, %701 : vector<1x256xf32>
    %745 = vector.broadcast %cst_234 : f32 to vector<1x256xf32>
    %746 = arith.minimumf %745, %744 : vector<1x256xf32>
    %747 = vector.broadcast %742 : f32 to vector<1x256xf32>
    %748 = arith.mulf %747, %746 : vector<1x256xf32>
    %749 = arith.addf %740, %748 : vector<1x256xf32>
    %750 = arith.index_cast %arg0 : i32 to index
    %c50 = arith.constant 50 : index
    %751 = memref.load %arg3[%750, %c50] : memref<2x150xf32, #tpu.memory_space<smem>>
    %cst_235 = arith.constant 5.000000e+00 : f32
    %cst_236 = arith.constant 6.000000e+00 : f32
    %752 = vector.broadcast %cst_235 : f32 to vector<1x256xf32>
    %753 = arith.maximumf %752, %701 : vector<1x256xf32>
    %754 = vector.broadcast %cst_236 : f32 to vector<1x256xf32>
    %755 = arith.minimumf %754, %753 : vector<1x256xf32>
    %756 = vector.broadcast %751 : f32 to vector<1x256xf32>
    %757 = arith.mulf %756, %755 : vector<1x256xf32>
    %758 = arith.addf %749, %757 : vector<1x256xf32>
    %759 = arith.index_cast %arg0 : i32 to index
    %c51 = arith.constant 51 : index
    %760 = memref.load %arg3[%759, %c51] : memref<2x150xf32, #tpu.memory_space<smem>>
    %cst_237 = arith.constant 6.000000e+00 : f32
    %cst_238 = arith.constant 7.000000e+00 : f32
    %761 = vector.broadcast %cst_237 : f32 to vector<1x256xf32>
    %762 = arith.maximumf %761, %701 : vector<1x256xf32>
    %763 = vector.broadcast %cst_238 : f32 to vector<1x256xf32>
    %764 = arith.minimumf %763, %762 : vector<1x256xf32>
    %765 = vector.broadcast %760 : f32 to vector<1x256xf32>
    %766 = arith.mulf %765, %764 : vector<1x256xf32>
    %767 = arith.addf %758, %766 : vector<1x256xf32>
    %768 = arith.index_cast %arg0 : i32 to index
    %c52 = arith.constant 52 : index
    %769 = memref.load %arg3[%768, %c52] : memref<2x150xf32, #tpu.memory_space<smem>>
    %cst_239 = arith.constant 7.000000e+00 : f32
    %cst_240 = arith.constant 8.000000e+00 : f32
    %770 = vector.broadcast %cst_239 : f32 to vector<1x256xf32>
    %771 = arith.maximumf %770, %701 : vector<1x256xf32>
    %772 = vector.broadcast %cst_240 : f32 to vector<1x256xf32>
    %773 = arith.minimumf %772, %771 : vector<1x256xf32>
    %774 = vector.broadcast %769 : f32 to vector<1x256xf32>
    %775 = arith.mulf %774, %773 : vector<1x256xf32>
    %776 = arith.addf %767, %775 : vector<1x256xf32>
    %777 = arith.index_cast %arg0 : i32 to index
    %c53 = arith.constant 53 : index
    %778 = memref.load %arg3[%777, %c53] : memref<2x150xf32, #tpu.memory_space<smem>>
    %cst_241 = arith.constant 8.000000e+00 : f32
    %cst_242 = arith.constant 9.000000e+00 : f32
    %779 = vector.broadcast %cst_241 : f32 to vector<1x256xf32>
    %780 = arith.maximumf %779, %701 : vector<1x256xf32>
    %781 = vector.broadcast %cst_242 : f32 to vector<1x256xf32>
    %782 = arith.minimumf %781, %780 : vector<1x256xf32>
    %783 = vector.broadcast %778 : f32 to vector<1x256xf32>
    %784 = arith.mulf %783, %782 : vector<1x256xf32>
    %785 = arith.addf %776, %784 : vector<1x256xf32>
    %786 = arith.index_cast %arg0 : i32 to index
    %c54 = arith.constant 54 : index
    %787 = memref.load %arg3[%786, %c54] : memref<2x150xf32, #tpu.memory_space<smem>>
    %cst_243 = arith.constant 9.000000e+00 : f32
    %cst_244 = arith.constant 1.000000e+01 : f32
    %788 = vector.broadcast %cst_243 : f32 to vector<1x256xf32>
    %789 = arith.maximumf %788, %701 : vector<1x256xf32>
    %790 = vector.broadcast %cst_244 : f32 to vector<1x256xf32>
    %791 = arith.minimumf %790, %789 : vector<1x256xf32>
    %792 = vector.broadcast %787 : f32 to vector<1x256xf32>
    %793 = arith.mulf %792, %791 : vector<1x256xf32>
    %794 = arith.addf %785, %793 : vector<1x256xf32>
    %795 = arith.index_cast %arg0 : i32 to index
    %c55 = arith.constant 55 : index
    %796 = memref.load %arg3[%795, %c55] : memref<2x150xf32, #tpu.memory_space<smem>>
    %cst_245 = arith.constant 1.000000e+01 : f32
    %cst_246 = arith.constant 1.100000e+01 : f32
    %797 = vector.broadcast %cst_245 : f32 to vector<1x256xf32>
    %798 = arith.maximumf %797, %701 : vector<1x256xf32>
    %799 = vector.broadcast %cst_246 : f32 to vector<1x256xf32>
    %800 = arith.minimumf %799, %798 : vector<1x256xf32>
    %801 = vector.broadcast %796 : f32 to vector<1x256xf32>
    %802 = arith.mulf %801, %800 : vector<1x256xf32>
    %803 = arith.addf %794, %802 : vector<1x256xf32>
    %804 = arith.index_cast %arg0 : i32 to index
    %c56 = arith.constant 56 : index
    %805 = memref.load %arg3[%804, %c56] : memref<2x150xf32, #tpu.memory_space<smem>>
    %cst_247 = arith.constant 1.100000e+01 : f32
    %cst_248 = arith.constant 1.200000e+01 : f32
    %806 = vector.broadcast %cst_247 : f32 to vector<1x256xf32>
    %807 = arith.maximumf %806, %701 : vector<1x256xf32>
    %808 = vector.broadcast %cst_248 : f32 to vector<1x256xf32>
    %809 = arith.minimumf %808, %807 : vector<1x256xf32>
    %810 = vector.broadcast %805 : f32 to vector<1x256xf32>
    %811 = arith.mulf %810, %809 : vector<1x256xf32>
    %812 = arith.addf %803, %811 : vector<1x256xf32>
    %813 = arith.index_cast %arg0 : i32 to index
    %c57 = arith.constant 57 : index
    %814 = memref.load %arg3[%813, %c57] : memref<2x150xf32, #tpu.memory_space<smem>>
    %cst_249 = arith.constant 1.200000e+01 : f32
    %cst_250 = arith.constant 1.300000e+01 : f32
    %815 = vector.broadcast %cst_249 : f32 to vector<1x256xf32>
    %816 = arith.maximumf %815, %701 : vector<1x256xf32>
    %817 = vector.broadcast %cst_250 : f32 to vector<1x256xf32>
    %818 = arith.minimumf %817, %816 : vector<1x256xf32>
    %819 = vector.broadcast %814 : f32 to vector<1x256xf32>
    %820 = arith.mulf %819, %818 : vector<1x256xf32>
    %821 = arith.addf %812, %820 : vector<1x256xf32>
    %822 = arith.index_cast %arg0 : i32 to index
    %c58 = arith.constant 58 : index
    %823 = memref.load %arg3[%822, %c58] : memref<2x150xf32, #tpu.memory_space<smem>>
    %cst_251 = arith.constant 1.300000e+01 : f32
    %cst_252 = arith.constant 1.400000e+01 : f32
    %824 = vector.broadcast %cst_251 : f32 to vector<1x256xf32>
    %825 = arith.maximumf %824, %701 : vector<1x256xf32>
    %826 = vector.broadcast %cst_252 : f32 to vector<1x256xf32>
    %827 = arith.minimumf %826, %825 : vector<1x256xf32>
    %828 = vector.broadcast %823 : f32 to vector<1x256xf32>
    %829 = arith.mulf %828, %827 : vector<1x256xf32>
    %830 = arith.addf %821, %829 : vector<1x256xf32>
    %831 = arith.index_cast %arg0 : i32 to index
    %c59 = arith.constant 59 : index
    %832 = memref.load %arg3[%831, %c59] : memref<2x150xf32, #tpu.memory_space<smem>>
    %cst_253 = arith.constant 1.400000e+01 : f32
    %cst_254 = arith.constant 1.500000e+01 : f32
    %833 = vector.broadcast %cst_253 : f32 to vector<1x256xf32>
    %834 = arith.maximumf %833, %701 : vector<1x256xf32>
    %835 = vector.broadcast %cst_254 : f32 to vector<1x256xf32>
    %836 = arith.minimumf %835, %834 : vector<1x256xf32>
    %837 = vector.broadcast %832 : f32 to vector<1x256xf32>
    %838 = arith.mulf %837, %836 : vector<1x256xf32>
    %839 = arith.addf %830, %838 : vector<1x256xf32>
    %840 = arith.mulf %673, %839 : vector<1x256xf32>
    %cst_255 = arith.constant 0.000000e+00 : f32
    %cst_256 = arith.constant 1.000000e+00 : f32
    %841 = vector.broadcast %cst_255 : f32 to vector<1x256xf32>
    %842 = arith.maximumf %841, %840 : vector<1x256xf32>
    %843 = vector.broadcast %cst_256 : f32 to vector<1x256xf32>
    %844 = arith.minimumf %843, %842 : vector<1x256xf32>
    %845 = arith.mulf %844, %13 : vector<1x256xf32>
    %cst_257 = arith.constant 1.500000e+01 : f32
    %846 = vector.broadcast %cst_257 : f32 to vector<1x256xf32>
    %847 = arith.mulf %686, %846 : vector<1x256xf32>
    %848 = arith.index_cast %arg0 : i32 to index
    %c4_258 = arith.constant 4 : index
    %849 = memref.load %arg2[%848, %c4_258] : memref<2x10xf32, #tpu.memory_space<smem>>
    %850 = arith.index_cast %arg0 : i32 to index
    %c60 = arith.constant 60 : index
    %851 = memref.load %arg3[%850, %c60] : memref<2x150xf32, #tpu.memory_space<smem>>
    %cst_259 = arith.constant 0.000000e+00 : f32
    %cst_260 = arith.constant 1.000000e+00 : f32
    %852 = vector.broadcast %cst_259 : f32 to vector<1x256xf32>
    %853 = arith.maximumf %852, %847 : vector<1x256xf32>
    %854 = vector.broadcast %cst_260 : f32 to vector<1x256xf32>
    %855 = arith.minimumf %854, %853 : vector<1x256xf32>
    %856 = vector.broadcast %851 : f32 to vector<1x256xf32>
    %857 = arith.mulf %856, %855 : vector<1x256xf32>
    %858 = vector.broadcast %849 : f32 to vector<1x256xf32>
    %859 = arith.addf %858, %857 : vector<1x256xf32>
    %860 = arith.index_cast %arg0 : i32 to index
    %c61 = arith.constant 61 : index
    %861 = memref.load %arg3[%860, %c61] : memref<2x150xf32, #tpu.memory_space<smem>>
    %cst_261 = arith.constant 1.000000e+00 : f32
    %cst_262 = arith.constant 2.000000e+00 : f32
    %862 = vector.broadcast %cst_261 : f32 to vector<1x256xf32>
    %863 = arith.maximumf %862, %847 : vector<1x256xf32>
    %864 = vector.broadcast %cst_262 : f32 to vector<1x256xf32>
    %865 = arith.minimumf %864, %863 : vector<1x256xf32>
    %866 = vector.broadcast %861 : f32 to vector<1x256xf32>
    %867 = arith.mulf %866, %865 : vector<1x256xf32>
    %868 = arith.addf %859, %867 : vector<1x256xf32>
    %869 = arith.index_cast %arg0 : i32 to index
    %c62 = arith.constant 62 : index
    %870 = memref.load %arg3[%869, %c62] : memref<2x150xf32, #tpu.memory_space<smem>>
    %cst_263 = arith.constant 2.000000e+00 : f32
    %cst_264 = arith.constant 3.000000e+00 : f32
    %871 = vector.broadcast %cst_263 : f32 to vector<1x256xf32>
    %872 = arith.maximumf %871, %847 : vector<1x256xf32>
    %873 = vector.broadcast %cst_264 : f32 to vector<1x256xf32>
    %874 = arith.minimumf %873, %872 : vector<1x256xf32>
    %875 = vector.broadcast %870 : f32 to vector<1x256xf32>
    %876 = arith.mulf %875, %874 : vector<1x256xf32>
    %877 = arith.addf %868, %876 : vector<1x256xf32>
    %878 = arith.index_cast %arg0 : i32 to index
    %c63 = arith.constant 63 : index
    %879 = memref.load %arg3[%878, %c63] : memref<2x150xf32, #tpu.memory_space<smem>>
    %cst_265 = arith.constant 3.000000e+00 : f32
    %cst_266 = arith.constant 4.000000e+00 : f32
    %880 = vector.broadcast %cst_265 : f32 to vector<1x256xf32>
    %881 = arith.maximumf %880, %847 : vector<1x256xf32>
    %882 = vector.broadcast %cst_266 : f32 to vector<1x256xf32>
    %883 = arith.minimumf %882, %881 : vector<1x256xf32>
    %884 = vector.broadcast %879 : f32 to vector<1x256xf32>
    %885 = arith.mulf %884, %883 : vector<1x256xf32>
    %886 = arith.addf %877, %885 : vector<1x256xf32>
    %887 = arith.index_cast %arg0 : i32 to index
    %c64 = arith.constant 64 : index
    %888 = memref.load %arg3[%887, %c64] : memref<2x150xf32, #tpu.memory_space<smem>>
    %cst_267 = arith.constant 4.000000e+00 : f32
    %cst_268 = arith.constant 5.000000e+00 : f32
    %889 = vector.broadcast %cst_267 : f32 to vector<1x256xf32>
    %890 = arith.maximumf %889, %847 : vector<1x256xf32>
    %891 = vector.broadcast %cst_268 : f32 to vector<1x256xf32>
    %892 = arith.minimumf %891, %890 : vector<1x256xf32>
    %893 = vector.broadcast %888 : f32 to vector<1x256xf32>
    %894 = arith.mulf %893, %892 : vector<1x256xf32>
    %895 = arith.addf %886, %894 : vector<1x256xf32>
    %896 = arith.index_cast %arg0 : i32 to index
    %c65 = arith.constant 65 : index
    %897 = memref.load %arg3[%896, %c65] : memref<2x150xf32, #tpu.memory_space<smem>>
    %cst_269 = arith.constant 5.000000e+00 : f32
    %cst_270 = arith.constant 6.000000e+00 : f32
    %898 = vector.broadcast %cst_269 : f32 to vector<1x256xf32>
    %899 = arith.maximumf %898, %847 : vector<1x256xf32>
    %900 = vector.broadcast %cst_270 : f32 to vector<1x256xf32>
    %901 = arith.minimumf %900, %899 : vector<1x256xf32>
    %902 = vector.broadcast %897 : f32 to vector<1x256xf32>
    %903 = arith.mulf %902, %901 : vector<1x256xf32>
    %904 = arith.addf %895, %903 : vector<1x256xf32>
    %905 = arith.index_cast %arg0 : i32 to index
    %c66 = arith.constant 66 : index
    %906 = memref.load %arg3[%905, %c66] : memref<2x150xf32, #tpu.memory_space<smem>>
    %cst_271 = arith.constant 6.000000e+00 : f32
    %cst_272 = arith.constant 7.000000e+00 : f32
    %907 = vector.broadcast %cst_271 : f32 to vector<1x256xf32>
    %908 = arith.maximumf %907, %847 : vector<1x256xf32>
    %909 = vector.broadcast %cst_272 : f32 to vector<1x256xf32>
    %910 = arith.minimumf %909, %908 : vector<1x256xf32>
    %911 = vector.broadcast %906 : f32 to vector<1x256xf32>
    %912 = arith.mulf %911, %910 : vector<1x256xf32>
    %913 = arith.addf %904, %912 : vector<1x256xf32>
    %914 = arith.index_cast %arg0 : i32 to index
    %c67 = arith.constant 67 : index
    %915 = memref.load %arg3[%914, %c67] : memref<2x150xf32, #tpu.memory_space<smem>>
    %cst_273 = arith.constant 7.000000e+00 : f32
    %cst_274 = arith.constant 8.000000e+00 : f32
    %916 = vector.broadcast %cst_273 : f32 to vector<1x256xf32>
    %917 = arith.maximumf %916, %847 : vector<1x256xf32>
    %918 = vector.broadcast %cst_274 : f32 to vector<1x256xf32>
    %919 = arith.minimumf %918, %917 : vector<1x256xf32>
    %920 = vector.broadcast %915 : f32 to vector<1x256xf32>
    %921 = arith.mulf %920, %919 : vector<1x256xf32>
    %922 = arith.addf %913, %921 : vector<1x256xf32>
    %923 = arith.index_cast %arg0 : i32 to index
    %c68 = arith.constant 68 : index
    %924 = memref.load %arg3[%923, %c68] : memref<2x150xf32, #tpu.memory_space<smem>>
    %cst_275 = arith.constant 8.000000e+00 : f32
    %cst_276 = arith.constant 9.000000e+00 : f32
    %925 = vector.broadcast %cst_275 : f32 to vector<1x256xf32>
    %926 = arith.maximumf %925, %847 : vector<1x256xf32>
    %927 = vector.broadcast %cst_276 : f32 to vector<1x256xf32>
    %928 = arith.minimumf %927, %926 : vector<1x256xf32>
    %929 = vector.broadcast %924 : f32 to vector<1x256xf32>
    %930 = arith.mulf %929, %928 : vector<1x256xf32>
    %931 = arith.addf %922, %930 : vector<1x256xf32>
    %932 = arith.index_cast %arg0 : i32 to index
    %c69 = arith.constant 69 : index
    %933 = memref.load %arg3[%932, %c69] : memref<2x150xf32, #tpu.memory_space<smem>>
    %cst_277 = arith.constant 9.000000e+00 : f32
    %cst_278 = arith.constant 1.000000e+01 : f32
    %934 = vector.broadcast %cst_277 : f32 to vector<1x256xf32>
    %935 = arith.maximumf %934, %847 : vector<1x256xf32>
    %936 = vector.broadcast %cst_278 : f32 to vector<1x256xf32>
    %937 = arith.minimumf %936, %935 : vector<1x256xf32>
    %938 = vector.broadcast %933 : f32 to vector<1x256xf32>
    %939 = arith.mulf %938, %937 : vector<1x256xf32>
    %940 = arith.addf %931, %939 : vector<1x256xf32>
    %941 = arith.index_cast %arg0 : i32 to index
    %c70 = arith.constant 70 : index
    %942 = memref.load %arg3[%941, %c70] : memref<2x150xf32, #tpu.memory_space<smem>>
    %cst_279 = arith.constant 1.000000e+01 : f32
    %cst_280 = arith.constant 1.100000e+01 : f32
    %943 = vector.broadcast %cst_279 : f32 to vector<1x256xf32>
    %944 = arith.maximumf %943, %847 : vector<1x256xf32>
    %945 = vector.broadcast %cst_280 : f32 to vector<1x256xf32>
    %946 = arith.minimumf %945, %944 : vector<1x256xf32>
    %947 = vector.broadcast %942 : f32 to vector<1x256xf32>
    %948 = arith.mulf %947, %946 : vector<1x256xf32>
    %949 = arith.addf %940, %948 : vector<1x256xf32>
    %950 = arith.index_cast %arg0 : i32 to index
    %c71 = arith.constant 71 : index
    %951 = memref.load %arg3[%950, %c71] : memref<2x150xf32, #tpu.memory_space<smem>>
    %cst_281 = arith.constant 1.100000e+01 : f32
    %cst_282 = arith.constant 1.200000e+01 : f32
    %952 = vector.broadcast %cst_281 : f32 to vector<1x256xf32>
    %953 = arith.maximumf %952, %847 : vector<1x256xf32>
    %954 = vector.broadcast %cst_282 : f32 to vector<1x256xf32>
    %955 = arith.minimumf %954, %953 : vector<1x256xf32>
    %956 = vector.broadcast %951 : f32 to vector<1x256xf32>
    %957 = arith.mulf %956, %955 : vector<1x256xf32>
    %958 = arith.addf %949, %957 : vector<1x256xf32>
    %959 = arith.index_cast %arg0 : i32 to index
    %c72 = arith.constant 72 : index
    %960 = memref.load %arg3[%959, %c72] : memref<2x150xf32, #tpu.memory_space<smem>>
    %cst_283 = arith.constant 1.200000e+01 : f32
    %cst_284 = arith.constant 1.300000e+01 : f32
    %961 = vector.broadcast %cst_283 : f32 to vector<1x256xf32>
    %962 = arith.maximumf %961, %847 : vector<1x256xf32>
    %963 = vector.broadcast %cst_284 : f32 to vector<1x256xf32>
    %964 = arith.minimumf %963, %962 : vector<1x256xf32>
    %965 = vector.broadcast %960 : f32 to vector<1x256xf32>
    %966 = arith.mulf %965, %964 : vector<1x256xf32>
    %967 = arith.addf %958, %966 : vector<1x256xf32>
    %968 = arith.index_cast %arg0 : i32 to index
    %c73 = arith.constant 73 : index
    %969 = memref.load %arg3[%968, %c73] : memref<2x150xf32, #tpu.memory_space<smem>>
    %cst_285 = arith.constant 1.300000e+01 : f32
    %cst_286 = arith.constant 1.400000e+01 : f32
    %970 = vector.broadcast %cst_285 : f32 to vector<1x256xf32>
    %971 = arith.maximumf %970, %847 : vector<1x256xf32>
    %972 = vector.broadcast %cst_286 : f32 to vector<1x256xf32>
    %973 = arith.minimumf %972, %971 : vector<1x256xf32>
    %974 = vector.broadcast %969 : f32 to vector<1x256xf32>
    %975 = arith.mulf %974, %973 : vector<1x256xf32>
    %976 = arith.addf %967, %975 : vector<1x256xf32>
    %977 = arith.index_cast %arg0 : i32 to index
    %c74 = arith.constant 74 : index
    %978 = memref.load %arg3[%977, %c74] : memref<2x150xf32, #tpu.memory_space<smem>>
    %cst_287 = arith.constant 1.400000e+01 : f32
    %cst_288 = arith.constant 1.500000e+01 : f32
    %979 = vector.broadcast %cst_287 : f32 to vector<1x256xf32>
    %980 = arith.maximumf %979, %847 : vector<1x256xf32>
    %981 = vector.broadcast %cst_288 : f32 to vector<1x256xf32>
    %982 = arith.minimumf %981, %980 : vector<1x256xf32>
    %983 = vector.broadcast %978 : f32 to vector<1x256xf32>
    %984 = arith.mulf %983, %982 : vector<1x256xf32>
    %985 = arith.addf %976, %984 : vector<1x256xf32>
    %986 = arith.mulf %686, %985 : vector<1x256xf32>
    %cst_289 = arith.constant 0.000000e+00 : f32
    %cst_290 = arith.constant 1.000000e+00 : f32
    %987 = vector.broadcast %cst_289 : f32 to vector<1x256xf32>
    %988 = arith.maximumf %987, %986 : vector<1x256xf32>
    %989 = vector.broadcast %cst_290 : f32 to vector<1x256xf32>
    %990 = arith.minimumf %989, %988 : vector<1x256xf32>
    %991 = arith.mulf %990, %13 : vector<1x256xf32>
    %cst_291 = arith.constant 1.500000e+01 : f32
    %992 = vector.broadcast %cst_291 : f32 to vector<1x256xf32>
    %993 = arith.mulf %699, %992 : vector<1x256xf32>
    %994 = arith.index_cast %arg0 : i32 to index
    %c5_292 = arith.constant 5 : index
    %995 = memref.load %arg2[%994, %c5_292] : memref<2x10xf32, #tpu.memory_space<smem>>
    %996 = arith.index_cast %arg0 : i32 to index
    %c75 = arith.constant 75 : index
    %997 = memref.load %arg3[%996, %c75] : memref<2x150xf32, #tpu.memory_space<smem>>
    %cst_293 = arith.constant 0.000000e+00 : f32
    %cst_294 = arith.constant 1.000000e+00 : f32
    %998 = vector.broadcast %cst_293 : f32 to vector<1x256xf32>
    %999 = arith.maximumf %998, %993 : vector<1x256xf32>
    %1000 = vector.broadcast %cst_294 : f32 to vector<1x256xf32>
    %1001 = arith.minimumf %1000, %999 : vector<1x256xf32>
    %1002 = vector.broadcast %997 : f32 to vector<1x256xf32>
    %1003 = arith.mulf %1002, %1001 : vector<1x256xf32>
    %1004 = vector.broadcast %995 : f32 to vector<1x256xf32>
    %1005 = arith.addf %1004, %1003 : vector<1x256xf32>
    %1006 = arith.index_cast %arg0 : i32 to index
    %c76 = arith.constant 76 : index
    %1007 = memref.load %arg3[%1006, %c76] : memref<2x150xf32, #tpu.memory_space<smem>>
    %cst_295 = arith.constant 1.000000e+00 : f32
    %cst_296 = arith.constant 2.000000e+00 : f32
    %1008 = vector.broadcast %cst_295 : f32 to vector<1x256xf32>
    %1009 = arith.maximumf %1008, %993 : vector<1x256xf32>
    %1010 = vector.broadcast %cst_296 : f32 to vector<1x256xf32>
    %1011 = arith.minimumf %1010, %1009 : vector<1x256xf32>
    %1012 = vector.broadcast %1007 : f32 to vector<1x256xf32>
    %1013 = arith.mulf %1012, %1011 : vector<1x256xf32>
    %1014 = arith.addf %1005, %1013 : vector<1x256xf32>
    %1015 = arith.index_cast %arg0 : i32 to index
    %c77 = arith.constant 77 : index
    %1016 = memref.load %arg3[%1015, %c77] : memref<2x150xf32, #tpu.memory_space<smem>>
    %cst_297 = arith.constant 2.000000e+00 : f32
    %cst_298 = arith.constant 3.000000e+00 : f32
    %1017 = vector.broadcast %cst_297 : f32 to vector<1x256xf32>
    %1018 = arith.maximumf %1017, %993 : vector<1x256xf32>
    %1019 = vector.broadcast %cst_298 : f32 to vector<1x256xf32>
    %1020 = arith.minimumf %1019, %1018 : vector<1x256xf32>
    %1021 = vector.broadcast %1016 : f32 to vector<1x256xf32>
    %1022 = arith.mulf %1021, %1020 : vector<1x256xf32>
    %1023 = arith.addf %1014, %1022 : vector<1x256xf32>
    %1024 = arith.index_cast %arg0 : i32 to index
    %c78 = arith.constant 78 : index
    %1025 = memref.load %arg3[%1024, %c78] : memref<2x150xf32, #tpu.memory_space<smem>>
    %cst_299 = arith.constant 3.000000e+00 : f32
    %cst_300 = arith.constant 4.000000e+00 : f32
    %1026 = vector.broadcast %cst_299 : f32 to vector<1x256xf32>
    %1027 = arith.maximumf %1026, %993 : vector<1x256xf32>
    %1028 = vector.broadcast %cst_300 : f32 to vector<1x256xf32>
    %1029 = arith.minimumf %1028, %1027 : vector<1x256xf32>
    %1030 = vector.broadcast %1025 : f32 to vector<1x256xf32>
    %1031 = arith.mulf %1030, %1029 : vector<1x256xf32>
    %1032 = arith.addf %1023, %1031 : vector<1x256xf32>
    %1033 = arith.index_cast %arg0 : i32 to index
    %c79 = arith.constant 79 : index
    %1034 = memref.load %arg3[%1033, %c79] : memref<2x150xf32, #tpu.memory_space<smem>>
    %cst_301 = arith.constant 4.000000e+00 : f32
    %cst_302 = arith.constant 5.000000e+00 : f32
    %1035 = vector.broadcast %cst_301 : f32 to vector<1x256xf32>
    %1036 = arith.maximumf %1035, %993 : vector<1x256xf32>
    %1037 = vector.broadcast %cst_302 : f32 to vector<1x256xf32>
    %1038 = arith.minimumf %1037, %1036 : vector<1x256xf32>
    %1039 = vector.broadcast %1034 : f32 to vector<1x256xf32>
    %1040 = arith.mulf %1039, %1038 : vector<1x256xf32>
    %1041 = arith.addf %1032, %1040 : vector<1x256xf32>
    %1042 = arith.index_cast %arg0 : i32 to index
    %c80 = arith.constant 80 : index
    %1043 = memref.load %arg3[%1042, %c80] : memref<2x150xf32, #tpu.memory_space<smem>>
    %cst_303 = arith.constant 5.000000e+00 : f32
    %cst_304 = arith.constant 6.000000e+00 : f32
    %1044 = vector.broadcast %cst_303 : f32 to vector<1x256xf32>
    %1045 = arith.maximumf %1044, %993 : vector<1x256xf32>
    %1046 = vector.broadcast %cst_304 : f32 to vector<1x256xf32>
    %1047 = arith.minimumf %1046, %1045 : vector<1x256xf32>
    %1048 = vector.broadcast %1043 : f32 to vector<1x256xf32>
    %1049 = arith.mulf %1048, %1047 : vector<1x256xf32>
    %1050 = arith.addf %1041, %1049 : vector<1x256xf32>
    %1051 = arith.index_cast %arg0 : i32 to index
    %c81 = arith.constant 81 : index
    %1052 = memref.load %arg3[%1051, %c81] : memref<2x150xf32, #tpu.memory_space<smem>>
    %cst_305 = arith.constant 6.000000e+00 : f32
    %cst_306 = arith.constant 7.000000e+00 : f32
    %1053 = vector.broadcast %cst_305 : f32 to vector<1x256xf32>
    %1054 = arith.maximumf %1053, %993 : vector<1x256xf32>
    %1055 = vector.broadcast %cst_306 : f32 to vector<1x256xf32>
    %1056 = arith.minimumf %1055, %1054 : vector<1x256xf32>
    %1057 = vector.broadcast %1052 : f32 to vector<1x256xf32>
    %1058 = arith.mulf %1057, %1056 : vector<1x256xf32>
    %1059 = arith.addf %1050, %1058 : vector<1x256xf32>
    %1060 = arith.index_cast %arg0 : i32 to index
    %c82 = arith.constant 82 : index
    %1061 = memref.load %arg3[%1060, %c82] : memref<2x150xf32, #tpu.memory_space<smem>>
    %cst_307 = arith.constant 7.000000e+00 : f32
    %cst_308 = arith.constant 8.000000e+00 : f32
    %1062 = vector.broadcast %cst_307 : f32 to vector<1x256xf32>
    %1063 = arith.maximumf %1062, %993 : vector<1x256xf32>
    %1064 = vector.broadcast %cst_308 : f32 to vector<1x256xf32>
    %1065 = arith.minimumf %1064, %1063 : vector<1x256xf32>
    %1066 = vector.broadcast %1061 : f32 to vector<1x256xf32>
    %1067 = arith.mulf %1066, %1065 : vector<1x256xf32>
    %1068 = arith.addf %1059, %1067 : vector<1x256xf32>
    %1069 = arith.index_cast %arg0 : i32 to index
    %c83 = arith.constant 83 : index
    %1070 = memref.load %arg3[%1069, %c83] : memref<2x150xf32, #tpu.memory_space<smem>>
    %cst_309 = arith.constant 8.000000e+00 : f32
    %cst_310 = arith.constant 9.000000e+00 : f32
    %1071 = vector.broadcast %cst_309 : f32 to vector<1x256xf32>
    %1072 = arith.maximumf %1071, %993 : vector<1x256xf32>
    %1073 = vector.broadcast %cst_310 : f32 to vector<1x256xf32>
    %1074 = arith.minimumf %1073, %1072 : vector<1x256xf32>
    %1075 = vector.broadcast %1070 : f32 to vector<1x256xf32>
    %1076 = arith.mulf %1075, %1074 : vector<1x256xf32>
    %1077 = arith.addf %1068, %1076 : vector<1x256xf32>
    %1078 = arith.index_cast %arg0 : i32 to index
    %c84 = arith.constant 84 : index
    %1079 = memref.load %arg3[%1078, %c84] : memref<2x150xf32, #tpu.memory_space<smem>>
    %cst_311 = arith.constant 9.000000e+00 : f32
    %cst_312 = arith.constant 1.000000e+01 : f32
    %1080 = vector.broadcast %cst_311 : f32 to vector<1x256xf32>
    %1081 = arith.maximumf %1080, %993 : vector<1x256xf32>
    %1082 = vector.broadcast %cst_312 : f32 to vector<1x256xf32>
    %1083 = arith.minimumf %1082, %1081 : vector<1x256xf32>
    %1084 = vector.broadcast %1079 : f32 to vector<1x256xf32>
    %1085 = arith.mulf %1084, %1083 : vector<1x256xf32>
    %1086 = arith.addf %1077, %1085 : vector<1x256xf32>
    %1087 = arith.index_cast %arg0 : i32 to index
    %c85 = arith.constant 85 : index
    %1088 = memref.load %arg3[%1087, %c85] : memref<2x150xf32, #tpu.memory_space<smem>>
    %cst_313 = arith.constant 1.000000e+01 : f32
    %cst_314 = arith.constant 1.100000e+01 : f32
    %1089 = vector.broadcast %cst_313 : f32 to vector<1x256xf32>
    %1090 = arith.maximumf %1089, %993 : vector<1x256xf32>
    %1091 = vector.broadcast %cst_314 : f32 to vector<1x256xf32>
    %1092 = arith.minimumf %1091, %1090 : vector<1x256xf32>
    %1093 = vector.broadcast %1088 : f32 to vector<1x256xf32>
    %1094 = arith.mulf %1093, %1092 : vector<1x256xf32>
    %1095 = arith.addf %1086, %1094 : vector<1x256xf32>
    %1096 = arith.index_cast %arg0 : i32 to index
    %c86 = arith.constant 86 : index
    %1097 = memref.load %arg3[%1096, %c86] : memref<2x150xf32, #tpu.memory_space<smem>>
    %cst_315 = arith.constant 1.100000e+01 : f32
    %cst_316 = arith.constant 1.200000e+01 : f32
    %1098 = vector.broadcast %cst_315 : f32 to vector<1x256xf32>
    %1099 = arith.maximumf %1098, %993 : vector<1x256xf32>
    %1100 = vector.broadcast %cst_316 : f32 to vector<1x256xf32>
    %1101 = arith.minimumf %1100, %1099 : vector<1x256xf32>
    %1102 = vector.broadcast %1097 : f32 to vector<1x256xf32>
    %1103 = arith.mulf %1102, %1101 : vector<1x256xf32>
    %1104 = arith.addf %1095, %1103 : vector<1x256xf32>
    %1105 = arith.index_cast %arg0 : i32 to index
    %c87 = arith.constant 87 : index
    %1106 = memref.load %arg3[%1105, %c87] : memref<2x150xf32, #tpu.memory_space<smem>>
    %cst_317 = arith.constant 1.200000e+01 : f32
    %cst_318 = arith.constant 1.300000e+01 : f32
    %1107 = vector.broadcast %cst_317 : f32 to vector<1x256xf32>
    %1108 = arith.maximumf %1107, %993 : vector<1x256xf32>
    %1109 = vector.broadcast %cst_318 : f32 to vector<1x256xf32>
    %1110 = arith.minimumf %1109, %1108 : vector<1x256xf32>
    %1111 = vector.broadcast %1106 : f32 to vector<1x256xf32>
    %1112 = arith.mulf %1111, %1110 : vector<1x256xf32>
    %1113 = arith.addf %1104, %1112 : vector<1x256xf32>
    %1114 = arith.index_cast %arg0 : i32 to index
    %c88 = arith.constant 88 : index
    %1115 = memref.load %arg3[%1114, %c88] : memref<2x150xf32, #tpu.memory_space<smem>>
    %cst_319 = arith.constant 1.300000e+01 : f32
    %cst_320 = arith.constant 1.400000e+01 : f32
    %1116 = vector.broadcast %cst_319 : f32 to vector<1x256xf32>
    %1117 = arith.maximumf %1116, %993 : vector<1x256xf32>
    %1118 = vector.broadcast %cst_320 : f32 to vector<1x256xf32>
    %1119 = arith.minimumf %1118, %1117 : vector<1x256xf32>
    %1120 = vector.broadcast %1115 : f32 to vector<1x256xf32>
    %1121 = arith.mulf %1120, %1119 : vector<1x256xf32>
    %1122 = arith.addf %1113, %1121 : vector<1x256xf32>
    %1123 = arith.index_cast %arg0 : i32 to index
    %c89 = arith.constant 89 : index
    %1124 = memref.load %arg3[%1123, %c89] : memref<2x150xf32, #tpu.memory_space<smem>>
    %cst_321 = arith.constant 1.400000e+01 : f32
    %cst_322 = arith.constant 1.500000e+01 : f32
    %1125 = vector.broadcast %cst_321 : f32 to vector<1x256xf32>
    %1126 = arith.maximumf %1125, %993 : vector<1x256xf32>
    %1127 = vector.broadcast %cst_322 : f32 to vector<1x256xf32>
    %1128 = arith.minimumf %1127, %1126 : vector<1x256xf32>
    %1129 = vector.broadcast %1124 : f32 to vector<1x256xf32>
    %1130 = arith.mulf %1129, %1128 : vector<1x256xf32>
    %1131 = arith.addf %1122, %1130 : vector<1x256xf32>
    %1132 = arith.mulf %699, %1131 : vector<1x256xf32>
    %cst_323 = arith.constant 0.000000e+00 : f32
    %cst_324 = arith.constant 1.000000e+00 : f32
    %1133 = vector.broadcast %cst_323 : f32 to vector<1x256xf32>
    %1134 = arith.maximumf %1133, %1132 : vector<1x256xf32>
    %1135 = vector.broadcast %cst_324 : f32 to vector<1x256xf32>
    %1136 = arith.minimumf %1135, %1134 : vector<1x256xf32>
    %1137 = arith.mulf %1136, %13 : vector<1x256xf32>
    %cst_325 = arith.constant 9.99999971E-10 : f32
    %1138 = vector.broadcast %cst_325 : f32 to vector<1x256xf32>
    %1139 = arith.maximumf %845, %1138 : vector<1x256xf32>
    %cst_326 = arith.constant 9.99999971E-10 : f32
    %1140 = vector.broadcast %cst_326 : f32 to vector<1x256xf32>
    %1141 = arith.maximumf %991, %1140 : vector<1x256xf32>
    %cst_327 = arith.constant 9.99999971E-10 : f32
    %1142 = vector.broadcast %cst_327 : f32 to vector<1x256xf32>
    %1143 = arith.maximumf %1137, %1142 : vector<1x256xf32>
    %1144 = arith.maximumf %1139, %1141 : vector<1x256xf32>
    %1145 = arith.maximumf %1144, %1143 : vector<1x256xf32>
    %1146 = arith.minimumf %1139, %1141 : vector<1x256xf32>
    %1147 = arith.minimumf %1146, %1143 : vector<1x256xf32>
    %1148 = arith.subf %1145, %1147 : vector<1x256xf32>
    %cst_328 = arith.constant 1.000000e-10 : f32
    %1149 = vector.broadcast %cst_328 : f32 to vector<1x256xf32>
    %1150 = arith.addf %1148, %1149 : vector<1x256xf32>
    %1151 = tpu.reciprocal %1150 {approx = true} : vector<1x256xf32> -> vector<1x256xf32>
    %1152 = tpu.reciprocal %1145 {approx = true} : vector<1x256xf32> -> vector<1x256xf32>
    %1153 = arith.subf %1141, %1143 : vector<1x256xf32>
    %1154 = arith.mulf %1153, %1151 : vector<1x256xf32>
    %1155 = arith.cmpf oeq, %1139, %1145 : vector<1x256xf32>
    %1156 = arith.extui %1155 : vector<1x256xi1> to vector<1x256xi32>
    %1157 = arith.sitofp %1156 : vector<1x256xi32> to vector<1x256xf32>
    %1158 = arith.mulf %1154, %1157 : vector<1x256xf32>
    %1159 = arith.subf %1143, %1139 : vector<1x256xf32>
    %1160 = arith.mulf %1159, %1151 : vector<1x256xf32>
    %cst_329 = arith.constant 2.000000e+00 : f32
    %1161 = vector.broadcast %cst_329 : f32 to vector<1x256xf32>
    %1162 = arith.addf %1161, %1160 : vector<1x256xf32>
    %1163 = arith.cmpf oeq, %1141, %1145 : vector<1x256xf32>
    %1164 = arith.extui %1163 : vector<1x256xi1> to vector<1x256xi32>
    %1165 = arith.sitofp %1164 : vector<1x256xi32> to vector<1x256xf32>
    %1166 = arith.mulf %1162, %1165 : vector<1x256xf32>
    %1167 = arith.addf %1158, %1166 : vector<1x256xf32>
    %1168 = arith.subf %1139, %1141 : vector<1x256xf32>
    %1169 = arith.mulf %1168, %1151 : vector<1x256xf32>
    %cst_330 = arith.constant 4.000000e+00 : f32
    %1170 = vector.broadcast %cst_330 : f32 to vector<1x256xf32>
    %1171 = arith.addf %1170, %1169 : vector<1x256xf32>
    %1172 = arith.cmpf oeq, %1143, %1145 : vector<1x256xf32>
    %1173 = arith.extui %1172 : vector<1x256xi1> to vector<1x256xi32>
    %1174 = arith.sitofp %1173 : vector<1x256xi32> to vector<1x256xf32>
    %1175 = arith.mulf %1171, %1174 : vector<1x256xf32>
    %1176 = arith.addf %1167, %1175 : vector<1x256xf32>
    %cst_331 = arith.constant 0.166666672 : f32
    %1177 = vector.broadcast %cst_331 : f32 to vector<1x256xf32>
    %1178 = arith.mulf %1176, %1177 : vector<1x256xf32>
    %cst_332 = arith.constant 0.000000e+00 : f32
    %1179 = vector.broadcast %cst_332 : f32 to vector<1x256xf32>
    %1180 = arith.cmpf olt, %1178, %1179 : vector<1x256xf32>
    %cst_333 = arith.constant 1.000000e+00 : f32
    %1181 = vector.broadcast %cst_333 : f32 to vector<1x256xf32>
    %1182 = arith.addf %1178, %1181 : vector<1x256xf32>
    %1183 = arith.select %1180, %1182, %1178 : vector<1x256xi1>, vector<1x256xf32>
    %1184 = arith.mulf %1150, %1152 : vector<1x256xf32>
    %cst_334 = arith.constant 0.000000e+00 : f32
    %cst_335 = arith.constant 1.000000e+00 : f32
    %1185 = vector.broadcast %cst_334 : f32 to vector<1x256xf32>
    %1186 = arith.maximumf %1185, %1183 : vector<1x256xf32>
    %1187 = vector.broadcast %cst_335 : f32 to vector<1x256xf32>
    %1188 = arith.minimumf %1187, %1186 : vector<1x256xf32>
    %cst_336 = arith.constant 0.000000e+00 : f32
    %cst_337 = arith.constant 1.000000e+00 : f32
    %1189 = vector.broadcast %cst_336 : f32 to vector<1x256xf32>
    %1190 = arith.maximumf %1189, %1184 : vector<1x256xf32>
    %1191 = vector.broadcast %cst_337 : f32 to vector<1x256xf32>
    %1192 = arith.minimumf %1191, %1190 : vector<1x256xf32>
    %cst_338 = arith.constant 1.500000e+01 : f32
    %1193 = vector.broadcast %cst_338 : f32 to vector<1x256xf32>
    %1194 = arith.mulf %1188, %1193 : vector<1x256xf32>
    %1195 = arith.index_cast %arg0 : i32 to index
    %c6_339 = arith.constant 6 : index
    %1196 = memref.load %arg2[%1195, %c6_339] : memref<2x10xf32, #tpu.memory_space<smem>>
    %1197 = arith.index_cast %arg0 : i32 to index
    %c90 = arith.constant 90 : index
    %1198 = memref.load %arg3[%1197, %c90] : memref<2x150xf32, #tpu.memory_space<smem>>
    %cst_340 = arith.constant 0.000000e+00 : f32
    %cst_341 = arith.constant 1.000000e+00 : f32
    %1199 = vector.broadcast %cst_340 : f32 to vector<1x256xf32>
    %1200 = arith.maximumf %1199, %1194 : vector<1x256xf32>
    %1201 = vector.broadcast %cst_341 : f32 to vector<1x256xf32>
    %1202 = arith.minimumf %1201, %1200 : vector<1x256xf32>
    %1203 = vector.broadcast %1198 : f32 to vector<1x256xf32>
    %1204 = arith.mulf %1203, %1202 : vector<1x256xf32>
    %1205 = vector.broadcast %1196 : f32 to vector<1x256xf32>
    %1206 = arith.addf %1205, %1204 : vector<1x256xf32>
    %1207 = arith.index_cast %arg0 : i32 to index
    %c91 = arith.constant 91 : index
    %1208 = memref.load %arg3[%1207, %c91] : memref<2x150xf32, #tpu.memory_space<smem>>
    %cst_342 = arith.constant 1.000000e+00 : f32
    %cst_343 = arith.constant 2.000000e+00 : f32
    %1209 = vector.broadcast %cst_342 : f32 to vector<1x256xf32>
    %1210 = arith.maximumf %1209, %1194 : vector<1x256xf32>
    %1211 = vector.broadcast %cst_343 : f32 to vector<1x256xf32>
    %1212 = arith.minimumf %1211, %1210 : vector<1x256xf32>
    %1213 = vector.broadcast %1208 : f32 to vector<1x256xf32>
    %1214 = arith.mulf %1213, %1212 : vector<1x256xf32>
    %1215 = arith.addf %1206, %1214 : vector<1x256xf32>
    %1216 = arith.index_cast %arg0 : i32 to index
    %c92 = arith.constant 92 : index
    %1217 = memref.load %arg3[%1216, %c92] : memref<2x150xf32, #tpu.memory_space<smem>>
    %cst_344 = arith.constant 2.000000e+00 : f32
    %cst_345 = arith.constant 3.000000e+00 : f32
    %1218 = vector.broadcast %cst_344 : f32 to vector<1x256xf32>
    %1219 = arith.maximumf %1218, %1194 : vector<1x256xf32>
    %1220 = vector.broadcast %cst_345 : f32 to vector<1x256xf32>
    %1221 = arith.minimumf %1220, %1219 : vector<1x256xf32>
    %1222 = vector.broadcast %1217 : f32 to vector<1x256xf32>
    %1223 = arith.mulf %1222, %1221 : vector<1x256xf32>
    %1224 = arith.addf %1215, %1223 : vector<1x256xf32>
    %1225 = arith.index_cast %arg0 : i32 to index
    %c93 = arith.constant 93 : index
    %1226 = memref.load %arg3[%1225, %c93] : memref<2x150xf32, #tpu.memory_space<smem>>
    %cst_346 = arith.constant 3.000000e+00 : f32
    %cst_347 = arith.constant 4.000000e+00 : f32
    %1227 = vector.broadcast %cst_346 : f32 to vector<1x256xf32>
    %1228 = arith.maximumf %1227, %1194 : vector<1x256xf32>
    %1229 = vector.broadcast %cst_347 : f32 to vector<1x256xf32>
    %1230 = arith.minimumf %1229, %1228 : vector<1x256xf32>
    %1231 = vector.broadcast %1226 : f32 to vector<1x256xf32>
    %1232 = arith.mulf %1231, %1230 : vector<1x256xf32>
    %1233 = arith.addf %1224, %1232 : vector<1x256xf32>
    %1234 = arith.index_cast %arg0 : i32 to index
    %c94 = arith.constant 94 : index
    %1235 = memref.load %arg3[%1234, %c94] : memref<2x150xf32, #tpu.memory_space<smem>>
    %cst_348 = arith.constant 4.000000e+00 : f32
    %cst_349 = arith.constant 5.000000e+00 : f32
    %1236 = vector.broadcast %cst_348 : f32 to vector<1x256xf32>
    %1237 = arith.maximumf %1236, %1194 : vector<1x256xf32>
    %1238 = vector.broadcast %cst_349 : f32 to vector<1x256xf32>
    %1239 = arith.minimumf %1238, %1237 : vector<1x256xf32>
    %1240 = vector.broadcast %1235 : f32 to vector<1x256xf32>
    %1241 = arith.mulf %1240, %1239 : vector<1x256xf32>
    %1242 = arith.addf %1233, %1241 : vector<1x256xf32>
    %1243 = arith.index_cast %arg0 : i32 to index
    %c95 = arith.constant 95 : index
    %1244 = memref.load %arg3[%1243, %c95] : memref<2x150xf32, #tpu.memory_space<smem>>
    %cst_350 = arith.constant 5.000000e+00 : f32
    %cst_351 = arith.constant 6.000000e+00 : f32
    %1245 = vector.broadcast %cst_350 : f32 to vector<1x256xf32>
    %1246 = arith.maximumf %1245, %1194 : vector<1x256xf32>
    %1247 = vector.broadcast %cst_351 : f32 to vector<1x256xf32>
    %1248 = arith.minimumf %1247, %1246 : vector<1x256xf32>
    %1249 = vector.broadcast %1244 : f32 to vector<1x256xf32>
    %1250 = arith.mulf %1249, %1248 : vector<1x256xf32>
    %1251 = arith.addf %1242, %1250 : vector<1x256xf32>
    %1252 = arith.index_cast %arg0 : i32 to index
    %c96 = arith.constant 96 : index
    %1253 = memref.load %arg3[%1252, %c96] : memref<2x150xf32, #tpu.memory_space<smem>>
    %cst_352 = arith.constant 6.000000e+00 : f32
    %cst_353 = arith.constant 7.000000e+00 : f32
    %1254 = vector.broadcast %cst_352 : f32 to vector<1x256xf32>
    %1255 = arith.maximumf %1254, %1194 : vector<1x256xf32>
    %1256 = vector.broadcast %cst_353 : f32 to vector<1x256xf32>
    %1257 = arith.minimumf %1256, %1255 : vector<1x256xf32>
    %1258 = vector.broadcast %1253 : f32 to vector<1x256xf32>
    %1259 = arith.mulf %1258, %1257 : vector<1x256xf32>
    %1260 = arith.addf %1251, %1259 : vector<1x256xf32>
    %1261 = arith.index_cast %arg0 : i32 to index
    %c97 = arith.constant 97 : index
    %1262 = memref.load %arg3[%1261, %c97] : memref<2x150xf32, #tpu.memory_space<smem>>
    %cst_354 = arith.constant 7.000000e+00 : f32
    %cst_355 = arith.constant 8.000000e+00 : f32
    %1263 = vector.broadcast %cst_354 : f32 to vector<1x256xf32>
    %1264 = arith.maximumf %1263, %1194 : vector<1x256xf32>
    %1265 = vector.broadcast %cst_355 : f32 to vector<1x256xf32>
    %1266 = arith.minimumf %1265, %1264 : vector<1x256xf32>
    %1267 = vector.broadcast %1262 : f32 to vector<1x256xf32>
    %1268 = arith.mulf %1267, %1266 : vector<1x256xf32>
    %1269 = arith.addf %1260, %1268 : vector<1x256xf32>
    %1270 = arith.index_cast %arg0 : i32 to index
    %c98 = arith.constant 98 : index
    %1271 = memref.load %arg3[%1270, %c98] : memref<2x150xf32, #tpu.memory_space<smem>>
    %cst_356 = arith.constant 8.000000e+00 : f32
    %cst_357 = arith.constant 9.000000e+00 : f32
    %1272 = vector.broadcast %cst_356 : f32 to vector<1x256xf32>
    %1273 = arith.maximumf %1272, %1194 : vector<1x256xf32>
    %1274 = vector.broadcast %cst_357 : f32 to vector<1x256xf32>
    %1275 = arith.minimumf %1274, %1273 : vector<1x256xf32>
    %1276 = vector.broadcast %1271 : f32 to vector<1x256xf32>
    %1277 = arith.mulf %1276, %1275 : vector<1x256xf32>
    %1278 = arith.addf %1269, %1277 : vector<1x256xf32>
    %1279 = arith.index_cast %arg0 : i32 to index
    %c99 = arith.constant 99 : index
    %1280 = memref.load %arg3[%1279, %c99] : memref<2x150xf32, #tpu.memory_space<smem>>
    %cst_358 = arith.constant 9.000000e+00 : f32
    %cst_359 = arith.constant 1.000000e+01 : f32
    %1281 = vector.broadcast %cst_358 : f32 to vector<1x256xf32>
    %1282 = arith.maximumf %1281, %1194 : vector<1x256xf32>
    %1283 = vector.broadcast %cst_359 : f32 to vector<1x256xf32>
    %1284 = arith.minimumf %1283, %1282 : vector<1x256xf32>
    %1285 = vector.broadcast %1280 : f32 to vector<1x256xf32>
    %1286 = arith.mulf %1285, %1284 : vector<1x256xf32>
    %1287 = arith.addf %1278, %1286 : vector<1x256xf32>
    %1288 = arith.index_cast %arg0 : i32 to index
    %c100 = arith.constant 100 : index
    %1289 = memref.load %arg3[%1288, %c100] : memref<2x150xf32, #tpu.memory_space<smem>>
    %cst_360 = arith.constant 1.000000e+01 : f32
    %cst_361 = arith.constant 1.100000e+01 : f32
    %1290 = vector.broadcast %cst_360 : f32 to vector<1x256xf32>
    %1291 = arith.maximumf %1290, %1194 : vector<1x256xf32>
    %1292 = vector.broadcast %cst_361 : f32 to vector<1x256xf32>
    %1293 = arith.minimumf %1292, %1291 : vector<1x256xf32>
    %1294 = vector.broadcast %1289 : f32 to vector<1x256xf32>
    %1295 = arith.mulf %1294, %1293 : vector<1x256xf32>
    %1296 = arith.addf %1287, %1295 : vector<1x256xf32>
    %1297 = arith.index_cast %arg0 : i32 to index
    %c101 = arith.constant 101 : index
    %1298 = memref.load %arg3[%1297, %c101] : memref<2x150xf32, #tpu.memory_space<smem>>
    %cst_362 = arith.constant 1.100000e+01 : f32
    %cst_363 = arith.constant 1.200000e+01 : f32
    %1299 = vector.broadcast %cst_362 : f32 to vector<1x256xf32>
    %1300 = arith.maximumf %1299, %1194 : vector<1x256xf32>
    %1301 = vector.broadcast %cst_363 : f32 to vector<1x256xf32>
    %1302 = arith.minimumf %1301, %1300 : vector<1x256xf32>
    %1303 = vector.broadcast %1298 : f32 to vector<1x256xf32>
    %1304 = arith.mulf %1303, %1302 : vector<1x256xf32>
    %1305 = arith.addf %1296, %1304 : vector<1x256xf32>
    %1306 = arith.index_cast %arg0 : i32 to index
    %c102 = arith.constant 102 : index
    %1307 = memref.load %arg3[%1306, %c102] : memref<2x150xf32, #tpu.memory_space<smem>>
    %cst_364 = arith.constant 1.200000e+01 : f32
    %cst_365 = arith.constant 1.300000e+01 : f32
    %1308 = vector.broadcast %cst_364 : f32 to vector<1x256xf32>
    %1309 = arith.maximumf %1308, %1194 : vector<1x256xf32>
    %1310 = vector.broadcast %cst_365 : f32 to vector<1x256xf32>
    %1311 = arith.minimumf %1310, %1309 : vector<1x256xf32>
    %1312 = vector.broadcast %1307 : f32 to vector<1x256xf32>
    %1313 = arith.mulf %1312, %1311 : vector<1x256xf32>
    %1314 = arith.addf %1305, %1313 : vector<1x256xf32>
    %1315 = arith.index_cast %arg0 : i32 to index
    %c103 = arith.constant 103 : index
    %1316 = memref.load %arg3[%1315, %c103] : memref<2x150xf32, #tpu.memory_space<smem>>
    %cst_366 = arith.constant 1.300000e+01 : f32
    %cst_367 = arith.constant 1.400000e+01 : f32
    %1317 = vector.broadcast %cst_366 : f32 to vector<1x256xf32>
    %1318 = arith.maximumf %1317, %1194 : vector<1x256xf32>
    %1319 = vector.broadcast %cst_367 : f32 to vector<1x256xf32>
    %1320 = arith.minimumf %1319, %1318 : vector<1x256xf32>
    %1321 = vector.broadcast %1316 : f32 to vector<1x256xf32>
    %1322 = arith.mulf %1321, %1320 : vector<1x256xf32>
    %1323 = arith.addf %1314, %1322 : vector<1x256xf32>
    %1324 = arith.index_cast %arg0 : i32 to index
    %c104 = arith.constant 104 : index
    %1325 = memref.load %arg3[%1324, %c104] : memref<2x150xf32, #tpu.memory_space<smem>>
    %cst_368 = arith.constant 1.400000e+01 : f32
    %cst_369 = arith.constant 1.500000e+01 : f32
    %1326 = vector.broadcast %cst_368 : f32 to vector<1x256xf32>
    %1327 = arith.maximumf %1326, %1194 : vector<1x256xf32>
    %1328 = vector.broadcast %cst_369 : f32 to vector<1x256xf32>
    %1329 = arith.minimumf %1328, %1327 : vector<1x256xf32>
    %1330 = vector.broadcast %1325 : f32 to vector<1x256xf32>
    %1331 = arith.mulf %1330, %1329 : vector<1x256xf32>
    %1332 = arith.addf %1323, %1331 : vector<1x256xf32>
    %1333 = arith.mulf %1188, %1332 : vector<1x256xf32>
    %cst_370 = arith.constant 1.500000e+01 : f32
    %1334 = vector.broadcast %cst_370 : f32 to vector<1x256xf32>
    %1335 = arith.mulf %1333, %1334 : vector<1x256xf32>
    %1336 = arith.index_cast %arg0 : i32 to index
    %c7_371 = arith.constant 7 : index
    %1337 = memref.load %arg2[%1336, %c7_371] : memref<2x10xf32, #tpu.memory_space<smem>>
    %1338 = arith.index_cast %arg0 : i32 to index
    %c105 = arith.constant 105 : index
    %1339 = memref.load %arg3[%1338, %c105] : memref<2x150xf32, #tpu.memory_space<smem>>
    %cst_372 = arith.constant 0.000000e+00 : f32
    %cst_373 = arith.constant 1.000000e+00 : f32
    %1340 = vector.broadcast %cst_372 : f32 to vector<1x256xf32>
    %1341 = arith.maximumf %1340, %1335 : vector<1x256xf32>
    %1342 = vector.broadcast %cst_373 : f32 to vector<1x256xf32>
    %1343 = arith.minimumf %1342, %1341 : vector<1x256xf32>
    %1344 = vector.broadcast %1339 : f32 to vector<1x256xf32>
    %1345 = arith.mulf %1344, %1343 : vector<1x256xf32>
    %1346 = vector.broadcast %1337 : f32 to vector<1x256xf32>
    %1347 = arith.addf %1346, %1345 : vector<1x256xf32>
    %1348 = arith.index_cast %arg0 : i32 to index
    %c106 = arith.constant 106 : index
    %1349 = memref.load %arg3[%1348, %c106] : memref<2x150xf32, #tpu.memory_space<smem>>
    %cst_374 = arith.constant 1.000000e+00 : f32
    %cst_375 = arith.constant 2.000000e+00 : f32
    %1350 = vector.broadcast %cst_374 : f32 to vector<1x256xf32>
    %1351 = arith.maximumf %1350, %1335 : vector<1x256xf32>
    %1352 = vector.broadcast %cst_375 : f32 to vector<1x256xf32>
    %1353 = arith.minimumf %1352, %1351 : vector<1x256xf32>
    %1354 = vector.broadcast %1349 : f32 to vector<1x256xf32>
    %1355 = arith.mulf %1354, %1353 : vector<1x256xf32>
    %1356 = arith.addf %1347, %1355 : vector<1x256xf32>
    %1357 = arith.index_cast %arg0 : i32 to index
    %c107 = arith.constant 107 : index
    %1358 = memref.load %arg3[%1357, %c107] : memref<2x150xf32, #tpu.memory_space<smem>>
    %cst_376 = arith.constant 2.000000e+00 : f32
    %cst_377 = arith.constant 3.000000e+00 : f32
    %1359 = vector.broadcast %cst_376 : f32 to vector<1x256xf32>
    %1360 = arith.maximumf %1359, %1335 : vector<1x256xf32>
    %1361 = vector.broadcast %cst_377 : f32 to vector<1x256xf32>
    %1362 = arith.minimumf %1361, %1360 : vector<1x256xf32>
    %1363 = vector.broadcast %1358 : f32 to vector<1x256xf32>
    %1364 = arith.mulf %1363, %1362 : vector<1x256xf32>
    %1365 = arith.addf %1356, %1364 : vector<1x256xf32>
    %1366 = arith.index_cast %arg0 : i32 to index
    %c108 = arith.constant 108 : index
    %1367 = memref.load %arg3[%1366, %c108] : memref<2x150xf32, #tpu.memory_space<smem>>
    %cst_378 = arith.constant 3.000000e+00 : f32
    %cst_379 = arith.constant 4.000000e+00 : f32
    %1368 = vector.broadcast %cst_378 : f32 to vector<1x256xf32>
    %1369 = arith.maximumf %1368, %1335 : vector<1x256xf32>
    %1370 = vector.broadcast %cst_379 : f32 to vector<1x256xf32>
    %1371 = arith.minimumf %1370, %1369 : vector<1x256xf32>
    %1372 = vector.broadcast %1367 : f32 to vector<1x256xf32>
    %1373 = arith.mulf %1372, %1371 : vector<1x256xf32>
    %1374 = arith.addf %1365, %1373 : vector<1x256xf32>
    %1375 = arith.index_cast %arg0 : i32 to index
    %c109 = arith.constant 109 : index
    %1376 = memref.load %arg3[%1375, %c109] : memref<2x150xf32, #tpu.memory_space<smem>>
    %cst_380 = arith.constant 4.000000e+00 : f32
    %cst_381 = arith.constant 5.000000e+00 : f32
    %1377 = vector.broadcast %cst_380 : f32 to vector<1x256xf32>
    %1378 = arith.maximumf %1377, %1335 : vector<1x256xf32>
    %1379 = vector.broadcast %cst_381 : f32 to vector<1x256xf32>
    %1380 = arith.minimumf %1379, %1378 : vector<1x256xf32>
    %1381 = vector.broadcast %1376 : f32 to vector<1x256xf32>
    %1382 = arith.mulf %1381, %1380 : vector<1x256xf32>
    %1383 = arith.addf %1374, %1382 : vector<1x256xf32>
    %1384 = arith.index_cast %arg0 : i32 to index
    %c110 = arith.constant 110 : index
    %1385 = memref.load %arg3[%1384, %c110] : memref<2x150xf32, #tpu.memory_space<smem>>
    %cst_382 = arith.constant 5.000000e+00 : f32
    %cst_383 = arith.constant 6.000000e+00 : f32
    %1386 = vector.broadcast %cst_382 : f32 to vector<1x256xf32>
    %1387 = arith.maximumf %1386, %1335 : vector<1x256xf32>
    %1388 = vector.broadcast %cst_383 : f32 to vector<1x256xf32>
    %1389 = arith.minimumf %1388, %1387 : vector<1x256xf32>
    %1390 = vector.broadcast %1385 : f32 to vector<1x256xf32>
    %1391 = arith.mulf %1390, %1389 : vector<1x256xf32>
    %1392 = arith.addf %1383, %1391 : vector<1x256xf32>
    %1393 = arith.index_cast %arg0 : i32 to index
    %c111 = arith.constant 111 : index
    %1394 = memref.load %arg3[%1393, %c111] : memref<2x150xf32, #tpu.memory_space<smem>>
    %cst_384 = arith.constant 6.000000e+00 : f32
    %cst_385 = arith.constant 7.000000e+00 : f32
    %1395 = vector.broadcast %cst_384 : f32 to vector<1x256xf32>
    %1396 = arith.maximumf %1395, %1335 : vector<1x256xf32>
    %1397 = vector.broadcast %cst_385 : f32 to vector<1x256xf32>
    %1398 = arith.minimumf %1397, %1396 : vector<1x256xf32>
    %1399 = vector.broadcast %1394 : f32 to vector<1x256xf32>
    %1400 = arith.mulf %1399, %1398 : vector<1x256xf32>
    %1401 = arith.addf %1392, %1400 : vector<1x256xf32>
    %1402 = arith.index_cast %arg0 : i32 to index
    %c112 = arith.constant 112 : index
    %1403 = memref.load %arg3[%1402, %c112] : memref<2x150xf32, #tpu.memory_space<smem>>
    %cst_386 = arith.constant 7.000000e+00 : f32
    %cst_387 = arith.constant 8.000000e+00 : f32
    %1404 = vector.broadcast %cst_386 : f32 to vector<1x256xf32>
    %1405 = arith.maximumf %1404, %1335 : vector<1x256xf32>
    %1406 = vector.broadcast %cst_387 : f32 to vector<1x256xf32>
    %1407 = arith.minimumf %1406, %1405 : vector<1x256xf32>
    %1408 = vector.broadcast %1403 : f32 to vector<1x256xf32>
    %1409 = arith.mulf %1408, %1407 : vector<1x256xf32>
    %1410 = arith.addf %1401, %1409 : vector<1x256xf32>
    %1411 = arith.index_cast %arg0 : i32 to index
    %c113 = arith.constant 113 : index
    %1412 = memref.load %arg3[%1411, %c113] : memref<2x150xf32, #tpu.memory_space<smem>>
    %cst_388 = arith.constant 8.000000e+00 : f32
    %cst_389 = arith.constant 9.000000e+00 : f32
    %1413 = vector.broadcast %cst_388 : f32 to vector<1x256xf32>
    %1414 = arith.maximumf %1413, %1335 : vector<1x256xf32>
    %1415 = vector.broadcast %cst_389 : f32 to vector<1x256xf32>
    %1416 = arith.minimumf %1415, %1414 : vector<1x256xf32>
    %1417 = vector.broadcast %1412 : f32 to vector<1x256xf32>
    %1418 = arith.mulf %1417, %1416 : vector<1x256xf32>
    %1419 = arith.addf %1410, %1418 : vector<1x256xf32>
    %1420 = arith.index_cast %arg0 : i32 to index
    %c114 = arith.constant 114 : index
    %1421 = memref.load %arg3[%1420, %c114] : memref<2x150xf32, #tpu.memory_space<smem>>
    %cst_390 = arith.constant 9.000000e+00 : f32
    %cst_391 = arith.constant 1.000000e+01 : f32
    %1422 = vector.broadcast %cst_390 : f32 to vector<1x256xf32>
    %1423 = arith.maximumf %1422, %1335 : vector<1x256xf32>
    %1424 = vector.broadcast %cst_391 : f32 to vector<1x256xf32>
    %1425 = arith.minimumf %1424, %1423 : vector<1x256xf32>
    %1426 = vector.broadcast %1421 : f32 to vector<1x256xf32>
    %1427 = arith.mulf %1426, %1425 : vector<1x256xf32>
    %1428 = arith.addf %1419, %1427 : vector<1x256xf32>
    %1429 = arith.index_cast %arg0 : i32 to index
    %c115 = arith.constant 115 : index
    %1430 = memref.load %arg3[%1429, %c115] : memref<2x150xf32, #tpu.memory_space<smem>>
    %cst_392 = arith.constant 1.000000e+01 : f32
    %cst_393 = arith.constant 1.100000e+01 : f32
    %1431 = vector.broadcast %cst_392 : f32 to vector<1x256xf32>
    %1432 = arith.maximumf %1431, %1335 : vector<1x256xf32>
    %1433 = vector.broadcast %cst_393 : f32 to vector<1x256xf32>
    %1434 = arith.minimumf %1433, %1432 : vector<1x256xf32>
    %1435 = vector.broadcast %1430 : f32 to vector<1x256xf32>
    %1436 = arith.mulf %1435, %1434 : vector<1x256xf32>
    %1437 = arith.addf %1428, %1436 : vector<1x256xf32>
    %1438 = arith.index_cast %arg0 : i32 to index
    %c116 = arith.constant 116 : index
    %1439 = memref.load %arg3[%1438, %c116] : memref<2x150xf32, #tpu.memory_space<smem>>
    %cst_394 = arith.constant 1.100000e+01 : f32
    %cst_395 = arith.constant 1.200000e+01 : f32
    %1440 = vector.broadcast %cst_394 : f32 to vector<1x256xf32>
    %1441 = arith.maximumf %1440, %1335 : vector<1x256xf32>
    %1442 = vector.broadcast %cst_395 : f32 to vector<1x256xf32>
    %1443 = arith.minimumf %1442, %1441 : vector<1x256xf32>
    %1444 = vector.broadcast %1439 : f32 to vector<1x256xf32>
    %1445 = arith.mulf %1444, %1443 : vector<1x256xf32>
    %1446 = arith.addf %1437, %1445 : vector<1x256xf32>
    %1447 = arith.index_cast %arg0 : i32 to index
    %c117 = arith.constant 117 : index
    %1448 = memref.load %arg3[%1447, %c117] : memref<2x150xf32, #tpu.memory_space<smem>>
    %cst_396 = arith.constant 1.200000e+01 : f32
    %cst_397 = arith.constant 1.300000e+01 : f32
    %1449 = vector.broadcast %cst_396 : f32 to vector<1x256xf32>
    %1450 = arith.maximumf %1449, %1335 : vector<1x256xf32>
    %1451 = vector.broadcast %cst_397 : f32 to vector<1x256xf32>
    %1452 = arith.minimumf %1451, %1450 : vector<1x256xf32>
    %1453 = vector.broadcast %1448 : f32 to vector<1x256xf32>
    %1454 = arith.mulf %1453, %1452 : vector<1x256xf32>
    %1455 = arith.addf %1446, %1454 : vector<1x256xf32>
    %1456 = arith.index_cast %arg0 : i32 to index
    %c118 = arith.constant 118 : index
    %1457 = memref.load %arg3[%1456, %c118] : memref<2x150xf32, #tpu.memory_space<smem>>
    %cst_398 = arith.constant 1.300000e+01 : f32
    %cst_399 = arith.constant 1.400000e+01 : f32
    %1458 = vector.broadcast %cst_398 : f32 to vector<1x256xf32>
    %1459 = arith.maximumf %1458, %1335 : vector<1x256xf32>
    %1460 = vector.broadcast %cst_399 : f32 to vector<1x256xf32>
    %1461 = arith.minimumf %1460, %1459 : vector<1x256xf32>
    %1462 = vector.broadcast %1457 : f32 to vector<1x256xf32>
    %1463 = arith.mulf %1462, %1461 : vector<1x256xf32>
    %1464 = arith.addf %1455, %1463 : vector<1x256xf32>
    %1465 = arith.index_cast %arg0 : i32 to index
    %c119 = arith.constant 119 : index
    %1466 = memref.load %arg3[%1465, %c119] : memref<2x150xf32, #tpu.memory_space<smem>>
    %cst_400 = arith.constant 1.400000e+01 : f32
    %cst_401 = arith.constant 1.500000e+01 : f32
    %1467 = vector.broadcast %cst_400 : f32 to vector<1x256xf32>
    %1468 = arith.maximumf %1467, %1335 : vector<1x256xf32>
    %1469 = vector.broadcast %cst_401 : f32 to vector<1x256xf32>
    %1470 = arith.minimumf %1469, %1468 : vector<1x256xf32>
    %1471 = vector.broadcast %1466 : f32 to vector<1x256xf32>
    %1472 = arith.mulf %1471, %1470 : vector<1x256xf32>
    %1473 = arith.addf %1464, %1472 : vector<1x256xf32>
    %1474 = arith.mulf %1192, %1473 : vector<1x256xf32>
    %cst_402 = arith.constant 1.500000e+01 : f32
    %1475 = vector.broadcast %cst_402 : f32 to vector<1x256xf32>
    %1476 = arith.mulf %1474, %1475 : vector<1x256xf32>
    %1477 = arith.index_cast %arg0 : i32 to index
    %c8_403 = arith.constant 8 : index
    %1478 = memref.load %arg2[%1477, %c8_403] : memref<2x10xf32, #tpu.memory_space<smem>>
    %1479 = arith.index_cast %arg0 : i32 to index
    %c120 = arith.constant 120 : index
    %1480 = memref.load %arg3[%1479, %c120] : memref<2x150xf32, #tpu.memory_space<smem>>
    %cst_404 = arith.constant 0.000000e+00 : f32
    %cst_405 = arith.constant 1.000000e+00 : f32
    %1481 = vector.broadcast %cst_404 : f32 to vector<1x256xf32>
    %1482 = arith.maximumf %1481, %1476 : vector<1x256xf32>
    %1483 = vector.broadcast %cst_405 : f32 to vector<1x256xf32>
    %1484 = arith.minimumf %1483, %1482 : vector<1x256xf32>
    %1485 = vector.broadcast %1480 : f32 to vector<1x256xf32>
    %1486 = arith.mulf %1485, %1484 : vector<1x256xf32>
    %1487 = vector.broadcast %1478 : f32 to vector<1x256xf32>
    %1488 = arith.addf %1487, %1486 : vector<1x256xf32>
    %1489 = arith.index_cast %arg0 : i32 to index
    %c121 = arith.constant 121 : index
    %1490 = memref.load %arg3[%1489, %c121] : memref<2x150xf32, #tpu.memory_space<smem>>
    %cst_406 = arith.constant 1.000000e+00 : f32
    %cst_407 = arith.constant 2.000000e+00 : f32
    %1491 = vector.broadcast %cst_406 : f32 to vector<1x256xf32>
    %1492 = arith.maximumf %1491, %1476 : vector<1x256xf32>
    %1493 = vector.broadcast %cst_407 : f32 to vector<1x256xf32>
    %1494 = arith.minimumf %1493, %1492 : vector<1x256xf32>
    %1495 = vector.broadcast %1490 : f32 to vector<1x256xf32>
    %1496 = arith.mulf %1495, %1494 : vector<1x256xf32>
    %1497 = arith.addf %1488, %1496 : vector<1x256xf32>
    %1498 = arith.index_cast %arg0 : i32 to index
    %c122 = arith.constant 122 : index
    %1499 = memref.load %arg3[%1498, %c122] : memref<2x150xf32, #tpu.memory_space<smem>>
    %cst_408 = arith.constant 2.000000e+00 : f32
    %cst_409 = arith.constant 3.000000e+00 : f32
    %1500 = vector.broadcast %cst_408 : f32 to vector<1x256xf32>
    %1501 = arith.maximumf %1500, %1476 : vector<1x256xf32>
    %1502 = vector.broadcast %cst_409 : f32 to vector<1x256xf32>
    %1503 = arith.minimumf %1502, %1501 : vector<1x256xf32>
    %1504 = vector.broadcast %1499 : f32 to vector<1x256xf32>
    %1505 = arith.mulf %1504, %1503 : vector<1x256xf32>
    %1506 = arith.addf %1497, %1505 : vector<1x256xf32>
    %1507 = arith.index_cast %arg0 : i32 to index
    %c123 = arith.constant 123 : index
    %1508 = memref.load %arg3[%1507, %c123] : memref<2x150xf32, #tpu.memory_space<smem>>
    %cst_410 = arith.constant 3.000000e+00 : f32
    %cst_411 = arith.constant 4.000000e+00 : f32
    %1509 = vector.broadcast %cst_410 : f32 to vector<1x256xf32>
    %1510 = arith.maximumf %1509, %1476 : vector<1x256xf32>
    %1511 = vector.broadcast %cst_411 : f32 to vector<1x256xf32>
    %1512 = arith.minimumf %1511, %1510 : vector<1x256xf32>
    %1513 = vector.broadcast %1508 : f32 to vector<1x256xf32>
    %1514 = arith.mulf %1513, %1512 : vector<1x256xf32>
    %1515 = arith.addf %1506, %1514 : vector<1x256xf32>
    %1516 = arith.index_cast %arg0 : i32 to index
    %c124 = arith.constant 124 : index
    %1517 = memref.load %arg3[%1516, %c124] : memref<2x150xf32, #tpu.memory_space<smem>>
    %cst_412 = arith.constant 4.000000e+00 : f32
    %cst_413 = arith.constant 5.000000e+00 : f32
    %1518 = vector.broadcast %cst_412 : f32 to vector<1x256xf32>
    %1519 = arith.maximumf %1518, %1476 : vector<1x256xf32>
    %1520 = vector.broadcast %cst_413 : f32 to vector<1x256xf32>
    %1521 = arith.minimumf %1520, %1519 : vector<1x256xf32>
    %1522 = vector.broadcast %1517 : f32 to vector<1x256xf32>
    %1523 = arith.mulf %1522, %1521 : vector<1x256xf32>
    %1524 = arith.addf %1515, %1523 : vector<1x256xf32>
    %1525 = arith.index_cast %arg0 : i32 to index
    %c125 = arith.constant 125 : index
    %1526 = memref.load %arg3[%1525, %c125] : memref<2x150xf32, #tpu.memory_space<smem>>
    %cst_414 = arith.constant 5.000000e+00 : f32
    %cst_415 = arith.constant 6.000000e+00 : f32
    %1527 = vector.broadcast %cst_414 : f32 to vector<1x256xf32>
    %1528 = arith.maximumf %1527, %1476 : vector<1x256xf32>
    %1529 = vector.broadcast %cst_415 : f32 to vector<1x256xf32>
    %1530 = arith.minimumf %1529, %1528 : vector<1x256xf32>
    %1531 = vector.broadcast %1526 : f32 to vector<1x256xf32>
    %1532 = arith.mulf %1531, %1530 : vector<1x256xf32>
    %1533 = arith.addf %1524, %1532 : vector<1x256xf32>
    %1534 = arith.index_cast %arg0 : i32 to index
    %c126 = arith.constant 126 : index
    %1535 = memref.load %arg3[%1534, %c126] : memref<2x150xf32, #tpu.memory_space<smem>>
    %cst_416 = arith.constant 6.000000e+00 : f32
    %cst_417 = arith.constant 7.000000e+00 : f32
    %1536 = vector.broadcast %cst_416 : f32 to vector<1x256xf32>
    %1537 = arith.maximumf %1536, %1476 : vector<1x256xf32>
    %1538 = vector.broadcast %cst_417 : f32 to vector<1x256xf32>
    %1539 = arith.minimumf %1538, %1537 : vector<1x256xf32>
    %1540 = vector.broadcast %1535 : f32 to vector<1x256xf32>
    %1541 = arith.mulf %1540, %1539 : vector<1x256xf32>
    %1542 = arith.addf %1533, %1541 : vector<1x256xf32>
    %1543 = arith.index_cast %arg0 : i32 to index
    %c127 = arith.constant 127 : index
    %1544 = memref.load %arg3[%1543, %c127] : memref<2x150xf32, #tpu.memory_space<smem>>
    %cst_418 = arith.constant 7.000000e+00 : f32
    %cst_419 = arith.constant 8.000000e+00 : f32
    %1545 = vector.broadcast %cst_418 : f32 to vector<1x256xf32>
    %1546 = arith.maximumf %1545, %1476 : vector<1x256xf32>
    %1547 = vector.broadcast %cst_419 : f32 to vector<1x256xf32>
    %1548 = arith.minimumf %1547, %1546 : vector<1x256xf32>
    %1549 = vector.broadcast %1544 : f32 to vector<1x256xf32>
    %1550 = arith.mulf %1549, %1548 : vector<1x256xf32>
    %1551 = arith.addf %1542, %1550 : vector<1x256xf32>
    %1552 = arith.index_cast %arg0 : i32 to index
    %c128 = arith.constant 128 : index
    %1553 = memref.load %arg3[%1552, %c128] : memref<2x150xf32, #tpu.memory_space<smem>>
    %cst_420 = arith.constant 8.000000e+00 : f32
    %cst_421 = arith.constant 9.000000e+00 : f32
    %1554 = vector.broadcast %cst_420 : f32 to vector<1x256xf32>
    %1555 = arith.maximumf %1554, %1476 : vector<1x256xf32>
    %1556 = vector.broadcast %cst_421 : f32 to vector<1x256xf32>
    %1557 = arith.minimumf %1556, %1555 : vector<1x256xf32>
    %1558 = vector.broadcast %1553 : f32 to vector<1x256xf32>
    %1559 = arith.mulf %1558, %1557 : vector<1x256xf32>
    %1560 = arith.addf %1551, %1559 : vector<1x256xf32>
    %1561 = arith.index_cast %arg0 : i32 to index
    %c129 = arith.constant 129 : index
    %1562 = memref.load %arg3[%1561, %c129] : memref<2x150xf32, #tpu.memory_space<smem>>
    %cst_422 = arith.constant 9.000000e+00 : f32
    %cst_423 = arith.constant 1.000000e+01 : f32
    %1563 = vector.broadcast %cst_422 : f32 to vector<1x256xf32>
    %1564 = arith.maximumf %1563, %1476 : vector<1x256xf32>
    %1565 = vector.broadcast %cst_423 : f32 to vector<1x256xf32>
    %1566 = arith.minimumf %1565, %1564 : vector<1x256xf32>
    %1567 = vector.broadcast %1562 : f32 to vector<1x256xf32>
    %1568 = arith.mulf %1567, %1566 : vector<1x256xf32>
    %1569 = arith.addf %1560, %1568 : vector<1x256xf32>
    %1570 = arith.index_cast %arg0 : i32 to index
    %c130 = arith.constant 130 : index
    %1571 = memref.load %arg3[%1570, %c130] : memref<2x150xf32, #tpu.memory_space<smem>>
    %cst_424 = arith.constant 1.000000e+01 : f32
    %cst_425 = arith.constant 1.100000e+01 : f32
    %1572 = vector.broadcast %cst_424 : f32 to vector<1x256xf32>
    %1573 = arith.maximumf %1572, %1476 : vector<1x256xf32>
    %1574 = vector.broadcast %cst_425 : f32 to vector<1x256xf32>
    %1575 = arith.minimumf %1574, %1573 : vector<1x256xf32>
    %1576 = vector.broadcast %1571 : f32 to vector<1x256xf32>
    %1577 = arith.mulf %1576, %1575 : vector<1x256xf32>
    %1578 = arith.addf %1569, %1577 : vector<1x256xf32>
    %1579 = arith.index_cast %arg0 : i32 to index
    %c131 = arith.constant 131 : index
    %1580 = memref.load %arg3[%1579, %c131] : memref<2x150xf32, #tpu.memory_space<smem>>
    %cst_426 = arith.constant 1.100000e+01 : f32
    %cst_427 = arith.constant 1.200000e+01 : f32
    %1581 = vector.broadcast %cst_426 : f32 to vector<1x256xf32>
    %1582 = arith.maximumf %1581, %1476 : vector<1x256xf32>
    %1583 = vector.broadcast %cst_427 : f32 to vector<1x256xf32>
    %1584 = arith.minimumf %1583, %1582 : vector<1x256xf32>
    %1585 = vector.broadcast %1580 : f32 to vector<1x256xf32>
    %1586 = arith.mulf %1585, %1584 : vector<1x256xf32>
    %1587 = arith.addf %1578, %1586 : vector<1x256xf32>
    %1588 = arith.index_cast %arg0 : i32 to index
    %c132 = arith.constant 132 : index
    %1589 = memref.load %arg3[%1588, %c132] : memref<2x150xf32, #tpu.memory_space<smem>>
    %cst_428 = arith.constant 1.200000e+01 : f32
    %cst_429 = arith.constant 1.300000e+01 : f32
    %1590 = vector.broadcast %cst_428 : f32 to vector<1x256xf32>
    %1591 = arith.maximumf %1590, %1476 : vector<1x256xf32>
    %1592 = vector.broadcast %cst_429 : f32 to vector<1x256xf32>
    %1593 = arith.minimumf %1592, %1591 : vector<1x256xf32>
    %1594 = vector.broadcast %1589 : f32 to vector<1x256xf32>
    %1595 = arith.mulf %1594, %1593 : vector<1x256xf32>
    %1596 = arith.addf %1587, %1595 : vector<1x256xf32>
    %1597 = arith.index_cast %arg0 : i32 to index
    %c133 = arith.constant 133 : index
    %1598 = memref.load %arg3[%1597, %c133] : memref<2x150xf32, #tpu.memory_space<smem>>
    %cst_430 = arith.constant 1.300000e+01 : f32
    %cst_431 = arith.constant 1.400000e+01 : f32
    %1599 = vector.broadcast %cst_430 : f32 to vector<1x256xf32>
    %1600 = arith.maximumf %1599, %1476 : vector<1x256xf32>
    %1601 = vector.broadcast %cst_431 : f32 to vector<1x256xf32>
    %1602 = arith.minimumf %1601, %1600 : vector<1x256xf32>
    %1603 = vector.broadcast %1598 : f32 to vector<1x256xf32>
    %1604 = arith.mulf %1603, %1602 : vector<1x256xf32>
    %1605 = arith.addf %1596, %1604 : vector<1x256xf32>
    %1606 = arith.index_cast %arg0 : i32 to index
    %c134 = arith.constant 134 : index
    %1607 = memref.load %arg3[%1606, %c134] : memref<2x150xf32, #tpu.memory_space<smem>>
    %cst_432 = arith.constant 1.400000e+01 : f32
    %cst_433 = arith.constant 1.500000e+01 : f32
    %1608 = vector.broadcast %cst_432 : f32 to vector<1x256xf32>
    %1609 = arith.maximumf %1608, %1476 : vector<1x256xf32>
    %1610 = vector.broadcast %cst_433 : f32 to vector<1x256xf32>
    %1611 = arith.minimumf %1610, %1609 : vector<1x256xf32>
    %1612 = vector.broadcast %1607 : f32 to vector<1x256xf32>
    %1613 = arith.mulf %1612, %1611 : vector<1x256xf32>
    %1614 = arith.addf %1605, %1613 : vector<1x256xf32>
    %1615 = arith.mulf %1474, %1614 : vector<1x256xf32>
    %cst_434 = arith.constant 1.500000e+01 : f32
    %1616 = vector.broadcast %cst_434 : f32 to vector<1x256xf32>
    %1617 = arith.mulf %1145, %1616 : vector<1x256xf32>
    %1618 = arith.index_cast %arg0 : i32 to index
    %c9_435 = arith.constant 9 : index
    %1619 = memref.load %arg2[%1618, %c9_435] : memref<2x10xf32, #tpu.memory_space<smem>>
    %1620 = arith.index_cast %arg0 : i32 to index
    %c135 = arith.constant 135 : index
    %1621 = memref.load %arg3[%1620, %c135] : memref<2x150xf32, #tpu.memory_space<smem>>
    %cst_436 = arith.constant 0.000000e+00 : f32
    %cst_437 = arith.constant 1.000000e+00 : f32
    %1622 = vector.broadcast %cst_436 : f32 to vector<1x256xf32>
    %1623 = arith.maximumf %1622, %1617 : vector<1x256xf32>
    %1624 = vector.broadcast %cst_437 : f32 to vector<1x256xf32>
    %1625 = arith.minimumf %1624, %1623 : vector<1x256xf32>
    %1626 = vector.broadcast %1621 : f32 to vector<1x256xf32>
    %1627 = arith.mulf %1626, %1625 : vector<1x256xf32>
    %1628 = vector.broadcast %1619 : f32 to vector<1x256xf32>
    %1629 = arith.addf %1628, %1627 : vector<1x256xf32>
    %1630 = arith.index_cast %arg0 : i32 to index
    %c136 = arith.constant 136 : index
    %1631 = memref.load %arg3[%1630, %c136] : memref<2x150xf32, #tpu.memory_space<smem>>
    %cst_438 = arith.constant 1.000000e+00 : f32
    %cst_439 = arith.constant 2.000000e+00 : f32
    %1632 = vector.broadcast %cst_438 : f32 to vector<1x256xf32>
    %1633 = arith.maximumf %1632, %1617 : vector<1x256xf32>
    %1634 = vector.broadcast %cst_439 : f32 to vector<1x256xf32>
    %1635 = arith.minimumf %1634, %1633 : vector<1x256xf32>
    %1636 = vector.broadcast %1631 : f32 to vector<1x256xf32>
    %1637 = arith.mulf %1636, %1635 : vector<1x256xf32>
    %1638 = arith.addf %1629, %1637 : vector<1x256xf32>
    %1639 = arith.index_cast %arg0 : i32 to index
    %c137 = arith.constant 137 : index
    %1640 = memref.load %arg3[%1639, %c137] : memref<2x150xf32, #tpu.memory_space<smem>>
    %cst_440 = arith.constant 2.000000e+00 : f32
    %cst_441 = arith.constant 3.000000e+00 : f32
    %1641 = vector.broadcast %cst_440 : f32 to vector<1x256xf32>
    %1642 = arith.maximumf %1641, %1617 : vector<1x256xf32>
    %1643 = vector.broadcast %cst_441 : f32 to vector<1x256xf32>
    %1644 = arith.minimumf %1643, %1642 : vector<1x256xf32>
    %1645 = vector.broadcast %1640 : f32 to vector<1x256xf32>
    %1646 = arith.mulf %1645, %1644 : vector<1x256xf32>
    %1647 = arith.addf %1638, %1646 : vector<1x256xf32>
    %1648 = arith.index_cast %arg0 : i32 to index
    %c138 = arith.constant 138 : index
    %1649 = memref.load %arg3[%1648, %c138] : memref<2x150xf32, #tpu.memory_space<smem>>
    %cst_442 = arith.constant 3.000000e+00 : f32
    %cst_443 = arith.constant 4.000000e+00 : f32
    %1650 = vector.broadcast %cst_442 : f32 to vector<1x256xf32>
    %1651 = arith.maximumf %1650, %1617 : vector<1x256xf32>
    %1652 = vector.broadcast %cst_443 : f32 to vector<1x256xf32>
    %1653 = arith.minimumf %1652, %1651 : vector<1x256xf32>
    %1654 = vector.broadcast %1649 : f32 to vector<1x256xf32>
    %1655 = arith.mulf %1654, %1653 : vector<1x256xf32>
    %1656 = arith.addf %1647, %1655 : vector<1x256xf32>
    %1657 = arith.index_cast %arg0 : i32 to index
    %c139 = arith.constant 139 : index
    %1658 = memref.load %arg3[%1657, %c139] : memref<2x150xf32, #tpu.memory_space<smem>>
    %cst_444 = arith.constant 4.000000e+00 : f32
    %cst_445 = arith.constant 5.000000e+00 : f32
    %1659 = vector.broadcast %cst_444 : f32 to vector<1x256xf32>
    %1660 = arith.maximumf %1659, %1617 : vector<1x256xf32>
    %1661 = vector.broadcast %cst_445 : f32 to vector<1x256xf32>
    %1662 = arith.minimumf %1661, %1660 : vector<1x256xf32>
    %1663 = vector.broadcast %1658 : f32 to vector<1x256xf32>
    %1664 = arith.mulf %1663, %1662 : vector<1x256xf32>
    %1665 = arith.addf %1656, %1664 : vector<1x256xf32>
    %1666 = arith.index_cast %arg0 : i32 to index
    %c140 = arith.constant 140 : index
    %1667 = memref.load %arg3[%1666, %c140] : memref<2x150xf32, #tpu.memory_space<smem>>
    %cst_446 = arith.constant 5.000000e+00 : f32
    %cst_447 = arith.constant 6.000000e+00 : f32
    %1668 = vector.broadcast %cst_446 : f32 to vector<1x256xf32>
    %1669 = arith.maximumf %1668, %1617 : vector<1x256xf32>
    %1670 = vector.broadcast %cst_447 : f32 to vector<1x256xf32>
    %1671 = arith.minimumf %1670, %1669 : vector<1x256xf32>
    %1672 = vector.broadcast %1667 : f32 to vector<1x256xf32>
    %1673 = arith.mulf %1672, %1671 : vector<1x256xf32>
    %1674 = arith.addf %1665, %1673 : vector<1x256xf32>
    %1675 = arith.index_cast %arg0 : i32 to index
    %c141 = arith.constant 141 : index
    %1676 = memref.load %arg3[%1675, %c141] : memref<2x150xf32, #tpu.memory_space<smem>>
    %cst_448 = arith.constant 6.000000e+00 : f32
    %cst_449 = arith.constant 7.000000e+00 : f32
    %1677 = vector.broadcast %cst_448 : f32 to vector<1x256xf32>
    %1678 = arith.maximumf %1677, %1617 : vector<1x256xf32>
    %1679 = vector.broadcast %cst_449 : f32 to vector<1x256xf32>
    %1680 = arith.minimumf %1679, %1678 : vector<1x256xf32>
    %1681 = vector.broadcast %1676 : f32 to vector<1x256xf32>
    %1682 = arith.mulf %1681, %1680 : vector<1x256xf32>
    %1683 = arith.addf %1674, %1682 : vector<1x256xf32>
    %1684 = arith.index_cast %arg0 : i32 to index
    %c142 = arith.constant 142 : index
    %1685 = memref.load %arg3[%1684, %c142] : memref<2x150xf32, #tpu.memory_space<smem>>
    %cst_450 = arith.constant 7.000000e+00 : f32
    %cst_451 = arith.constant 8.000000e+00 : f32
    %1686 = vector.broadcast %cst_450 : f32 to vector<1x256xf32>
    %1687 = arith.maximumf %1686, %1617 : vector<1x256xf32>
    %1688 = vector.broadcast %cst_451 : f32 to vector<1x256xf32>
    %1689 = arith.minimumf %1688, %1687 : vector<1x256xf32>
    %1690 = vector.broadcast %1685 : f32 to vector<1x256xf32>
    %1691 = arith.mulf %1690, %1689 : vector<1x256xf32>
    %1692 = arith.addf %1683, %1691 : vector<1x256xf32>
    %1693 = arith.index_cast %arg0 : i32 to index
    %c143 = arith.constant 143 : index
    %1694 = memref.load %arg3[%1693, %c143] : memref<2x150xf32, #tpu.memory_space<smem>>
    %cst_452 = arith.constant 8.000000e+00 : f32
    %cst_453 = arith.constant 9.000000e+00 : f32
    %1695 = vector.broadcast %cst_452 : f32 to vector<1x256xf32>
    %1696 = arith.maximumf %1695, %1617 : vector<1x256xf32>
    %1697 = vector.broadcast %cst_453 : f32 to vector<1x256xf32>
    %1698 = arith.minimumf %1697, %1696 : vector<1x256xf32>
    %1699 = vector.broadcast %1694 : f32 to vector<1x256xf32>
    %1700 = arith.mulf %1699, %1698 : vector<1x256xf32>
    %1701 = arith.addf %1692, %1700 : vector<1x256xf32>
    %1702 = arith.index_cast %arg0 : i32 to index
    %c144 = arith.constant 144 : index
    %1703 = memref.load %arg3[%1702, %c144] : memref<2x150xf32, #tpu.memory_space<smem>>
    %cst_454 = arith.constant 9.000000e+00 : f32
    %cst_455 = arith.constant 1.000000e+01 : f32
    %1704 = vector.broadcast %cst_454 : f32 to vector<1x256xf32>
    %1705 = arith.maximumf %1704, %1617 : vector<1x256xf32>
    %1706 = vector.broadcast %cst_455 : f32 to vector<1x256xf32>
    %1707 = arith.minimumf %1706, %1705 : vector<1x256xf32>
    %1708 = vector.broadcast %1703 : f32 to vector<1x256xf32>
    %1709 = arith.mulf %1708, %1707 : vector<1x256xf32>
    %1710 = arith.addf %1701, %1709 : vector<1x256xf32>
    %1711 = arith.index_cast %arg0 : i32 to index
    %c145 = arith.constant 145 : index
    %1712 = memref.load %arg3[%1711, %c145] : memref<2x150xf32, #tpu.memory_space<smem>>
    %cst_456 = arith.constant 1.000000e+01 : f32
    %cst_457 = arith.constant 1.100000e+01 : f32
    %1713 = vector.broadcast %cst_456 : f32 to vector<1x256xf32>
    %1714 = arith.maximumf %1713, %1617 : vector<1x256xf32>
    %1715 = vector.broadcast %cst_457 : f32 to vector<1x256xf32>
    %1716 = arith.minimumf %1715, %1714 : vector<1x256xf32>
    %1717 = vector.broadcast %1712 : f32 to vector<1x256xf32>
    %1718 = arith.mulf %1717, %1716 : vector<1x256xf32>
    %1719 = arith.addf %1710, %1718 : vector<1x256xf32>
    %1720 = arith.index_cast %arg0 : i32 to index
    %c146 = arith.constant 146 : index
    %1721 = memref.load %arg3[%1720, %c146] : memref<2x150xf32, #tpu.memory_space<smem>>
    %cst_458 = arith.constant 1.100000e+01 : f32
    %cst_459 = arith.constant 1.200000e+01 : f32
    %1722 = vector.broadcast %cst_458 : f32 to vector<1x256xf32>
    %1723 = arith.maximumf %1722, %1617 : vector<1x256xf32>
    %1724 = vector.broadcast %cst_459 : f32 to vector<1x256xf32>
    %1725 = arith.minimumf %1724, %1723 : vector<1x256xf32>
    %1726 = vector.broadcast %1721 : f32 to vector<1x256xf32>
    %1727 = arith.mulf %1726, %1725 : vector<1x256xf32>
    %1728 = arith.addf %1719, %1727 : vector<1x256xf32>
    %1729 = arith.index_cast %arg0 : i32 to index
    %c147 = arith.constant 147 : index
    %1730 = memref.load %arg3[%1729, %c147] : memref<2x150xf32, #tpu.memory_space<smem>>
    %cst_460 = arith.constant 1.200000e+01 : f32
    %cst_461 = arith.constant 1.300000e+01 : f32
    %1731 = vector.broadcast %cst_460 : f32 to vector<1x256xf32>
    %1732 = arith.maximumf %1731, %1617 : vector<1x256xf32>
    %1733 = vector.broadcast %cst_461 : f32 to vector<1x256xf32>
    %1734 = arith.minimumf %1733, %1732 : vector<1x256xf32>
    %1735 = vector.broadcast %1730 : f32 to vector<1x256xf32>
    %1736 = arith.mulf %1735, %1734 : vector<1x256xf32>
    %1737 = arith.addf %1728, %1736 : vector<1x256xf32>
    %1738 = arith.index_cast %arg0 : i32 to index
    %c148 = arith.constant 148 : index
    %1739 = memref.load %arg3[%1738, %c148] : memref<2x150xf32, #tpu.memory_space<smem>>
    %cst_462 = arith.constant 1.300000e+01 : f32
    %cst_463 = arith.constant 1.400000e+01 : f32
    %1740 = vector.broadcast %cst_462 : f32 to vector<1x256xf32>
    %1741 = arith.maximumf %1740, %1617 : vector<1x256xf32>
    %1742 = vector.broadcast %cst_463 : f32 to vector<1x256xf32>
    %1743 = arith.minimumf %1742, %1741 : vector<1x256xf32>
    %1744 = vector.broadcast %1739 : f32 to vector<1x256xf32>
    %1745 = arith.mulf %1744, %1743 : vector<1x256xf32>
    %1746 = arith.addf %1737, %1745 : vector<1x256xf32>
    %1747 = arith.index_cast %arg0 : i32 to index
    %c149 = arith.constant 149 : index
    %1748 = memref.load %arg3[%1747, %c149] : memref<2x150xf32, #tpu.memory_space<smem>>
    %cst_464 = arith.constant 1.400000e+01 : f32
    %cst_465 = arith.constant 1.500000e+01 : f32
    %1749 = vector.broadcast %cst_464 : f32 to vector<1x256xf32>
    %1750 = arith.maximumf %1749, %1617 : vector<1x256xf32>
    %1751 = vector.broadcast %cst_465 : f32 to vector<1x256xf32>
    %1752 = arith.minimumf %1751, %1750 : vector<1x256xf32>
    %1753 = vector.broadcast %1748 : f32 to vector<1x256xf32>
    %1754 = arith.mulf %1753, %1752 : vector<1x256xf32>
    %1755 = arith.addf %1746, %1754 : vector<1x256xf32>
    %1756 = arith.mulf %1145, %1755 : vector<1x256xf32>
    %cst_466 = arith.constant 0.000000e+00 : f32
    %cst_467 = arith.constant 1.000000e+00 : f32
    %1757 = vector.broadcast %cst_466 : f32 to vector<1x256xf32>
    %1758 = arith.maximumf %1757, %1333 : vector<1x256xf32>
    %1759 = vector.broadcast %cst_467 : f32 to vector<1x256xf32>
    %1760 = arith.minimumf %1759, %1758 : vector<1x256xf32>
    %1761 = arith.mulf %1760, %13 : vector<1x256xf32>
    %cst_468 = arith.constant 0.000000e+00 : f32
    %cst_469 = arith.constant 1.000000e+00 : f32
    %1762 = vector.broadcast %cst_468 : f32 to vector<1x256xf32>
    %1763 = arith.maximumf %1762, %1615 : vector<1x256xf32>
    %1764 = vector.broadcast %cst_469 : f32 to vector<1x256xf32>
    %1765 = arith.minimumf %1764, %1763 : vector<1x256xf32>
    %1766 = arith.mulf %1765, %13 : vector<1x256xf32>
    %cst_470 = arith.constant 0.000000e+00 : f32
    %cst_471 = arith.constant 1.000000e+00 : f32
    %1767 = vector.broadcast %cst_470 : f32 to vector<1x256xf32>
    %1768 = arith.maximumf %1767, %1756 : vector<1x256xf32>
    %1769 = vector.broadcast %cst_471 : f32 to vector<1x256xf32>
    %1770 = arith.minimumf %1769, %1768 : vector<1x256xf32>
    %1771 = arith.mulf %1770, %13 : vector<1x256xf32>
    %cst_472 = arith.constant 3.600000e+02 : f32
    %1772 = vector.broadcast %cst_472 : f32 to vector<1x256xf32>
    %1773 = arith.mulf %1761, %1772 : vector<1x256xf32>
    %cst_473 = arith.constant 1.000000e+00 : f32
    %1774 = vector.broadcast %cst_473 : f32 to vector<1x256xf32>
    %1775 = arith.subf %1774, %1766 : vector<1x256xf32>
    %1776 = arith.mulf %1771, %1775 : vector<1x256xf32>
    %1777 = arith.subf %1776, %1771 : vector<1x256xf32>
    %cst_474 = arith.constant 0.0166666675 : f32
    %1778 = vector.broadcast %cst_474 : f32 to vector<1x256xf32>
    %1779 = arith.mulf %1777, %1778 : vector<1x256xf32>
    %cst_475 = arith.constant 0.000000e+00 : f32
    %1780 = vector.broadcast %cst_475 : f32 to vector<1x256xf32>
    %1781 = arith.subf %1780, %1779 : vector<1x256xf32>
    %cst_476 = arith.constant 6.000000e+01 : f32
    %1782 = vector.broadcast %cst_476 : f32 to vector<1x256xf32>
    %1783 = arith.subf %1773, %1782 : vector<1x256xf32>
    %cst_477 = arith.constant 0.000000e+00 : f32
    %cst_478 = arith.constant 6.000000e+01 : f32
    %1784 = vector.broadcast %cst_477 : f32 to vector<1x256xf32>
    %1785 = arith.maximumf %1784, %1783 : vector<1x256xf32>
    %1786 = vector.broadcast %cst_478 : f32 to vector<1x256xf32>
    %1787 = arith.minimumf %1786, %1785 : vector<1x256xf32>
    %1788 = arith.mulf %1787, %1779 : vector<1x256xf32>
    %1789 = arith.addf %1771, %1788 : vector<1x256xf32>
    %cst_479 = arith.constant 2.400000e+02 : f32
    %1790 = vector.broadcast %cst_479 : f32 to vector<1x256xf32>
    %1791 = arith.subf %1773, %1790 : vector<1x256xf32>
    %cst_480 = arith.constant 0.000000e+00 : f32
    %cst_481 = arith.constant 6.000000e+01 : f32
    %1792 = vector.broadcast %cst_480 : f32 to vector<1x256xf32>
    %1793 = arith.maximumf %1792, %1791 : vector<1x256xf32>
    %1794 = vector.broadcast %cst_481 : f32 to vector<1x256xf32>
    %1795 = arith.minimumf %1794, %1793 : vector<1x256xf32>
    %1796 = arith.mulf %1795, %1779 : vector<1x256xf32>
    %1797 = arith.subf %1789, %1796 : vector<1x256xf32>
    %cst_482 = arith.constant 0.000000e+00 : f32
    %cst_483 = arith.constant 6.000000e+01 : f32
    %1798 = vector.broadcast %cst_482 : f32 to vector<1x256xf32>
    %1799 = arith.maximumf %1798, %1773 : vector<1x256xf32>
    %1800 = vector.broadcast %cst_483 : f32 to vector<1x256xf32>
    %1801 = arith.minimumf %1800, %1799 : vector<1x256xf32>
    %1802 = arith.mulf %1801, %1781 : vector<1x256xf32>
    %1803 = arith.addf %1776, %1802 : vector<1x256xf32>
    %cst_484 = arith.constant 1.800000e+02 : f32
    %1804 = vector.broadcast %cst_484 : f32 to vector<1x256xf32>
    %1805 = arith.subf %1773, %1804 : vector<1x256xf32>
    %cst_485 = arith.constant 0.000000e+00 : f32
    %cst_486 = arith.constant 6.000000e+01 : f32
    %1806 = vector.broadcast %cst_485 : f32 to vector<1x256xf32>
    %1807 = arith.maximumf %1806, %1805 : vector<1x256xf32>
    %1808 = vector.broadcast %cst_486 : f32 to vector<1x256xf32>
    %1809 = arith.minimumf %1808, %1807 : vector<1x256xf32>
    %1810 = arith.mulf %1809, %1781 : vector<1x256xf32>
    %1811 = arith.subf %1803, %1810 : vector<1x256xf32>
    %cst_487 = arith.constant 1.200000e+02 : f32
    %1812 = vector.broadcast %cst_487 : f32 to vector<1x256xf32>
    %1813 = arith.subf %1773, %1812 : vector<1x256xf32>
    %cst_488 = arith.constant 0.000000e+00 : f32
    %cst_489 = arith.constant 6.000000e+01 : f32
    %1814 = vector.broadcast %cst_488 : f32 to vector<1x256xf32>
    %1815 = arith.maximumf %1814, %1813 : vector<1x256xf32>
    %1816 = vector.broadcast %cst_489 : f32 to vector<1x256xf32>
    %1817 = arith.minimumf %1816, %1815 : vector<1x256xf32>
    %1818 = arith.mulf %1817, %1781 : vector<1x256xf32>
    %1819 = arith.addf %1776, %1818 : vector<1x256xf32>
    %cst_490 = arith.constant 3.000000e+02 : f32
    %1820 = vector.broadcast %cst_490 : f32 to vector<1x256xf32>
    %1821 = arith.subf %1773, %1820 : vector<1x256xf32>
    %cst_491 = arith.constant 0.000000e+00 : f32
    %cst_492 = arith.constant 6.000000e+01 : f32
    %1822 = vector.broadcast %cst_491 : f32 to vector<1x256xf32>
    %1823 = arith.maximumf %1822, %1821 : vector<1x256xf32>
    %1824 = vector.broadcast %cst_492 : f32 to vector<1x256xf32>
    %1825 = arith.minimumf %1824, %1823 : vector<1x256xf32>
    %1826 = arith.mulf %1825, %1781 : vector<1x256xf32>
    %1827 = arith.subf %1819, %1826 : vector<1x256xf32>
    %cst_493 = arith.constant 0.000000e+00 : f32
    %cst_494 = arith.constant 1.000000e+00 : f32
    %1828 = vector.broadcast %cst_493 : f32 to vector<1x256xf32>
    %1829 = arith.maximumf %1828, %1797 : vector<1x256xf32>
    %1830 = vector.broadcast %cst_494 : f32 to vector<1x256xf32>
    %1831 = arith.minimumf %1830, %1829 : vector<1x256xf32>
    %cst_495 = arith.constant 0.000000e+00 : f32
    %cst_496 = arith.constant 1.000000e+00 : f32
    %1832 = vector.broadcast %cst_495 : f32 to vector<1x256xf32>
    %1833 = arith.maximumf %1832, %1811 : vector<1x256xf32>
    %1834 = vector.broadcast %cst_496 : f32 to vector<1x256xf32>
    %1835 = arith.minimumf %1834, %1833 : vector<1x256xf32>
    %cst_497 = arith.constant 0.000000e+00 : f32
    %cst_498 = arith.constant 1.000000e+00 : f32
    %1836 = vector.broadcast %cst_497 : f32 to vector<1x256xf32>
    %1837 = arith.maximumf %1836, %1827 : vector<1x256xf32>
    %1838 = vector.broadcast %cst_498 : f32 to vector<1x256xf32>
    %1839 = arith.minimumf %1838, %1837 : vector<1x256xf32>
    %1840 = arith.addf %4, %1831 : vector<1x256xf32>
    %cst_499 = arith.constant 0.000000e+00 : f32
    %cst_500 = arith.constant 1.000000e+00 : f32
    %1841 = vector.broadcast %cst_499 : f32 to vector<1x256xf32>
    %1842 = arith.maximumf %1841, %1840 : vector<1x256xf32>
    %1843 = vector.broadcast %cst_500 : f32 to vector<1x256xf32>
    %1844 = arith.minimumf %1843, %1842 : vector<1x256xf32>
    %1845 = arith.mulf %1844, %13 : vector<1x256xf32>
    %c0_501 = arith.constant 0 : index
    %c0_502 = arith.constant 0 : index
    %1846 = arith.index_cast %1 : i32 to index
    %c0_503 = arith.constant 0 : index
    %1847 = vector.load %arg6[%c0_501, %c0_502, %1846, %c0_503] : memref<1x3x1x256xf32, #tpu.memory_space<vmem>>, vector<1x1x1x256xf32>
    %1848 = vector.shape_cast %1847 : vector<1x1x1x256xf32> to vector<1x256xf32>
    %1849 = vector.shape_cast %1845 : vector<1x256xf32> to vector<1x1x1x256xf32>
    tpu.vector_store %arg6[%c0_501, %c0_502, %1846, %c0_503], %1849 {strides = array<i32>} : memref<1x3x1x256xf32, #tpu.memory_space<vmem>>, vector<1x1x1x256xf32>,
    %1850 = arith.addf %7, %1835 : vector<1x256xf32>
    %cst_504 = arith.constant 0.000000e+00 : f32
    %cst_505 = arith.constant 1.000000e+00 : f32
    %1851 = vector.broadcast %cst_504 : f32 to vector<1x256xf32>
    %1852 = arith.maximumf %1851, %1850 : vector<1x256xf32>
    %1853 = vector.broadcast %cst_505 : f32 to vector<1x256xf32>
    %1854 = arith.minimumf %1853, %1852 : vector<1x256xf32>
    %1855 = arith.mulf %1854, %13 : vector<1x256xf32>
    %c0_506 = arith.constant 0 : index
    %c1_507 = arith.constant 1 : index
    %1856 = arith.index_cast %1 : i32 to index
    %c0_508 = arith.constant 0 : index
    %1857 = vector.load %arg6[%c0_506, %c1_507, %1856, %c0_508] : memref<1x3x1x256xf32, #tpu.memory_space<vmem>>, vector<1x1x1x256xf32>
    %1858 = vector.shape_cast %1857 : vector<1x1x1x256xf32> to vector<1x256xf32>
    %1859 = vector.shape_cast %1855 : vector<1x256xf32> to vector<1x1x1x256xf32>
    tpu.vector_store %arg6[%c0_506, %c1_507, %1856, %c0_508], %1859 {strides = array<i32>} : memref<1x3x1x256xf32, #tpu.memory_space<vmem>>, vector<1x1x1x256xf32>,
    %1860 = arith.addf %10, %1839 : vector<1x256xf32>
    %cst_509 = arith.constant 0.000000e+00 : f32
    %cst_510 = arith.constant 1.000000e+00 : f32
    %1861 = vector.broadcast %cst_509 : f32 to vector<1x256xf32>
    %1862 = arith.maximumf %1861, %1860 : vector<1x256xf32>
    %1863 = vector.broadcast %cst_510 : f32 to vector<1x256xf32>
    %1864 = arith.minimumf %1863, %1862 : vector<1x256xf32>
    %1865 = arith.mulf %1864, %13 : vector<1x256xf32>
    %c0_511 = arith.constant 0 : index
    %c2_512 = arith.constant 2 : index
    %1866 = arith.index_cast %1 : i32 to index
    %c0_513 = arith.constant 0 : index
    %1867 = vector.load %arg6[%c0_511, %c2_512, %1866, %c0_513] : memref<1x3x1x256xf32, #tpu.memory_space<vmem>>, vector<1x1x1x256xf32>
    %1868 = vector.shape_cast %1867 : vector<1x1x1x256xf32> to vector<1x256xf32>
    %1869 = vector.shape_cast %1865 : vector<1x256xf32> to vector<1x1x1x256xf32>
    tpu.vector_store %arg6[%c0_511, %c2_512, %1866, %c0_513], %1869 {strides = array<i32>} : memref<1x3x1x256xf32, #tpu.memory_space<vmem>>, vector<1x1x1x256xf32>,
    %c1_i32_514 = arith.constant 1 : i32
    return
  }
  func.func @transform_0(%arg0: i32, %arg1: i32, %arg2: memref<2x10xf32, #tpu.memory_space<smem>>, %arg3: memref<2x150xf32, #tpu.memory_space<smem>>) -> (i32, i32, i32, i32) {
    %c0_i32 = arith.constant 0 : i32
    %c0_i32_0 = arith.constant 0 : i32
    %c0_i32_1 = arith.constant 0 : i32
    return %arg0, %c0_i32, %arg1, %c0_i32_0 : i32, i32, i32, i32
  }
  func.func @transform_1(%arg0: i32, %arg1: i32, %arg2: memref<2x10xf32, #tpu.memory_space<smem>>, %arg3: memref<2x150xf32, #tpu.memory_space<smem>>) -> (i32, i32, i32, i32) {
    %c0_i32 = arith.constant 0 : i32
    %c0_i32_0 = arith.constant 0 : i32
    %c0_i32_1 = arith.constant 0 : i32
    return %arg0, %c0_i32, %arg1, %c0_i32_0 : i32, i32, i32, i32
  }
  func.func @transform_2(%arg0: i32, %arg1: i32, %arg2: memref<2x10xf32, #tpu.memory_space<smem>>, %arg3: memref<2x150xf32, #tpu.memory_space<smem>>) -> (i32, i32, i32, i32) {
    %c0_i32 = arith.constant 0 : i32
    %c0_i32_0 = arith.constant 0 : i32
    %c0_i32_1 = arith.constant 0 : i32
    return %arg0, %c0_i32, %arg1, %c0_i32_0 : i32, i32, i32, i32
  }
}

</mosaic_0001>

<bundles_post_ra>
// kernel: sub.4
= control target key start
LH: loop header
LB: loop body
LE: loop exit
PB: predicated region body
PF: predicated region fallthrough
CT: control target
= control target key end

     0   :  { %s34_s0 = inlined_call_operand.vmem [shape: f32[2,10], index: 0, kind: input, shape index: {}]   ;;  %s35_s1 = inlined_call_operand.vmem [shape: f32[2,10], index: 1, kind: input, shape index: {}]   ;;  %s36_s2 = inlined_call_operand.vmem [shape: f32[2,10], index: 2, kind: output, shape index: {}]  }
   0x1   :  { %v3_v0 = vld [vmem:[%s34_s0] sm:$0x3] }
   0x2   :  { %v4_v1 = vld [vmem:[%s35_s1] sm:$0x3] }
   0x3   :  { %v7_v2 = vsub.f32 %v3_v0, %v4_v1 }
   0x5   :  { %9 = vst [vmem:[%s36_s2] sm:$0x3] %v7_v2 }

// kernel: curl_forward.1
= control target key start
LH: loop header
LB: loop body
LE: loop exit
PB: predicated region body
PF: predicated region fallthrough
CT: control target
= control target key end

     0   :  { %s2496_s21 = smov [#allocation3]   ;;  %s2497_s22 = smov [#allocation4]   ;;  %s4223_s0 = inlined_call_operand.vmem [shape: f32[2,10], index: 0, kind: input, shape index: {}]   ;;  %s4224_s2 = inlined_call_operand.vmem [shape: f32[2,3,1,256], index: 2, kind: input, shape index: {}]   ;;  %s4225_s3 = inlined_call_operand.vmem [shape: f32[2,1,1,256], index: 3, kind: input, shape index: {}]   ;;  %s4226_s4 = inlined_call_operand.vmem [shape: f32[2,3,1,256], index: 4, kind: output, shape index: {}]   ;;  %s4227_s1 = inlined_call_operand.vmem [shape: f32[2,150], index: 1, kind: input, shape index: {}]  }
   0x1   :  { %4249 = sst [smem:[#allocation11_spill]] %s4224_s2  ;;  %s10_s17 = sshll.u32 %s4223_s0, 4  ;;  %s11_s17 = int_to_ptr.vmem [resolvable:$true] %s10_s17 }
   0x2   :  { %4250 = sst [smem:[#allocation12_spill]] %s4225_s3  ;;  %s15_s20 = sshll.u32 %s4227_s1, 4  ;;  %s16_s20 = int_to_ptr.vmem [resolvable:$true] %s15_s20 }
   0x3   :  { %4251 = sst [smem:[#allocation13_spill]] %s4226_s4 }
   0x4   :  { %13 = dma.vmem_to_smem %s11_s17, 32, %s2496_s21, [#allocation2] }
   0x5   :  { %18 = dma.vmem_to_smem %s16_s20, 64, %s2497_s22, [#allocation2] }
   0x6   :  { %2482 = dma.done.wait [#allocation2], 96 }
   0x7   :  { %2483 = vsyncadd [#allocation2], 4294967200 }
   0x8   :  { %21 = sfence }
   0x9   :  { %s2530_s23 = smov 0   ;;  %s2532_s24 = smov 0  }
   0xa   :  { %s2534_s25 = smov 0  }
   0xb LB: > { %4252 = sst [smem:[#allocation6_spill]] %s2490_s24  ;;  %s39_s0 = sadd.s32 1, %s2490_s24  ;;  %s2494_s25 = sphi %s2534_s25, %s27_s25   ;;  %s2490_s24 = sphi %s2532_s24, %s4294_s24   ;;  %s2486_s23 = sphi %s2530_s23, %s4293_s23  }
   0xc   : > { %4253 = sst [smem:[#allocation7_spill]] %s2494_s25  ;;  %p1847_p0 = scmp.ge.s32.totalorder %s2494_s25, 1 }
   0xd   : > { %p41_p1 = scmp.ge.s32.totalorder %s39_s0, 2  ;;  %p161_p2 = scmp.lt.s32.totalorder %s2494_s25, 3 }
   0xf   : > { %s4296_s0 = smov (%p41_p1, %s39_s0), 0  ;;  %p162_p3 = pnand %p1847_p0, %p161_p2 }
  0x10   : > { %4254 = sst [smem:[#allocation8_spill]] %s4296_s0 }
  0x11   : > { %165 = sbr.rel (%p162_p3) target bundleno = 576 (0x240), region = 28 }
  0x16   : > { %p197_p4 = scmp.lt.s32.totalorder %s2486_s23, 1  ;;  %s4256_s2 = sld [smem:[#allocation11_spill]] }
  0x17   : > { %s309_s30 = sand.u32 1, %s2486_s23  ;;  %s304_s5 = sshra.s32 %s2486_s23, 1 }
  0x18   : > { %s2552_s1 = scalar_select %p197_p4, %s2486_s23, 1 }
  0x19   : > { %s2707_s6 = sshll.u32 %s309_s30, 7  ;;  %s2711_s8 = sshll.u32 %s304_s5, 9 }
  0x1a   : > { %4255 = sst [smem:[#allocation9_spill]] %s2552_s1  ;;  %s4228_s26 = smul.u32 6, %s2552_s1 }
  0x1b   : > { %s4234_s7 = sadd.s32 1, %s2707_s6  ;;  %s311_s9 = sadd.s32 %s2711_s8, %s2707_s6 }
  0x1c   : > { %s2560_s29 = scalar_lea.vmem %s4256_s2, %s4228_s26  ;;  %s2716_s10 = sshll.u32 %s2486_s23, 7 }
  0x1d   : > { %4257 = sst [smem:[#allocation10_spill]] %s2560_s29  ;;  %v2563_v0 = vld [vmem:[%s2560_s29] sm:$0x3]  ;;  %v2566_v1 = vld [vmem:[%s2560_s29 + $0x2] sm:$0x3]  ;;  %s320_s11 = sadd.s32 %s2711_s8, %s4234_s7 }
  0x1e   : > { %v2569_v2 = vld [vmem:[%s2560_s29 + $0x4] sm:$0x3]  ;;  %v234_v3 = vmax.f32 %v2563_v0, 0.0001  ;;  %v241_v4 = vmax.f32 %v2566_v1, 0.0001 }
  0x1f   : > { %v248_v5 = vmax.f32 %v2569_v2, 0.0001  ;;  %s2722_s12 = sld [smem:[#allocation3 + %s2716_s10]]  ;;  %s4233_s13 = sadd.s32 2, %s2707_s6 }
  0x20   : > { %v235_v6 = vadd.f32 0.055, %v234_v3  ;;  %v242_v7 = vadd.f32 0.055, %v241_v4  ;;  %s2725_s14 = sld [smem:[#allocation4 + %s311_s9]]  ;;  %s4232_s15 = sadd.s32 3, %s2707_s6 }
  0x21   : > { %v249_v8 = vadd.f32 0.055, %v248_v5  ;;  %s2728_s16 = sld [smem:[#allocation4 + %s320_s11]]  ;;  %s4230_s17 = sadd.s32 4, %s2707_s6 }
  0x22   : > { %v2574_v9 = vmul.f32 0.9478673, %v235_v6  ;;  %v2576_v10 = vmul.f32 0.9478673, %v242_v7  ;;  %s328_s18 = sadd.s32 %s2711_s8, %s4233_s13  ;;  %s4235_s19 = sadd.s32 15, %s2707_s6 }
  0x23   : > { %v2578_v11 = vmul.f32 0.9478673, %v249_v8  ;;  %s336_s20 = sadd.s32 %s2711_s8, %s4232_s15  ;;  %s4229_s21 = sadd.s32 5, %s2707_s6 }
  0x24   : > { %v2581_v12 = vand.u32 2147483647, %v2574_v9  ;;  %v2584_v13 = vand.u32 2147483647, %v2576_v10  ;;  %vm1933_vm15 = vcmp.lt.f32.partialorder %v2574_v9, 0  ;;  %s344_s22 = sadd.s32 %s2711_s8, %s4230_s17  ;;  %s4231_s23 = sadd.s32 6, %s2707_s6 }
  0x25   : > { %v2587_v14 = vand.u32 2147483647, %v2578_v11  ;;  %s2743_s27 = sld [smem:[#allocation4 + %s328_s18]]  ;;  %s436_s28 = sadd.s32 1, %s2716_s10 }
  0x26   : > { %v1892_v15 = vand.u32 8388607, %v2581_v12  ;;  %v1963_v16 = vand.u32 8388607, %v2584_v13  ;;  %v1888_v28 = vand.u32 2139095040, %v2581_v12  ;;  %v1959_v37 = vand.u32 2139095040, %v2584_v13  ;;  %s352_s5 = sadd.s32 %s2711_s8, %s4229_s21  ;;  %s360_s11 = sadd.s32 %s2711_s8, %s4231_s23 }
  0x27   : > { %v2034_v17 = vand.u32 8388607, %v2587_v14  ;;  %v2030_v48 = vand.u32 2139095040, %v2587_v14  ;;  %vm1926_vm3 = vweird.f32 %v2581_v12  ;;  %vm1925_vm4 = vcmp.lt.f32.partialorder %v2581_v12, 0.0  ;;  %s2746_s30 = sld [smem:[#allocation4 + %s336_s20]]  ;;  %s4237_s18 = sadd.s32 7, %s2707_s6 }
  0x28   : > { %v1893_v18 = vor.u32 8388608, %v1892_v15  ;;  %v1964_v20 = vor.u32 8388608, %v1963_v16  ;;  %v1889_v36 = vshrl.u32 %v1888_v28, 23  ;;  %v1960_v46 = vshrl.u32 %v1959_v37, 23  ;;  %s2751_s9 = sld [smem:[#allocation4 + %s344_s22]]  ;;  %s4236_s21 = sadd.s32 8, %s2707_s6 }
  0x29   : > { %v2035_v21 = vor.u32 8388608, %v2034_v17  ;;  %v2031_v61 = vshrl.u32 %v2030_v48, 23  ;;  %vm1924_vm5 = vcmp.eq.f32.partialorder %v2581_v12, 0.0  ;;  %vm1997_vm6 = vweird.f32 %v2584_v13  ;;  %s2757_s26 = sld [smem:[#allocation3 + %s436_s28]]  ;;  %s439_s22 = sadd.s32 %s2711_s8, %s4235_s19 }
  0x2a   : > { %v1895_v19 = vand.u32 8388607, %v1893_v18  ;;  %v1966_v23 = vand.u32 8388607, %v1964_v20  ;;  %v1951_v50 = vadd.s32 4294967169, %v1889_v36  ;;  %v2022_v59 = vadd.s32 4294967169, %v1960_v46  ;;  %s368_s28 = sadd.s32 %s2711_s8, %s4237_s18 }
  0x2b   : > { %v2037_v24 = vand.u32 8388607, %v2035_v21  ;;  %vm1923_vm7 = vcmp.eq.f32.partialorder %v2581_v12, 1.0  ;;  %vm1996_vm8 = vcmp.lt.f32.partialorder %v2584_v13, 0.0  ;;  %vm1995_vm9 = vcmp.eq.f32.partialorder %v2584_v13, 0.0  ;;  %s2760_s20 = sld [smem:[#allocation4 + %s352_s5]]  ;;  %s376_s5 = sadd.s32 %s2711_s8, %s4236_s21 }
  0x2c   : > { %v2592_v22 = vor.u32 1065353216, %v1895_v19  ;;  %v2596_v26 = vor.u32 1065353216, %v1966_v23  ;;  %v1900_v62 = vadd.s32 1, %v1951_v50  ;;  %v1971_v17 = vadd.s32 1, %v2022_v59  ;;  %s2764_s17 = sld [smem:[#allocation4 + %s360_s11]]  ;;  %s4240_s23 = sadd.s32 9, %s2707_s6 }
  0x2d   : > { %v2598_v27 = vor.u32 1065353216, %v2037_v24  ;;  %vm1994_vm10 = vcmp.eq.f32.partialorder %v2584_v13, 1.0  ;;  %vm2068_vm11 = vweird.f32 %v2587_v14  ;;  %vm2067_vm12 = vcmp.lt.f32.partialorder %v2587_v14, 0.0  ;;  %s4238_s15 = sadd.s32 10, %s2707_s6  ;;  %s4239_s11 = sadd.s32 11, %s2707_s6 }
  0x2e   : > { %vm1897_vm0 = vcmp.ge.f32.partialorder %v2592_v22, 1.4142135  ;;  %v1898_v25 = vmul.f32 0.5, %v2592_v22  ;;  %vm1968_vm1 = vcmp.ge.f32.partialorder %v2596_v26, 1.4142135  ;;  %v1969_v30 = vmul.f32 0.5, %v2596_v26  ;;  %s384_s19 = sadd.s32 %s2711_s8, %s4240_s23  ;;  %s392_s18 = sadd.s32 %s2711_s8, %s4238_s15 }
  0x2f   : > { %vm2039_vm2 = vcmp.ge.f32.partialorder %v2598_v27, 1.4142135  ;;  %v2040_v35 = vmul.f32 0.5, %v2598_v27  ;;  %v1901_v28 = vsel %vm1897_vm0, %v1900_v62, %v1951_v50  ;;  %v1972_v37 = vsel %vm1968_vm1, %v1971_v17, %v2022_v59  ;;  %s2779_s13 = sld [smem:[#allocation4 + %s439_s22]]  ;;  %s400_s22 = sadd.s32 %s2711_s8, %s4239_s11 }
  0x30   : > { %v1899_v29 = vsel %vm1897_vm0, %v1898_v25, %v2592_v22  ;;  %v1970_v32 = vsel %vm1968_vm1, %v1969_v30, %v2596_v26  ;;  %v2093_v25 = vadd.s32 4294967169, %v2031_v61  ;;  %v1992_v50 = vcvt.s32.f32 %v1972_v37  ;;  %s2782_s7 = sld [smem:[#allocation4 + %s368_s28]]  ;;  %s4241_s28 = sadd.s32 16, %s2707_s6 }
  0x31   : > { %v2606_v31 = vadd.f32 -1.0, %v1899_v29  ;;  %v2614_v34 = vadd.f32 -1.0, %v1970_v32  ;;  %v2041_v41 = vsel %vm2039_vm2, %v2040_v35, %v2598_v27  ;;  %vm2066_vm13 = vcmp.eq.f32.partialorder %v2587_v14, 0.0  ;;  %s2789_s21 = sld [smem:[#allocation4 + %s376_s5]]  ;;  %s448_s15 = sadd.s32 %s2711_s8, %s4241_s28 }
  0x32   : > { %v2623_v42 = vadd.f32 -1.0, %v2041_v41  ;;  %vm2065_vm14 = vcmp.eq.f32.partialorder %v2587_v14, 1.0  ;;  %vm1934_vm0 = vcmp.eq.f32.partialorder %v2574_v9, 0  ;;  %vm1938_vm1 = vcmp.eq.f32.partialorder %v2581_v12, 2139095040  ;;  %s2804_s5 = sld [smem:[#allocation4 + %s384_s19]]  ;;  %s4260_s0 = sadd.s32 18, %s2707_s6 }
  0x33   : > { %v1903_v33 = vmul.f32 %v2606_v31, %v2606_v31  ;;  %v1974_v40 = vmul.f32 %v2614_v34, %v2614_v34  ;;  %s2810_s11 = sld [smem:[#allocation4 + %s392_s18]]  ;;  %s4258_s18 = sadd.s32 12, %s2707_s6 }
  0x34   : > { %v2045_v49 = vmul.f32 %v2623_v42, %v2623_v42  ;;  %s2817_s19 = sld [smem:[#allocation4 + %s400_s22]]  ;;  %s2828_s23 = sadd.s32 %s2711_s8, %s4258_s18 }
  0x35   : > { %v1904_v38 = vmul.f32 0.12621109, %v1903_v33  ;;  %v1906_v39 = vmul.f32 -0.20706727, %v1903_v33  ;;  %v1975_v45 = vmul.f32 0.12621109, %v1974_v40  ;;  %s464_s24 = sadd.s32 %s2711_s8, %s4260_s0 }
  0x36   : > { %v1977_v47 = vmul.f32 -0.20706727, %v1974_v40  ;;  %v2046_v55 = vmul.f32 0.12621109, %v2045_v49  ;;  %v2048_v7 = vmul.f32 -0.20706727, %v2045_v49 }
  0x37   : > { %v1905_v43 = vadd.f32 0.21545328, %v1904_v38  ;;  %v1907_v44 = vadd.f32 -0.23896284, %v1906_v39  ;;  %v1976_v53 = vadd.f32 0.21545328, %v1975_v45 }
  0x38   : > { %v1978_v54 = vadd.f32 -0.23896284, %v1977_v47  ;;  %v2047_v6 = vadd.f32 0.21545328, %v2046_v55  ;;  %v2049_v19 = vadd.f32 -0.23896284, %v2048_v7 }
  0x39   : > { %v1908_v51 = vmul.f32 %v1905_v43, %v1903_v33  ;;  %v1910_v52 = vmul.f32 %v1907_v44, %v1903_v33  ;;  %v1979_v58 = vmul.f32 %v1976_v53, %v1974_v40  ;;  %v1921_v43 = vcvt.s32.f32 %v1901_v28  ;;  %s4259_s22 = sadd.s32 17, %s2707_s6  ;;  %s2839_s18 = sld [smem:[#allocation4 + %s448_s15]] }
  0x3a   : > { %v1981_v60 = vmul.f32 %v1978_v54, %v1974_v40  ;;  %v2050_v20 = vmul.f32 %v2047_v6, %v2045_v49  ;;  %v2052_v32 = vmul.f32 %v2049_v19, %v2045_v49  ;;  %v2042_v45 = vadd.s32 1, %v2093_v25  ;;  %s456_s28 = sadd.s32 %s2711_s8, %s4259_s22  ;;  %s4261_s2 = sadd.s32 19, %s2707_s6 }
  0x3b   : > { %v1909_v56 = vadd.f32 0.28795174, %v1908_v51  ;;  %v1911_v57 = vadd.f32 -0.3607037, %v1910_v52  ;;  %v1980_v4 = vadd.f32 0.28795174, %v1979_v58  ;;  %s472_s22 = sadd.s32 %s2711_s8, %s4261_s2 }
  0x3c   : > { %v1982_v5 = vadd.f32 -0.3607037, %v1981_v60  ;;  %v2051_v30 = vadd.f32 0.28795174, %v2050_v20  ;;  %v2053_v39 = vadd.f32 -0.3607037, %v2052_v32  ;;  %v2043_v53 = vsel %vm2039_vm2, %v2042_v45, %v2093_v25 }
  0x3d   : > { %v1912_v63 = vmul.f32 %v1909_v56, %v1903_v33  ;;  %v1914_v3 = vmul.f32 %v1911_v57, %v1903_v33  ;;  %v1983_v16 = vmul.f32 %v1980_v4, %v1974_v40  ;;  %v2063_v27 = vcvt.s32.f32 %v2043_v53  ;;  %s2858_s15 = sld [smem:[#allocation4 + %s456_s28]]  ;;  %s4262_s0 = sadd.s32 20, %s2707_s6 }
  0x3e   : > { %v1985_v18 = vmul.f32 %v1982_v5, %v1974_v40  ;;  %v2054_v41 = vmul.f32 %v2051_v30, %v2045_v49  ;;  %v2056_v47 = vmul.f32 %v2053_v39, %v2045_v49  ;;  %vm2004_vm2 = vcmp.lt.f32.partialorder %v2576_v10, 0  ;;  %s480_s25 = sadd.s32 %s2711_s8, %s4262_s0  ;;  %s2878_s2 = sld [smem:[#allocation4 + %s464_s24]] }
  0x3f   : > { %v1913_v8 = vadd.f32 0.48090908, %v1912_v63  ;;  %v1915_v15 = vadd.f32 -0.72134733, %v1914_v3  ;;  %v1984_v24 = vadd.f32 0.48090908, %v1983_v16 }
  0x40   : > { %v1986_v29 = vadd.f32 -0.72134733, %v1985_v18  ;;  %v2055_v46 = vadd.f32 0.48090908, %v2054_v41  ;;  %v233_v19 = vmul.f32 0.07739938, %v2563_v0 }
  0x41   : > { %v1916_v21 = vmul.f32 %v1913_v8, %v1903_v33  ;;  %v1918_v23 = vmul.f32 %v2606_v31, %v1915_v15  ;;  %v1987_v36 = vmul.f32 %v1984_v24, %v1974_v40  ;;  %v2057_v40 = vadd.f32 -0.72134733, %v2056_v47  ;;  %s495_s4 = sadd.s32 22, %s2707_s6  ;;  %s4263_s0 = sadd.s32 13, %s2707_s6 }
  0x42   : > { %v1989_v38 = vmul.f32 %v2614_v34, %v1986_v29  ;;  %v2058_v51 = vmul.f32 %v2055_v46, %v2045_v49  ;;  %v240_v24 = vmul.f32 0.07739938, %v2566_v1  ;;  %s416_s28 = sadd.s32 %s2711_s8, %s4263_s0  ;;  %s2890_s29 = sld [smem:[#allocation4 + %s472_s22]] }
  0x43   : > { %v1917_v35 = vadd.f32 1.442695, %v1916_v21  ;;  %v1988_v44 = vadd.f32 1.442695, %v1987_v36  ;;  %s2900_s24 = sld [smem:[#allocation4 + %s480_s25]]  ;;  %s4264_s3 = sadd.s32 21, %s2707_s6 }
  0x44   : > { %v2059_v54 = vadd.f32 1.442695, %v2058_v51  ;;  %s488_s0 = sadd.s32 %s2711_s8, %s4264_s3  ;;  %s2912_s22 = sld [smem:[#allocation4 + %s2828_s23]] }
  0x45   : > { %v1919_v33 = vadd.f32 %v1918_v23, %v1917_v35  ;;  %v1990_v48 = vadd.f32 %v1989_v38, %v1988_v44  ;;  %s496_s1 = sadd.s32 %s2711_s8, %s495_s4  ;;  %s2919_s3 = sld [smem:[#allocation4 + %s416_s28]] }
  0x46   : > { %s2925_s4 = sld [smem:[#allocation4 + %s488_s0]]  ;;  %s503_s23 = sadd.s32 23, %s2707_s6 }
  0x47   : > { %v1920_v22 = vmul.f32 %v2606_v31, %v1919_v33  ;;  %v1991_v52 = vmul.f32 %v2614_v34, %v1990_v48  ;;  %v2060_v31 = vmul.f32 %v2623_v42, %v2057_v40  ;;  %s2931_s25 = sld [smem:[#allocation4 + %s496_s1]]  ;;  %s4248_s1 = sadd.s32 14, %s2707_s6 }
  0x48   : > { %s511_s28 = sadd.s32 24, %s2707_s6  ;;  %s519_s0 = sadd.s32 25, %s2707_s6 }
  0x49   : > { %v1922_v26 = vadd.f32 %v1921_v43, %v1920_v22  ;;  %v1993_v49 = vadd.f32 %v1992_v50, %v1991_v52  ;;  %v2061_v34 = vadd.f32 %v2060_v31, %v2059_v54 }
  0x4b   : > { %v1927_v55 = vsel %vm1926_vm3, %v2581_v12, %v1922_v26  ;;  %v1998_v58 = vsel %vm1997_vm6, %v2584_v13, %v1993_v49  ;;  %v2062_v61 = vmul.f32 %v2623_v42, %v2061_v34  ;;  %vm1946_vm3 = vcmp.ne.f32.partialorder %v2574_v9, %v2574_v9 }
  0x4c   : > { %v1928_v56 = vsel %vm1925_vm4, nan, %v1927_v55  ;;  %v1999_v60 = vsel %vm1996_vm8, nan, %v1998_v58  ;;  %vm2005_vm4 = vcmp.eq.f32.partialorder %v2576_v10, 0  ;;  %vm2009_vm6 = vcmp.eq.f32.partialorder %v2584_v13, 2139095040 }
  0x4d   : > { %v1929_v57 = vsel %vm1924_vm5, -inf, %v1928_v56  ;;  %v2000_v63 = vsel %vm1995_vm9, -inf, %v1999_v60  ;;  %v2064_v4 = vadd.f32 %v2063_v27, %v2062_v61  ;;  %vm1935_vm5 = vcmp.eq.f32.partialorder %v2574_v9, 1065353216 }
  0x4e   : > { %v1930_v59 = vsel %vm1923_vm7, 0.0, %v1929_v57  ;;  %v2001_v3 = vsel %vm1994_vm10, 0.0, %v2000_v63  ;;  %vm232_vm7 = vcmp.le.f32.partialorder %v2563_v0, 0.04045  ;;  %vm2017_vm8 = vcmp.ne.f32.partialorder %v2576_v10, %v2576_v10 }
  0x4f   : > { %v1931_v62 = vmul.f32 2.4, %v1930_v59  ;;  %v2002_v5 = vmul.f32 2.4, %v2001_v3  ;;  %v2069_v6 = vsel %vm2068_vm11, %v2587_v14, %v2064_v4  ;;  %vm2006_vm9 = vcmp.eq.f32.partialorder %v2576_v10, 1065353216 }
  0x50   : > { %v2070_v7 = vsel %vm2067_vm12, nan, %v2069_v6  ;;  %vm239_vm10 = vcmp.le.f32.partialorder %v2566_v1, 0.04045  ;;  %vm2075_vm11 = vcmp.lt.f32.partialorder %v2578_v11, 0  ;;  %v247_v0 = vmul.f32 0.07739938, %v2569_v2 }
  0x51   : > { %2413 = vpow2.f32 %v1931_v62  ;;  %v2071_v8 = vsel %vm2066_vm13, -inf, %v2070_v7  ;;  %vm2076_vm12 = vcmp.eq.f32.partialorder %v2578_v11, 0  ;;  %vm2080_vm13 = vcmp.eq.f32.partialorder %v2587_v14, 2139095040 }
  0x52   : > { %2415 = vpow2.f32 %v2002_v5  ;;  %v2072_v42 = vsel %vm2065_vm14, 0.0, %v2071_v8  ;;  %vm2088_vm14 = vcmp.ne.f32.partialorder %v2578_v11, %v2578_v11 }
  0x53   : > { %v2073_v15 = vmul.f32 2.4, %v2072_v42 }
  0x55   : > { %2417 = vpow2.f32 %v2073_v15 }
  0x57   : > { %v2414_v16 = vpop.eup %2413 }
  0x58   : > { %v1939_v17 = vsel %vm1933_vm15, 2143289344, %v2414_v16  ;;  %v2416_v18 = vpop.eup %2415  ;;  %vm2077_vm15 = vcmp.eq.f32.partialorder %v2578_v11, 1065353216 }
  0x59   : > { %v1940_v20 = vsel %vm1934_vm0, 0, %v1939_v17  ;;  %v2010_v21 = vsel %vm2004_vm2, 2143289344, %v2416_v18  ;;  %vm246_vm0 = vcmp.le.f32.partialorder %v2569_v2, 0.04045 }
  0x5a   : > { %v1945_v12 = vsel %vm1938_vm1, 2139095040, %v1940_v20  ;;  %v2011_v25 = vsel %vm2005_vm4, 0, %v2010_v21 }
  0x5b   : > { %v1949_v23 = vsel %vm1946_vm3, 2143289344, %v1945_v12  ;;  %v2016_v9 = vsel %vm2009_vm6, 2139095040, %v2011_v25  ;;  %v2418_v30 = vpop.eup %2417 }
  0x5c   : > { %v1950_v28 = vsel %vm1935_vm5, 1065353216, %v1949_v23  ;;  %v2020_v29 = vsel %vm2017_vm8, 2143289344, %v2016_v9  ;;  %v2081_v36 = vsel %vm2075_vm11, 2143289344, %v2418_v30 }
  0x5d   : > { %v238_v13 = vsel %vm232_vm7, %v233_v19, %v1950_v28  ;;  %v2021_v32 = vsel %vm2006_vm9, 1065353216, %v2020_v29  ;;  %v2082_v38 = vsel %vm2076_vm12, 0, %v2081_v36 }
  0x5e   : > { %v253_v10 = vmul.f32 0.412453, %v238_v13  ;;  %v245_v35 = vsel %vm239_vm10, %v240_v24, %v2021_v32  ;;  %v258_v1 = vmul.f32 0.212671, %v238_v13  ;;  %v263_v37 = vmul.f32 0.019334, %v238_v13 }
  0x5f   : > { %v254_v39 = vmul.f32 0.35758, %v245_v35  ;;  %v259_v41 = vmul.f32 0.71516, %v245_v35  ;;  %v2087_v33 = vsel %vm2080_vm13, 2139095040, %v2082_v38 }
  0x60   : > { %v264_v43 = vmul.f32 0.119193, %v245_v35  ;;  %v2091_v44 = vsel %vm2088_vm14, 2143289344, %v2087_v33 }
  0x61   : > { %v2092_v45 = vsel %vm2077_vm15, 1065353216, %v2091_v44  ;;  %v255_v14 = vadd.f32 %v254_v39, %v253_v10  ;;  %v260_v46 = vadd.f32 %v259_v41, %v258_v1 }
  0x62   : > { %v265_v47 = vadd.f32 %v264_v43, %v263_v37  ;;  %v252_v22 = vsel %vm246_vm0, %v247_v0, %v2092_v45 }
  0x63   : > { %v256_v48 = vmul.f32 0.180423, %v252_v22  ;;  %v261_v50 = vmul.f32 0.072169, %v252_v22  ;;  %v266_v40 = vmul.f32 0.950227, %v252_v22  ;;  %v315_v22 = vstv %s2725_s14  ;;  %s520_s14 = sadd.s32 %s2711_s8, %s519_s0 }
  0x64   : > { %s575_s0 = sadd.s32 31, %s2707_s6 }
  0x65   : > { %v257_v51 = vadd.f32 %v256_v48, %v255_v14  ;;  %v2679_v11 = vadd.f32 %v261_v50, %v260_v46  ;;  %v267_v26 = vadd.f32 %v266_v40, %v265_v47  ;;  %v317_v40 = vstv %s2722_s12 }
  0x67   : > { %v2681_v52 = vmul.f32 1.0521265, %v257_v51  ;;  %v2683_v2 = vmul.f32 0.9184811, %v267_v26  ;;  %v2686_v53 = vmax.f32 %v2679_v11, 0.0001  ;;  %v324_v51 = vstv %s2728_s16 }
  0x68   : > { %v277_v24 = vmul.f32 7.787037, %v2679_v11  ;;  %vm276_vm13 = vcmp.le.f32.partialorder %v2679_v11, 0.008856452 }
  0x69   : > { %v2689_v54 = vmax.f32 %v2681_v52, 0.0001  ;;  %v2692_v31 = vand.u32 2147483647, %v2686_v53  ;;  %v2695_v55 = vmax.f32 %v2683_v2, 0.0001 }
  0x6a   : > { %v271_v7 = vmul.f32 7.787037, %v2681_v52  ;;  %v2138_v28 = vand.u32 2147483648, %v2686_v53  ;;  %vm270_vm4 = vcmp.le.f32.partialorder %v2681_v52, 0.008856452  ;;  %vm2120_vm8 = vcmp.lt.f32.partialorder %v2686_v53, 0.0 }
  0x6b   : > { %v2698_v49 = vand.u32 2147483647, %v2689_v54  ;;  %2419 = vlog2.f32 %v2692_v31  ;;  %v2704_v56 = vand.u32 2147483647, %v2695_v55  ;;  %vm2095_vm1 = vcmp.eq.f32.partialorder %v2689_v54, 0.0 }
  0x6c   : > { %v2787_v19 = vadd.f32 0.13793103, %v271_v7  ;;  %vm2096_vm2 = vcmp.lt.f32.partialorder %v2689_v54, 0.0  ;;  %v2114_v21 = vand.u32 2147483648, %v2689_v54  ;;  %vm2135_vm3 = vweird.f32 %v2692_v31 }
  0x6d   : > { %2421 = vlog2.f32 %v2698_v49  ;;  %vm2098_vm5 = vcmp.eq.f32.partialorder %v2698_v49, inf  ;;  %vm2111_vm6 = vweird.f32 %v2698_v49  ;;  %vm2113_vm7 = vcmp.eq.f32.partialorder %v2698_v49, 0.0 }
  0x6e   : > { %2423 = vlog2.f32 %v2704_v56  ;;  %v283_v0 = vmul.f32 7.787037, %v2683_v2  ;;  %vm2119_vm9 = vcmp.eq.f32.partialorder %v2686_v53, 0.0  ;;  %vm2137_vm10 = vcmp.eq.f32.partialorder %v2692_v31, 0.0 }
  0x6f   : > { %v278_v10 = vadd.f32 0.13793103, %v277_v24  ;;  %vm2122_vm11 = vcmp.eq.f32.partialorder %v2692_v31, inf  ;;  %vm2144_vm12 = vcmp.lt.f32.partialorder %v2695_v55, 0.0  ;;  %vm2143_vm14 = vcmp.eq.f32.partialorder %v2695_v55, 0.0 }
  0x70   : > { %vm282_vm15 = vcmp.le.f32.partialorder %v2683_v2, 0.008856452  ;;  %v284_v38 = vadd.f32 0.13793103, %v283_v0  ;;  %vm2159_vm0 = vweird.f32 %v2704_v56  ;;  %v2162_v45 = vand.u32 2147483648, %v2695_v55 }
  0x71   : > { %v2420_v34 = vpop.eup %2419  ;;  %v484_v24 = vstv %s2900_s24 }
  0x72   : > { %v2125_v57 = vmul.f32 -0.33333334, %v2420_v34 }
  0x73   : > { %v2422_v27 = vpop.eup %2421 }
  0x74   : > { %v2101_v58 = vmul.f32 -0.33333334, %v2422_v27  ;;  %2425 = vpow2.f32 %v2125_v57  ;;  %v2424_v59 = vpop.eup %2423  ;;  %v340_v27 = vstv %s2746_s30  ;;  %s424_s30 = sadd.s32 %s2711_s8, %s4248_s1 }
  0x75   : > { %v2149_v60 = vmul.f32 -0.33333334, %v2424_v59  ;;  %v348_v59 = vstv %s2751_s9  ;;  %s2976_s1 = sld [smem:[#allocation4 + %s424_s30]]  ;;  %s535_s30 = sadd.s32 27, %s2707_s6 }
  0x76   : > { %2427 = vpow2.f32 %v2101_v58  ;;  %s536_s9 = sadd.s32 %s2711_s8, %s535_s30 }
  0x77   : > { %2429 = vpow2.f32 %v2149_v60  ;;  %v356_v60 = vstv %s2760_s20  ;;  %s3042_s20 = sld [smem:[#allocation4 + %s536_s9]]  ;;  %s607_s9 = sadd.s32 35, %s2707_s6 }
  0x7a   : > { %v2426_v61 = vpop.eup %2425 }
  0x7b   : > { %v2127_v63 = vmul.f32 %v2426_v61, %v2426_v61 }
  0x7c   : > { %v2428_v62 = vpop.eup %2427 }
  0x7d   : > { %v2103_v3 = vmul.f32 %v2428_v62, %v2428_v62  ;;  %v2128_v4 = vmul.f32 %v2127_v63, %v2692_v31  ;;  %v2430_v6 = vpop.eup %2429  ;;  %v332_v31 = vstv %s2743_s27  ;;  %s527_s27 = sadd.s32 26, %s2707_s6 }
  0x7e   : > { %v2151_v15 = vmul.f32 %v2430_v6, %v2430_v6 }
  0x7f   : > { %v2104_v5 = vmul.f32 %v2103_v3, %v2698_v49  ;;  %v2129_v8 = vmul.f32 %v2128_v4, %v2127_v63  ;;  %v443_v63 = vstv %s2779_s13 }
  0x80   : > { %v2152_v18 = vmul.f32 %v2151_v15, %v2704_v56 }
  0x81   : > { %v2105_v42 = vmul.f32 %v2104_v5, %v2103_v3  ;;  %v2130_v16 = vsub.f32 %v2129_v8, %v2426_v61  ;;  %v372_v5 = vstv %s2782_s7  ;;  %v380_v8 = vstv %s2789_s21  ;;  %s551_s7 = sadd.s32 29, %s2707_s6 }
  0x82   : > { %v2153_v23 = vmul.f32 %v2152_v18, %v2151_v15 }
  0x83   : > { %v2106_v17 = vsub.f32 %v2105_v42, %v2428_v62  ;;  %v2131_v20 = vmul.f32 -0.33333334, %v2130_v16  ;;  %v452_v42 = vstv %s2839_s18  ;;  %v388_v16 = vstv %s2804_s5  ;;  %s552_s5 = sadd.s32 %s2711_s8, %s551_s7  ;;  %s623_s7 = sadd.s32 37, %s2707_s6 }
  0x84   : > { %v2154_v13 = vsub.f32 %v2153_v23, %v2430_v6  ;;  %v404_v23 = vstv %s2817_s19  ;;  %s566_s19 = sadd.s32 30, %s2707_s6 }
  0x85   : > { %v2107_v12 = vmul.f32 -0.33333334, %v2106_v17  ;;  %v2132_v25 = vadd.f32 %v2426_v61, %v2131_v20  ;;  %v460_v17 = vstv %s2858_s15  ;;  %v468_v20 = vstv %s2878_s2  ;;  %s567_s13 = sadd.s32 %s2711_s8, %s566_s19 }
  0x86   : > { %v2155_v32 = vmul.f32 -0.33333334, %v2154_v13 }
  0x87   : > { %v2108_v9 = vadd.f32 %v2428_v62, %v2107_v12  ;;  %v2133_v29 = vmul.f32 %v2132_v25, %v2686_v53  ;;  %v364_v62 = vstv %s2764_s17  ;;  %v476_v12 = vstv %s2890_s29  ;;  %s543_s17 = sadd.s32 28, %s2707_s6  ;;  %s615_s29 = sadd.s32 36, %s2707_s6 }
  0x88   : > { %v2156_v1 = vadd.f32 %v2430_v6, %v2155_v32  ;;  %v445_v6 = vstv %s2757_s26  ;;  %v412_v32 = vstv %s2912_s22  ;;  %s504_s22 = sadd.s32 %s2711_s8, %s503_s23  ;;  %s2994_s23 = sld [smem:[#allocation4 + %s520_s14]] }
  0x89   : > { %v2109_v30 = vmul.f32 %v2108_v9, %v2689_v54  ;;  %v2134_v35 = vmul.f32 %v2133_v29, %v2132_v25  ;;  %s2988_s16 = sld [smem:[#allocation4 + %s504_s22]] }
  0x8a   : > { %v2157_v33 = vmul.f32 %v2156_v1, %v2695_v55  ;;  %s3062_s14 = sld [smem:[#allocation4 + %s552_s5]]  ;;  %s624_s5 = sadd.s32 %s2711_s8, %s623_s7 }
  0x8b   : > { %v2110_v36 = vmul.f32 %v2109_v30, %v2108_v9  ;;  %v2136_v37 = vsel %vm2135_vm3, %v2686_v53, %v2134_v35  ;;  %vm2146_vm3 = vcmp.eq.f32.partialorder %v2704_v56, inf  ;;  %s3079_s26 = sld [smem:[#allocation4 + %s567_s13]]  ;;  %s655_s13 = sadd.s32 41, %s2707_s6 }
  0x8c   : > { %v2139_v41 = vsel %vm2137_vm10, %v2138_v28, %v2136_v37  ;;  %v2158_v47 = vmul.f32 %v2157_v33, %v2156_v1 }
  0x8d   : > { %v2112_v39 = vsel %vm2111_vm6, %v2689_v54, %v2110_v36  ;;  %v2140_v44 = vsel %vm2120_vm8, nan, %v2139_v41  ;;  %vm2161_vm6 = vcmp.eq.f32.partialorder %v2704_v56, 0.0  ;;  %v500_v41 = vstv %s2931_s25  ;;  %s608_s25 = sadd.s32 %s2711_s8, %s607_s9 }
  0x8e   : > { %v2115_v43 = vsel %vm2113_vm7, %v2114_v21, %v2112_v39  ;;  %v2141_v46 = vsel %vm2119_vm9, 0.0, %v2140_v44  ;;  %v2160_v54 = vsel %vm2159_vm0, %v2695_v55, %v2158_v47  ;;  %v492_v39 = vstv %s2925_s4 }
  0x8f   : > { %v2116_v14 = vsel %vm2096_vm2, nan, %v2115_v43  ;;  %v2142_v50 = vsel %vm2122_vm11, inf, %v2141_v46  ;;  %v2163_v34 = vsel %vm2161_vm6, %v2162_v45, %v2160_v54 }
  0x90   : > { %v2117_v48 = vsel %vm2095_vm1, 0.0, %v2116_v14  ;;  %v281_v53 = vsel %vm276_vm13, %v278_v10, %v2142_v50  ;;  %v2164_v57 = vsel %vm2144_vm12, nan, %v2163_v34 }
  0x91   : > { %v2118_v26 = vsel %vm2098_vm5, inf, %v2117_v48  ;;  %v288_v11 = vmul.f32 116.0, %v281_v53  ;;  %v2165_v52 = vsel %vm2143_vm14, 0.0, %v2164_v57 }
  0x92   : > { %v275_v49 = vsel %vm270_vm4, %v2787_v19, %v2118_v26  ;;  %v2166_v3 = vsel %vm2146_vm3, inf, %v2165_v52  ;;  %v396_v19 = vstv %s2810_s11  ;;  %s544_s11 = sadd.s32 %s2711_s8, %s543_s17  ;;  %s616_s17 = sadd.s32 %s2711_s8, %s615_s29 }
  0x93   : > { %v291_v58 = vsub.f32 %v275_v49, %v281_v53  ;;  %v1851_v61 = vadd.f32 -16.0, %v288_v11  ;;  %v287_v55 = vsel %vm282_vm15, %v284_v38, %v2166_v3  ;;  %v420_v38 = vstv %s2919_s3  ;;  %s512_s3 = sadd.s32 %s2711_s8, %s511_s28  ;;  %s528_s28 = sadd.s32 %s2711_s8, %s527_s27 }
  0x94   : > { %v296_v56 = vsub.f32 %v281_v53, %v287_v55  ;;  %s2990_s12 = sld [smem:[#allocation4 + %s512_s3]]  ;;  %s583_s3 = sadd.s32 32, %s2707_s6 }
  0x95   : > { %v292_v4 = vmul.f32 500.0, %v291_v58  ;;  %v2935_v7 = vmul.f32 0.01, %v1851_v61  ;;  %s3036_s21 = sld [smem:[#allocation4 + %s528_s28]]  ;;  %s584_s15 = sadd.s32 %s2711_s8, %s583_s3 }
  0x96   : > { %v297_v21 = vmul.f32 200.0, %v296_v56  ;;  %s3057_s22 = sld [smem:[#allocation4 + %s544_s11]]  ;;  %s599_s27 = sadd.s32 34, %s2707_s6 }
  0x97   : > { %v293_v15 = vmul.f32 0.009090909, %v292_v4  ;;  %v2942_v18 = vmul.f32 15.0, %v2935_v7  ;;  %s3087_s2 = sld [smem:[#allocation4 + %s584_s15]]  ;;  %s600_s28 = sadd.s32 %s2711_s8, %s599_s27 }
  0x98   : > { %v298_v29 = vmul.f32 0.009090909, %v297_v21  ;;  %s3114_s4 = sld [smem:[#allocation4 + %s600_s28]]  ;;  %s671_s28 = sadd.s32 43, %s2707_s6 }
  0x99   : > { %v294_v2 = vadd.f32 1.0, %v293_v15  ;;  %v313_v25 = vmax.f32 %v2942_v18, 0.0  ;;  %v322_v28 = vmax.f32 %v2942_v18, 1.0  ;;  %v330_v9 = vmax.f32 %v2942_v18, 2.0  ;;  %s3132_s11 = sld [smem:[#allocation4 + %s616_s17]] }
  0x9a   : > { %v338_v13 = vmax.f32 %v2942_v18, 3.0  ;;  %v346_v0 = vmax.f32 %v2942_v18, 4.0  ;;  %v354_v30 = vmax.f32 %v2942_v18, 5.0  ;;  %v362_v37 = vmax.f32 %v2942_v18, 6.0  ;;  %s3143_s3 = sld [smem:[#allocation4 + %s624_s5]]  ;;  %s763_s5 = sadd.s32 45, %s2707_s6 }
  0x9b   : > { %v314_v10 = vmin.f32 %v313_v25, 1.0  ;;  %v323_v35 = vmin.f32 %v322_v28, 2.0  ;;  %v331_v36 = vmin.f32 %v330_v9, 3.0  ;;  %v2967_v33 = vmul.f32 0.5, %v294_v2 }
  0x9c   : > { %v339_v1 = vmin.f32 %v338_v13, 4.0  ;;  %v299_v43 = vadd.f32 1.0, %v298_v29  ;;  %v347_v47 = vmin.f32 %v346_v0, 5.0  ;;  %v355_v48 = vmin.f32 %v354_v30, 6.0 }
  0x9d   : > { %v316_v44 = vmul.f32 %v315_v22, %v314_v10  ;;  %v325_v45 = vmul.f32 %v324_v51, %v323_v35  ;;  %v333_v14 = vmul.f32 %v332_v31, %v331_v36  ;;  %v370_v26 = vmax.f32 %v2942_v18, 7.0 }
  0x9e   : > { %v341_v46 = vmul.f32 %v340_v27, %v339_v1  ;;  %v378_v53 = vmax.f32 %v2942_v18, 8.0  ;;  %v386_v22 = vmax.f32 %v2942_v18, 9.0  ;;  %v363_v51 = vmin.f32 %v362_v37, 7.0 }
  0x9f   : > { %v318_v50 = vadd.f32 %v317_v40, %v316_v44  ;;  %v394_v54 = vmax.f32 %v2942_v18, 10.0  ;;  %v402_v31 = vmax.f32 %v2942_v18, 11.0  ;;  %v410_v49 = vmax.f32 %v2942_v18, 12.0 }
  0xa0   : > { %v371_v34 = vmin.f32 %v370_v26, 8.0  ;;  %v379_v11 = vmin.f32 %v378_v53, 9.0  ;;  %v387_v27 = vmin.f32 %v386_v22, 10.0  ;;  %v418_v61 = vmax.f32 %v2942_v18, 13.0 }
  0xa1   : > { %v326_v40 = vadd.f32 %v325_v45, %v318_v50  ;;  %v395_v57 = vmin.f32 %v394_v54, 11.0  ;;  %v403_v58 = vmin.f32 %v402_v31, 12.0  ;;  %v411_v52 = vmin.f32 %v410_v49, 13.0 }
  0xa2   : > { %v2997_v3 = vmul.f32 0.5, %v299_v43  ;;  %v349_v55 = vmul.f32 %v348_v59, %v347_v47  ;;  %v357_v15 = vmul.f32 %v356_v60, %v355_v48  ;;  %v365_v56 = vmul.f32 %v364_v62, %v363_v51 }
  0xa3   : > { %v334_v4 = vadd.f32 %v333_v14, %v326_v40  ;;  %v373_v2 = vmul.f32 %v372_v5, %v371_v34  ;;  %v381_v21 = vmul.f32 %v380_v8, %v379_v11  ;;  %v419_v25 = vmin.f32 %v418_v61, 14.0 }
  0xa4   : > { %v3012_v9 = vmul.f32 %v388_v16, %v387_v27  ;;  %v3016_v13 = vmul.f32 %v396_v19, %v395_v57  ;;  %v3019_v59 = vmul.f32 15.0, %v2967_v33  ;;  %v3025_v60 = vmul.f32 %v404_v23, %v403_v58 }
  0xa5   : > { %v342_v28 = vadd.f32 %v341_v46, %v334_v4  ;;  %v3027_v62 = vmul.f32 %v412_v32, %v411_v52  ;;  %v426_v5 = vmax.f32 %v2942_v18, 14.0  ;;  %v428_v8 = vstv %s2976_s1  ;;  %s564_s1 = sadd.s32 2, %s2716_s10 }
  0xa6   : > { %v3032_v19 = vmul.f32 %v420_v38, %v419_v25  ;;  %v441_v29 = vmax.f32 %v3019_v59, 0.0  ;;  %v450_v0 = vmax.f32 %v3019_v59, 1.0  ;;  %v458_v23 = vmax.f32 %v3019_v59, 2.0  ;;  %s3068_s18 = sld [smem:[#allocation3 + %s564_s1]]  ;;  %s639_s1 = sadd.s32 39, %s2707_s6 }
  0xa7   : > { %v350_v16 = vadd.f32 %v349_v55, %v342_v28  ;;  %v466_v18 = vmax.f32 %v3019_v59, 3.0  ;;  %v474_v30 = vmax.f32 %v3019_v59, 4.0  ;;  %v482_v32 = vmax.f32 %v3019_v59, 5.0 }
  0xa8   : > { %v442_v35 = vmin.f32 %v441_v29, 1.0  ;;  %v451_v36 = vmin.f32 %v450_v0, 2.0  ;;  %v508_v1 = vstv %s2988_s16  ;;  %v459_v37 = vmin.f32 %v458_v23, 3.0  ;;  %s576_s16 = sadd.s32 %s2711_s8, %s575_s0  ;;  %s647_s0 = sadd.s32 40, %s2707_s6 }
  0xa9   : > { %v358_v10 = vadd.f32 %v357_v15, %v350_v16  ;;  %v467_v38 = vmin.f32 %v466_v18, 4.0  ;;  %v516_v43 = vstv %s2990_s12  ;;  %v524_v44 = vstv %s2994_s23  ;;  %s591_s12 = sadd.s32 33, %s2707_s6  ;;  %s3082_s23 = sld [smem:[#allocation4 + %s576_s16]] }
  0xaa   : > { %v444_v14 = vmul.f32 %v443_v63, %v442_v35  ;;  %v453_v46 = vmul.f32 %v452_v42, %v451_v36  ;;  %v490_v47 = vmax.f32 %v3019_v59, 6.0  ;;  %v427_v48 = vmin.f32 %v426_v5, 15.0  ;;  %s592_s30 = sadd.s32 %s2711_s8, %s591_s12  ;;  %s640_s16 = sadd.s32 %s2711_s8, %s639_s1 }
  0xab   : > { %v366_v45 = vadd.f32 %v365_v56, %v358_v10  ;;  %v461_v50 = vmul.f32 %v460_v17, %v459_v37  ;;  %v475_v26 = vmin.f32 %v474_v30, 5.0  ;;  %v483_v53 = vmin.f32 %v482_v32, 6.0  ;;  %s3106_s24 = sld [smem:[#allocation4 + %s592_s30]]  ;;  %s648_s15 = sadd.s32 %s2711_s8, %s647_s0 }
  0xac   : > { %v446_v22 = vadd.f32 %v445_v6, %v444_v14  ;;  %v491_v42 = vmin.f32 %v490_v47, 7.0  ;;  %v498_v51 = vmax.f32 %v3019_v59, 7.0  ;;  %v506_v54 = vmax.f32 %v3019_v59, 8.0  ;;  %s656_s12 = sadd.s32 %s2711_s8, %s655_s13  ;;  %s3157_s27 = sld [smem:[#allocation4 + %s640_s16]] }
  0xad   : > { %v374_v63 = vadd.f32 %v373_v2, %v366_v45  ;;  %v514_v17 = vmax.f32 %v3019_v59, 9.0  ;;  %v522_v31 = vmax.f32 %v3019_v59, 10.0  ;;  %v530_v49 = vmax.f32 %v3019_v59, 11.0  ;;  %s3169_s30 = sld [smem:[#allocation4 + %s656_s12]]  ;;  %s772_s1 = sadd.s32 46, %s2707_s6 }
  0xae   : > { %v454_v6 = vadd.f32 %v453_v46, %v446_v22  ;;  %v469_v34 = vmul.f32 %v468_v20, %v467_v38  ;;  %v499_v11 = vmin.f32 %v498_v51, 8.0  ;;  %v429_v27 = vmul.f32 %v428_v8, %v427_v48  ;;  %s761_s0 = sadd.s32 3, %s2716_s10 }
  0xaf   : > { %v382_v40 = vadd.f32 %v381_v21, %v374_v63  ;;  %v507_v57 = vmin.f32 %v506_v54, 9.0  ;;  %v515_v58 = vmin.f32 %v514_v17, 10.0  ;;  %v523_v52 = vmin.f32 %v522_v31, 11.0  ;;  %s3281_s16 = sld [smem:[#allocation3 + %s761_s0]] }
  0xb0   : > { %v462_v4 = vadd.f32 %v461_v50, %v454_v6  ;;  %v477_v20 = vmul.f32 %v476_v12, %v475_v26  ;;  %v531_v55 = vmin.f32 %v530_v49, 12.0  ;;  %v485_v15 = vmul.f32 %v484_v24, %v483_v53 }
  0xb1   : > { %v390_v61 = vadd.f32 %v3012_v9, %v382_v40  ;;  %v493_v56 = vmul.f32 %v492_v39, %v491_v42  ;;  %v501_v2 = vmul.f32 %v500_v41, %v499_v11  ;;  %v532_v21 = vstv %s3036_s21  ;;  %s631_s21 = sadd.s32 38, %s2707_s6 }
  0xb2   : > { %v470_v28 = vadd.f32 %v469_v34, %v462_v4  ;;  %v509_v9 = vmul.f32 %v508_v1, %v507_v57  ;;  %v538_v12 = vmax.f32 %v3019_v59, 12.0  ;;  %v517_v24 = vmul.f32 %v516_v43, %v515_v58  ;;  %s632_s19 = sadd.s32 %s2711_s8, %s631_s21 }
  0xb3   : > { %v398_v25 = vadd.f32 %v3016_v13, %v390_v61  ;;  %v3102_v39 = vmul.f32 %v524_v44, %v523_v52  ;;  %v546_v41 = vmax.f32 %v3019_v59, 13.0  ;;  %v554_v5 = vmax.f32 %v3019_v59, 14.0 }
  0xb4   : > { %v478_v8 = vadd.f32 %v477_v20, %v470_v28  ;;  %v3109_v16 = vmul.f32 %v532_v21, %v531_v55  ;;  %v3112_v29 = vmul.f32 15.0, %v2997_v3  ;;  %v539_v0 = vmin.f32 %v538_v12, 13.0 }
  0xb5   : > { %v406_v13 = vadd.f32 %v3025_v60, %v398_v25  ;;  %v540_v23 = vstv %s3042_s20  ;;  %v548_v18 = vstv %s3057_s22  ;;  %v556_v59 = vstv %s3062_s14  ;;  %s3128_s20 = sld [smem:[#allocation4 + %s608_s25]]  ;;  %s679_s22 = sadd.s32 44, %s2707_s6 }
  0xb6   : > { %v486_v30 = vadd.f32 %v485_v15, %v478_v8  ;;  %v547_v32 = vmin.f32 %v546_v41, 14.0  ;;  %v569_v10 = vmax.f32 %v3112_v29, 0.0  ;;  %v555_v35 = vmin.f32 %v554_v5, 15.0  ;;  %s672_s14 = sadd.s32 %s2711_s8, %s671_s28  ;;  %s4266_s25 = sld [smem:[#allocation12_spill]] }
  0xb7   : > { %v414_v60 = vadd.f32 %v3027_v62, %v406_v13  ;;  %v571_v36 = vstv %s3079_s26  ;;  %v578_v1 = vmax.f32 %v3112_v29, 1.0  ;;  %v580_v37 = vstv %s3082_s23  ;;  %s4265_s26 = sld [smem:[#allocation9_spill]]  ;;  %s663_s23 = sadd.s32 42, %s2707_s6 }
  0xb8   : > { %v494_v62 = vadd.f32 %v493_v56, %v486_v30  ;;  %v570_v43 = vmin.f32 %v569_v10, 1.0  ;;  %v586_v44 = vmax.f32 %v3112_v29, 2.0  ;;  %v573_v45 = vstv %s3068_s18  ;;  %s3147_s18 = sld [smem:[#allocation4 + %s632_s19]]  ;;  %s664_s29 = sadd.s32 %s2711_s8, %s663_s23 }
  0xb9   : > { %v422_v38 = vadd.f32 %v3032_v19, %v414_v60  ;;  %v579_v14 = vmin.f32 %v578_v1, 2.0  ;;  %v588_v46 = vstv %s3087_s2  ;;  %v594_v47 = vmax.f32 %v3112_v29, 3.0  ;;  %s3162_s2 = sld [smem:[#allocation4 + %s648_s15]]  ;;  %s680_s21 = sadd.s32 %s2711_s8, %s679_s22 }
  0xba   : > { %v502_v19 = vadd.f32 %v501_v2, %v494_v62  ;;  %v572_v50 = vmul.f32 %v571_v36, %v570_v43  ;;  %v587_v26 = vmin.f32 %v586_v44, 3.0  ;;  %v596_v22 = vstv %s3106_s24  ;;  %s3187_s7 = sld [smem:[#allocation4 + %s664_s29]]  ;;  %s764_s19 = sadd.s32 %s2711_s8, %s763_s5 }
  0xbb   : > { %v430_v48 = vadd.f32 %v429_v27, %v422_v38  ;;  %v581_v53 = vmul.f32 %v580_v37, %v579_v14  ;;  %v595_v63 = vmin.f32 %v594_v47, 4.0  ;;  %v602_v42 = vmax.f32 %v3112_v29, 4.0  ;;  %s3277_s13 = sld [smem:[#allocation4 + %s764_s19]]  ;;  %s773_s15 = sadd.s32 %s2711_s8, %s772_s1 }
  0xbc   : > { %v510_v51 = vadd.f32 %v509_v9, %v502_v19  ;;  %v574_v54 = vadd.f32 %v573_v45, %v572_v50  ;;  %v589_v17 = vmul.f32 %v588_v46, %v587_v26  ;;  %v604_v31 = vstv %s3114_s4  ;;  %s812_s28 = sadd.s32 51, %s2707_s6  ;;  %s820_s4 = sadd.s32 52, %s2707_s6 }
  0xbd   : > { %v431_v49 = vmul.f32 %v430_v48, %v2935_v7  ;;  %v541_v40 = vmul.f32 %v540_v23, %v539_v0  ;;  %v603_v6 = vmin.f32 %v602_v42, 5.0  ;;  %v610_v34 = vmax.f32 %v3112_v29, 5.0  ;;  %s1848_s9 = sshll.u32 %s4265_s26, 1  ;;  %s813_s24 = sadd.s32 %s2711_s8, %s812_s28 }
  0xbe   : > { %v518_v11 = vadd.f32 %v517_v24, %v510_v51  ;;  %v582_v27 = vadd.f32 %v581_v53, %v574_v54  ;;  %v597_v57 = vmul.f32 %v596_v22, %v595_v63  ;;  %v618_v58 = vmax.f32 %v3112_v29, 6.0  ;;  %s3184_s17 = scalar_lea.vmem %s4266_s25, %s1848_s9  ;;  %s821_s5 = sadd.s32 %s2711_s8, %s820_s4 }
  0xbf   : > { %v605_v52 = vmul.f32 %v604_v31, %v603_v6  ;;  %v611_v61 = vmin.f32 %v610_v34, 6.0  ;;  %v612_v4 = vstv %s3128_s20  ;;  %v626_v7 = vmax.f32 %v3112_v29, 7.0  ;;  %s3191_s20 = sld [smem:[#allocation4 + %s672_s14]]  ;;  %v231_v38 = vld [vmem:[%s3184_s17] sm:$0x3]  ;;  %s836_s19 = sadd.s32 54, %s2707_s6 }
  0xc0   : > { %v526_v20 = vadd.f32 %v3102_v39, %v518_v11  ;;  %v590_v55 = vadd.f32 %v589_v17, %v582_v27  ;;  %v619_v15 = vmin.f32 %v618_v58, 7.0  ;;  %v620_v56 = vstv %s3132_s11  ;;  %s681_s11 = sld [smem:[#allocation4 + %s680_s21]]  ;;  %s889_s1 = sadd.s32 4, %s2716_s10 }
  0xc1   : > { %v432_v2 = vmax.f32 %v431_v49, 0.0  ;;  %v549_v21 = vmul.f32 %v548_v18, %v547_v32  ;;  %v557_v25 = vmul.f32 %v556_v59, %v555_v35  ;;  %v634_v28 = vmax.f32 %v3112_v29, 8.0  ;;  %s988_s26 = sadd.s32 72, %s2707_s6 }
  0xc2   : > { %v534_v9 = vadd.f32 %v3109_v16, %v526_v20  ;;  %v598_v12 = vadd.f32 %v597_v57, %v590_v55  ;;  %v613_v24 = vmul.f32 %v612_v4, %v611_v61  ;;  %v627_v39 = vmin.f32 %v626_v7, 8.0 }
  0xc3   : > { %v621_v41 = vmul.f32 %v620_v56, %v619_v15  ;;  %v628_v5 = vstv %s3143_s3  ;;  %v635_v13 = vmin.f32 %v634_v28, 9.0  ;;  %v642_v8 = vmax.f32 %v3112_v29, 9.0  ;;  %s780_s3 = sadd.s32 47, %s2707_s6 }
  0xc4   : > { %v542_v0 = vadd.f32 %v541_v40, %v534_v9  ;;  %v606_v23 = vadd.f32 %v605_v52, %v598_v12  ;;  %v636_v18 = vstv %s3147_s18  ;;  %v650_v59 = vmax.f32 %v3112_v29, 10.0  ;;  %s788_s18 = sadd.s32 48, %s2707_s6  ;;  %s781_s12 = sadd.s32 %s2711_s8, %s780_s3 }
  0xc5   : > { %v433_v16 = vmin.f32 %v432_v2, 1.0  ;;  %v658_v60 = vmax.f32 %v3112_v29, 11.0  ;;  %v629_v10 = vmul.f32 %v628_v5, %v627_v39  ;;  %v643_v35 = vmin.f32 %v642_v8, 10.0  ;;  %s789_s23 = sadd.s32 %s2711_s8, %s788_s18  ;;  %s3298_s9 = sld [smem:[#allocation4 + %s781_s12]] }
  0xc6   : > { %v550_v30 = vadd.f32 %v549_v21, %v542_v0  ;;  %v614_v32 = vadd.f32 %v613_v24, %v606_v23  ;;  %v637_v36 = vmul.f32 %v636_v18, %v635_v13  ;;  %v644_v1 = vstv %s3157_s27  ;;  %s796_s27 = sadd.s32 49, %s2707_s6  ;;  %s3302_s22 = sld [smem:[#allocation4 + %s789_s23]] }
  0xc7   : > { %v651_v37 = vmin.f32 %v650_v59, 11.0  ;;  %v652_v44 = vstv %s3162_s2  ;;  %v666_v45 = vmax.f32 %v3112_v29, 12.0  ;;  %v434_v14 = vmul.f32 %v433_v16, %v231_v38  ;;  %s804_s2 = sadd.s32 50, %s2707_s6  ;;  %s797_s29 = sadd.s32 %s2711_s8, %s796_s27 }
  0xc8   : > { %v558_v62 = vadd.f32 %v557_v25, %v550_v30  ;;  %v622_v43 = vadd.f32 %v621_v41, %v614_v32  ;;  %v659_v46 = vmin.f32 %v658_v60, 12.0  ;;  %v660_v47 = vstv %s3169_s30  ;;  %s3295_s30 = sld [smem:[#allocation4 + %s773_s15]]  ;;  %s805_s14 = sadd.s32 %s2711_s8, %s804_s2 }
  0xc9   : > { %v645_v50 = vmul.f32 %v644_v1, %v643_v35  ;;  %v674_v26 = vmax.f32 %v3112_v29, 13.0  ;;  %v653_v53 = vmul.f32 %v652_v44, %v651_v37  ;;  %v667_v42 = vmin.f32 %v666_v45, 13.0  ;;  %s3312_s25 = sld [smem:[#allocation4 + %s797_s29]]  ;;  %s844_s3 = sadd.s32 55, %s2707_s6 }
  0xca   : > { %v559_v48 = vmul.f32 %v558_v62, %v2967_v33  ;;  %v630_v19 = vadd.f32 %v629_v10, %v622_v43  ;;  %v682_v51 = vmax.f32 %v3112_v29, 14.0  ;;  %v661_v54 = vmul.f32 %v660_v47, %v659_v46  ;;  %s3317_s21 = sld [smem:[#allocation4 + %s805_s14]]  ;;  %s837_s12 = sadd.s32 %s2711_s8, %s836_s19 }
  0xcb   : > { %v668_v17 = vstv %s3187_s7  ;;  %v675_v40 = vmin.f32 %v674_v26, 14.0  ;;  %v691_v6 = vmul.f32 100.0, %v434_v14  ;;  %v676_v34 = vstv %s3191_s20  ;;  %s891_s7 = sadd.s32 60, %s2707_s6  ;;  %s828_s20 = sadd.s32 53, %s2707_s6 }
  0xcc   : > { %v560_v63 = vmax.f32 %v559_v48, 0.0  ;;  %v638_v22 = vadd.f32 %v637_v36, %v630_v19  ;;  %v669_v33 = vmul.f32 %v668_v17, %v667_v42  ;;  %v683_v57 = vmin.f32 %v682_v51, 15.0  ;;  %s829_s0 = sadd.s32 %s2711_s8, %s828_s20  ;;  %s3345_s18 = sld [smem:[#allocation4 + %s821_s5]] }
  0xcd   : > { %v684_v58 = vstv %s681_s11  ;;  %v677_v61 = vmul.f32 %v676_v34, %v675_v40  ;;  %v698_v7 = vadd.f32 16.0, %v691_v6  ;;  %s3322_s11 = sld [smem:[#allocation4 + %s813_s24]]  ;;  %s892_s15 = sadd.s32 %s2711_s8, %s891_s7 }
  0xce   : > { %v561_v31 = vmin.f32 %v560_v63, 1.0  ;;  %v646_v49 = vadd.f32 %v645_v50, %v638_v22  ;;  %v685_v55 = vmul.f32 %v684_v58, %v683_v57  ;;  %s3352_s27 = sld [smem:[#allocation3 + %s889_s1]]  ;;  %s845_s2 = sadd.s32 %s2711_s8, %s844_s3 }
  0xcf   : > { %v699_v2 = vmul.f32 0.00862069, %v698_v7  ;;  %s3357_s23 = sld [smem:[#allocation4 + %s829_s0]]  ;;  %s900_s29 = sadd.s32 61, %s2707_s6 }
  0xd0   : > { %v562_v11 = vmul.f32 %v561_v31, %v231_v38  ;;  %v654_v27 = vadd.f32 %v653_v53, %v646_v49  ;;  %s3366_s28 = sld [smem:[#allocation4 + %s892_s15]]  ;;  %s908_s24 = sadd.s32 62, %s2707_s6 }
  0xd1   : > { %v714_v41 = vmax.f32 %v699_v2, 0.0001  ;;  %v1859_v23 = vadd.f32 -0.13793103, %v699_v2  ;;  %vm711_vm2 = vcmp.le.f32.partialorder %v699_v2, 0.20689656  ;;  %s901_s20 = sadd.s32 %s2711_s8, %s900_s29  ;;  %s909_s5 = sadd.s32 %s2711_s8, %s908_s24 }
  0xd2   : > { %v662_v52 = vadd.f32 %v661_v54, %v654_v27  ;;  %v692_v4 = vmul.f32 2.0, %v562_v11  ;;  %s3369_s14 = sld [smem:[#allocation4 + %s837_s12]]  ;;  %s852_s7 = sadd.s32 56, %s2707_s6 }
  0xd3   : > { %v2169_v18 = vmul.f32 %v714_v41, %v714_v41  ;;  %v713_v32 = vmul.f32 0.12841855, %v1859_v23  ;;  %s3372_s4 = sld [smem:[#allocation4 + %s845_s2]]  ;;  %s916_s19 = sadd.s32 63, %s2707_s6 }
  0xd4   : > { %v670_v20 = vadd.f32 %v669_v33, %v662_v52  ;;  %v1856_v15 = vadd.f32 -1.0, %v692_v4  ;;  %s860_s1 = sadd.s32 57, %s2707_s6  ;;  %s924_s0 = sadd.s32 64, %s2707_s6 }
  0xd5   : > { %v2170_v10 = vmul.f32 %v2169_v18, %v714_v41  ;;  %s868_s3 = sadd.s32 58, %s2707_s6  ;;  %s3388_s15 = sld [smem:[#allocation4 + %s901_s20]] }
  0xd6   : > { %v678_v29 = vadd.f32 %v677_v61, %v670_v20  ;;  %v694_v56 = vmul.f32 110.0, %v1856_v15  ;;  %s3395_s12 = sld [smem:[#allocation4 + %s909_s5]]  ;;  %s917_s2 = sadd.s32 %s2711_s8, %s916_s19 }
  0xd7   : > { %v716_v37 = vsel %vm711_vm2, %v713_v32, %v2170_v10  ;;  %s925_s29 = sadd.s32 %s2711_s8, %s924_s0  ;;  %s932_s24 = sadd.s32 65, %s2707_s6 }
  0xd8   : > { %v686_v21 = vadd.f32 %v685_v55, %v678_v29  ;;  %v700_v25 = vmul.f32 0.002, %v694_v56  ;;  %v725_v44 = vmul.f32 1.5371385, %v716_v37  ;;  %v735_v47 = vmul.f32 0.2040259, %v716_v37  ;;  %s853_s20 = sadd.s32 %s2711_s8, %s852_s7  ;;  %s861_s19 = sadd.s32 %s2711_s8, %s860_s1 }
  0xd9   : > { %s940_s5 = sadd.s32 66, %s2707_s6  ;;  %s3428_s0 = sld [smem:[#allocation4 + %s917_s2]] }
  0xda   : > { %v687_v28 = vmul.f32 %v686_v21, %v2997_v3  ;;  %v701_v9 = vadd.f32 %v700_v25, %v699_v2  ;;  %s3438_s7 = sld [smem:[#allocation4 + %s925_s29]]  ;;  %s933_s1 = sadd.s32 %s2711_s8, %s932_s24 }
  0xdb   : > { %s3447_s2 = sld [smem:[#allocation4 + %s853_s20]]  ;;  %s941_s29 = sadd.s32 %s2711_s8, %s940_s5 }
  0xdc   : > { %v688_v12 = vmax.f32 %v687_v28, 0.0  ;;  %v707_v24 = vmax.f32 %v701_v9, 0.0001  ;;  %v1858_v5 = vadd.f32 -0.13793103, %v701_v9  ;;  %s3456_s24 = sld [smem:[#allocation4 + %s861_s19]] }
  0xdd   : > { %vm704_vm1 = vcmp.le.f32.partialorder %v701_v9, 0.20689656  ;;  %s3466_s20 = sld [smem:[#allocation4 + %s933_s1]]  ;;  %s876_s19 = sadd.s32 59, %s2707_s6 }
  0xde   : > { %v689_v39 = vmin.f32 %v688_v12, 1.0  ;;  %v2167_v13 = vmul.f32 %v707_v24, %v707_v24  ;;  %v706_v59 = vmul.f32 0.12841855, %v1858_v5 }
  0xe0   : > { %v690_v8 = vmul.f32 %v689_v39, %v231_v38  ;;  %v2168_v16 = vmul.f32 %v2167_v13, %v707_v24  ;;  %v730_v38 = vmul.f32 1.8760108, %v716_v37 }
  0xe2   : > { %v695_v0 = vmul.f32 2.0, %v690_v8  ;;  %v709_v35 = vsel %vm704_vm1, %v706_v59, %v2168_v16 }
  0xe3   : > { %v710_v1 = vmul.f32 0.950456, %v709_v35 }
  0xe4   : > { %v1857_v60 = vadd.f32 -1.0, %v695_v0 }
  0xe5   : > { %v724_v46 = vmul.f32 3.2404542, %v710_v1  ;;  %v729_v48 = vmul.f32 -0.969266, %v710_v1  ;;  %v734_v19 = vmul.f32 0.0556434, %v710_v1 }
  0xe6   : > { %v697_v30 = vmul.f32 110.0, %v1857_v60 }
  0xe7   : > { %v726_v63 = vsub.f32 %v724_v46, %v725_v44  ;;  %v731_v22 = vadd.f32 %v730_v38, %v729_v48  ;;  %v736_v42 = vsub.f32 %v734_v19, %v735_v47 }
  0xe8   : > { %v702_v3 = vmul.f32 0.005, %v697_v30 }
  0xea   : > { %v703_v36 = vsub.f32 %v699_v2, %v702_v3 }
  0xec   : > { %v1860_v62 = vadd.f32 -0.13793103, %v703_v36  ;;  %v720_v43 = vmax.f32 %v703_v36, 0.0001  ;;  %vm717_vm4 = vcmp.le.f32.partialorder %v703_v36, 0.20689656 }
  0xee   : > { %v719_v45 = vmul.f32 0.12841855, %v1860_v62  ;;  %v2171_v14 = vmul.f32 %v720_v43, %v720_v43 }
  0xf0   : > { %v2172_v50 = vmul.f32 %v2171_v14, %v720_v43 }
  0xf2   : > { %v722_v26 = vsel %vm717_vm4, %v719_v45, %v2172_v50 }
  0xf3   : > { %v723_v53 = vmul.f32 1.088754, %v722_v26 }
  0xf5   : > { %v727_v51 = vmul.f32 0.4985314, %v723_v53  ;;  %v732_v54 = vmul.f32 0.041556, %v723_v53  ;;  %v737_v17 = vmul.f32 1.0572252, %v723_v53 }
  0xf7   : > { %v3203_v31 = vsub.f32 %v726_v63, %v727_v51  ;;  %v3205_v49 = vadd.f32 %v732_v54, %v731_v22  ;;  %v3207_v40 = vadd.f32 %v737_v17, %v736_v42 }
  0xf9   : > { %v3210_v6 = vmax.f32 %v3203_v31, 0.0001  ;;  %v3213_v34 = vmax.f32 %v3205_v49, 0.0001  ;;  %v3216_v11 = vmax.f32 %v3207_v40, 0.0001 }
  0xfb   : > { %v3219_v27 = vand.u32 2147483647, %v3210_v6  ;;  %v3222_v33 = vand.u32 2147483647, %v3213_v34  ;;  %v3225_v57 = vand.u32 2147483647, %v3216_v11 }
  0xfc   : > { %vm2224_vm4 = vcmp.lt.f32.partialorder %v3210_v6, 0 }
  0xfd   : > { %v2183_v58 = vand.u32 8388607, %v3219_v27  ;;  %v2254_v52 = vand.u32 8388607, %v3222_v33  ;;  %v2325_v61 = vand.u32 8388607, %v3225_v57  ;;  %vm2217_vm9 = vweird.f32 %v3219_v27 }
  0xfe   : > { %v2179_v24 = vand.u32 2139095040, %v3219_v27  ;;  %v2250_v8 = vand.u32 2139095040, %v3222_v33  ;;  %v2321_v60 = vand.u32 2139095040, %v3225_v57  ;;  %vm2216_vm10 = vcmp.lt.f32.partialorder %v3219_v27, 0.0 }
  0xff   : > { %v2184_v4 = vor.u32 8388608, %v2183_v58  ;;  %v2255_v20 = vor.u32 8388608, %v2254_v52  ;;  %v2326_v55 = vor.u32 8388608, %v2325_v61  ;;  %vm2215_vm11 = vcmp.eq.f32.partialorder %v3219_v27, 0.0 }
 0x100   : > { %v2180_v16 = vshrl.u32 %v2179_v24, 23  ;;  %v2251_v3 = vshrl.u32 %v2250_v8, 23  ;;  %v2322_v48 = vshrl.u32 %v2321_v60, 23  ;;  %vm2288_vm12 = vweird.f32 %v3222_v33 }
 0x101   : > { %v2186_v7 = vand.u32 8388607, %v2184_v4  ;;  %v2257_v29 = vand.u32 8388607, %v2255_v20  ;;  %v2328_v56 = vand.u32 8388607, %v2326_v55  ;;  %vm2359_vm3 = vweird.f32 %v3225_v57 }
 0x102   : > { %v2242_v44 = vadd.s32 4294967169, %v2180_v16  ;;  %v2313_v19 = vadd.s32 4294967169, %v2251_v3  ;;  %vm2214_vm13 = vcmp.eq.f32.partialorder %v3219_v27, 1.0  ;;  %vm2287_vm14 = vcmp.lt.f32.partialorder %v3222_v33, 0.0 }
 0x103   : > { %v3230_v15 = vor.u32 1065353216, %v2186_v7  ;;  %v3234_v21 = vor.u32 1065353216, %v2257_v29  ;;  %v3236_v25 = vor.u32 1065353216, %v2328_v56  ;;  %v2384_v7 = vadd.s32 4294967169, %v2322_v48 }
 0x104   : > { %v2191_v51 = vadd.s32 1, %v2242_v44  ;;  %v2262_v20 = vadd.s32 1, %v2313_v19  ;;  %vm2286_vm15 = vcmp.eq.f32.partialorder %v3222_v33, 0.0  ;;  %vm2285_vm0 = vcmp.eq.f32.partialorder %v3222_v33, 1.0 }
 0x105   : > { %vm2188_vm5 = vcmp.ge.f32.partialorder %v3230_v15, 1.4142135  ;;  %v2189_v2 = vmul.f32 0.5, %v3230_v15  ;;  %vm2259_vm7 = vcmp.ge.f32.partialorder %v3234_v21, 1.4142135  ;;  %v2260_v9 = vmul.f32 0.5, %v3234_v21 }
 0x106   : > { %vm2330_vm8 = vcmp.ge.f32.partialorder %v3236_v25, 1.4142135  ;;  %v2331_v13 = vmul.f32 0.5, %v3236_v25  ;;  %v2192_v24 = vsel %vm2188_vm5, %v2191_v51, %v2242_v44  ;;  %vm2358_vm6 = vcmp.lt.f32.partialorder %v3225_v57, 0.0 }
 0x107   : > { %v2190_v28 = vsel %vm2188_vm5, %v2189_v2, %v3230_v15  ;;  %v2261_v39 = vsel %vm2259_vm7, %v2260_v9, %v3234_v21  ;;  %vm2357_vm1 = vcmp.eq.f32.partialorder %v3225_v57, 0.0  ;;  %vm2356_vm2 = vcmp.eq.f32.partialorder %v3225_v57, 1.0 }
 0x108   : > { %v3243_v12 = vadd.f32 -1.0, %v2190_v28  ;;  %v3252_v5 = vadd.f32 -1.0, %v2261_v39  ;;  %v2332_v59 = vsel %vm2330_vm8, %v2331_v13, %v3236_v25  ;;  %vm739_vm5 = vcmp.le.f32.partialorder %v3203_v31, 0.0031308 }
 0x109   : > { %v3262_v30 = vadd.f32 -1.0, %v2332_v59  ;;  %v2263_v59 = vsel %vm2259_vm7, %v2262_v20, %v2313_v19  ;;  %vm2225_vm7 = vcmp.eq.f32.partialorder %v3210_v6, 0 }
 0x10a   : > { %v2194_v41 = vmul.f32 %v3243_v12, %v3243_v12  ;;  %v2265_v18 = vmul.f32 %v3252_v5, %v3252_v5 }
 0x10b   : > { %v3266_v1 = vmul.f32 %v3262_v30, %v3262_v30 }
 0x10c   : > { %v2195_v0 = vmul.f32 0.12621109, %v2194_v41  ;;  %v2197_v23 = vmul.f32 -0.20706727, %v2194_v41  ;;  %v2266_v35 = vmul.f32 0.12621109, %v2265_v18 }
 0x10d   : > { %v2268_v36 = vmul.f32 -0.20706727, %v2265_v18  ;;  %v2337_v45 = vmul.f32 0.12621109, %v3266_v1  ;;  %v2339_v53 = vmul.f32 -0.20706727, %v3266_v1 }
 0x10e   : > { %v2196_v32 = vadd.f32 0.21545328, %v2195_v0  ;;  %v2198_v10 = vadd.f32 -0.23896284, %v2197_v23  ;;  %v2267_v43 = vadd.f32 0.21545328, %v2266_v35 }
 0x10f   : > { %v2269_v38 = vadd.f32 -0.23896284, %v2268_v36  ;;  %v2338_v26 = vadd.f32 0.21545328, %v2337_v45  ;;  %v2340_v17 = vadd.f32 -0.23896284, %v2339_v53 }
 0x110   : > { %v2199_v37 = vmul.f32 %v2196_v32, %v2194_v41  ;;  %v2201_v62 = vmul.f32 %v2198_v10, %v2194_v41  ;;  %v2270_v47 = vmul.f32 %v2267_v43, %v2265_v18  ;;  %v2212_v10 = vcvt.s32.f32 %v2192_v24 }
 0x111   : > { %v2272_v50 = vmul.f32 %v2269_v38, %v2265_v18  ;;  %v2341_v58 = vmul.f32 %v2338_v26, %v3266_v1  ;;  %v2343_v56 = vmul.f32 %v2340_v17, %v3266_v1 }
 0x112   : > { %v2200_v14 = vadd.f32 0.28795174, %v2199_v37  ;;  %v2202_v46 = vadd.f32 -0.3607037, %v2201_v62  ;;  %v2271_v42 = vadd.f32 0.28795174, %v2270_v47  ;;  %v2283_v37 = vcvt.s32.f32 %v2263_v59 }
 0x113   : > { %v2273_v54 = vadd.f32 -0.3607037, %v2272_v50  ;;  %v2342_v29 = vadd.f32 0.28795174, %v2341_v58  ;;  %v2344_v13 = vadd.f32 -0.3607037, %v2343_v56  ;;  %v785_v59 = vstv %s3298_s9 }
 0x114   : > { %v2203_v63 = vmul.f32 %v2200_v14, %v2194_v41  ;;  %v2205_v22 = vmul.f32 %v2202_v46, %v2194_v41  ;;  %v2274_v4 = vmul.f32 %v2271_v42, %v2265_v18  ;;  %s948_s9 = sadd.s32 67, %s2707_s6 }
 0x115   : > { %v2276_v55 = vmul.f32 %v2273_v54, %v2265_v18  ;;  %v2345_v8 = vmul.f32 %v2342_v29, %v3266_v1  ;;  %v2347_v60 = vmul.f32 %v2344_v13, %v3266_v1  ;;  %v768_v13 = vstv %s3277_s13  ;;  %s869_s13 = sadd.s32 %s2711_s8, %s868_s3  ;;  %s949_s5 = sadd.s32 %s2711_s8, %s948_s9 }
 0x116   : > { %v2204_v52 = vadd.f32 0.48090908, %v2203_v63  ;;  %v2206_v61 = vadd.f32 -0.72134733, %v2205_v22  ;;  %v2275_v9 = vadd.f32 0.48090908, %v2274_v4 }
 0x117   : > { %v2277_v39 = vadd.f32 -0.72134733, %v2276_v55  ;;  %v2346_v16 = vadd.f32 0.48090908, %v2345_v8  ;;  %v2348_v35 = vadd.f32 -0.72134733, %v2347_v60  ;;  %v770_v8 = vstv %s3281_s16 }
 0x118   : > { %v2207_v2 = vmul.f32 %v2204_v52, %v2194_v41  ;;  %v2209_v28 = vmul.f32 %v3243_v12, %v2206_v61  ;;  %v2278_v23 = vmul.f32 %v2275_v9, %v2265_v18  ;;  %v2333_v41 = vadd.s32 1, %v2384_v7  ;;  %s3488_s3 = sld [smem:[#allocation4 + %s869_s13]]  ;;  %s877_s13 = sadd.s32 %s2711_s8, %s876_s19 }
 0x119   : > { %v2280_v15 = vmul.f32 %v3252_v5, %v2277_v39  ;;  %v2349_v21 = vmul.f32 %v2346_v16, %v3266_v1  ;;  %v2351_v44 = vmul.f32 %v3262_v30, %v2348_v35  ;;  %v3383_v52 = vmul.f32 12.92, %v3203_v31  ;;  %s3514_s1 = sld [smem:[#allocation4 + %s949_s5]]  ;;  %s964_s9 = sadd.s32 69, %s2707_s6 }
 0x11a   : > { %v2208_v0 = vadd.f32 1.442695, %v2207_v2  ;;  %v2279_v18 = vadd.f32 1.442695, %v2278_v23  ;;  %v2334_v62 = vsel %vm2330_vm8, %v2333_v41, %v2384_v7  ;;  %vm2226_vm8 = vcmp.eq.f32.partialorder %v3210_v6, 1065353216  ;;  %s3535_s16 = sld [smem:[#allocation4 + %s877_s13]] }
 0x11b   : > { %v2350_v43 = vadd.f32 1.442695, %v2349_v21  ;;  %v2354_v38 = vcvt.s32.f32 %v2334_v62  ;;  %v3409_v55 = vmul.f32 12.92, %v3205_v49  ;;  %v3422_v2 = vmul.f32 12.92, %v3207_v40 }
 0x11c   : > { %v2210_v32 = vadd.f32 %v2209_v28, %v2208_v0  ;;  %v2281_v36 = vadd.f32 %v2280_v15, %v2279_v18  ;;  %v777_v41 = vstv %s3295_s30  ;;  %v793_v15 = vstv %s3302_s22  ;;  %s3472_s30 = sld [smem:[#allocation4 + %s941_s29]]  ;;  %s956_s29 = sadd.s32 68, %s2707_s6 }
 0x11d   : > { %v2352_v25 = vadd.f32 %v2351_v44, %v2350_v43  ;;  %v801_v16 = vstv %s3312_s25  ;;  %v817_v18 = vstv %s3322_s11  ;;  %v905_v62 = vstv %s3388_s15  ;;  %s957_s5 = sadd.s32 %s2711_s8, %s956_s29  ;;  %s972_s19 = sadd.s32 70, %s2707_s6 }
 0x11e   : > { %v2211_v3 = vmul.f32 %v3243_v12, %v2210_v32  ;;  %v2282_v12 = vmul.f32 %v3252_v5, %v2281_v36  ;;  %v896_v36 = vstv %s3366_s28  ;;  %v849_v31 = vstv %s3372_s4  ;;  %s965_s22 = sadd.s32 %s2711_s8, %s964_s9  ;;  %s980_s29 = sadd.s32 71, %s2707_s6 }
 0x11f   : > { %v2353_v46 = vmul.f32 %v3262_v30, %v2352_v25  ;;  %s3548_s13 = sld [smem:[#allocation4 + %s957_s5]]  ;;  %s973_s25 = sadd.s32 %s2711_s8, %s972_s19 }
 0x120   : > { %v2213_v1 = vadd.f32 %v2212_v10, %v2211_v3  ;;  %v2284_v45 = vadd.f32 %v2283_v37, %v2282_v12  ;;  %v809_v10 = vstv %s3317_s21  ;;  %v825_v3 = vstv %s3345_s18  ;;  %s996_s9 = sadd.s32 73, %s2707_s6  ;;  %s3567_s5 = sld [smem:[#allocation4 + %s965_s22]] }
 0x121   : > { %v2355_v50 = vadd.f32 %v2354_v38, %v2353_v46  ;;  %v833_v37 = vstv %s3357_s23  ;;  %v913_v12 = vstv %s3395_s12  ;;  %v921_v38 = vstv %s3428_s0  ;;  %s981_s21 = sadd.s32 %s2711_s8, %s980_s29  ;;  %s989_s11 = sadd.s32 %s2711_s8, %s988_s26 }
 0x122   : > { %v2218_v5 = vsel %vm2217_vm9, %v3219_v27, %v2213_v1  ;;  %v2289_v48 = vsel %vm2288_vm12, %v3222_v33, %v2284_v45  ;;  %vm2229_vm9 = vcmp.eq.f32.partialorder %v3219_v27, 2139095040  ;;  %vm2296_vm12 = vcmp.eq.f32.partialorder %v3213_v34, 0  ;;  %s1004_s18 = sadd.s32 74, %s2707_s6  ;;  %s3589_s23 = sld [smem:[#allocation4 + %s973_s25]] }
 0x123   : > { %v2219_v14 = vsel %vm2216_vm10, nan, %v2218_v5  ;;  %v2290_v19 = vsel %vm2287_vm14, nan, %v2289_v48  ;;  %v2360_v22 = vsel %vm2359_vm3, %v3225_v57, %v2355_v50  ;;  %vm2237_vm10 = vcmp.ne.f32.partialorder %v3210_v6, %v3210_v6  ;;  %s3596_s26 = sld [smem:[#allocation4 + %s981_s21]]  ;;  %s1028_s22 = sadd.s32 76, %s2707_s6 }
 0x124   : > { %v2220_v47 = vsel %vm2215_vm11, -inf, %v2219_v14  ;;  %v2291_v53 = vsel %vm2286_vm15, -inf, %v2290_v19  ;;  %v2361_v51 = vsel %vm2358_vm6, nan, %v2360_v22  ;;  %vm2295_vm11 = vcmp.lt.f32.partialorder %v3213_v34, 0  ;;  %s3602_s4 = sld [smem:[#allocation4 + %s989_s11]]  ;;  %s1036_s29 = sadd.s32 77, %s2707_s6 }
 0x125   : > { %v2221_v30 = vsel %vm2214_vm13, 0.0, %v2220_v47  ;;  %v2292_v63 = vsel %vm2285_vm0, 0.0, %v2291_v53  ;;  %v2362_v54 = vsel %vm2357_vm1, -inf, %v2361_v51  ;;  %vm2297_vm13 = vcmp.eq.f32.partialorder %v3213_v34, 1065353216  ;;  %s1044_s15 = sadd.s32 78, %s2707_s6  ;;  %s1037_s25 = sadd.s32 %s2711_s8, %s1036_s29 }
 0x126   : > { %v2222_v26 = vmul.f32 0.41666666, %v2221_v30  ;;  %v2293_v42 = vmul.f32 0.41666666, %v2292_v63  ;;  %v2363_v17 = vsel %vm2356_vm2, 0.0, %v2362_v54  ;;  %vm2300_vm14 = vcmp.eq.f32.partialorder %v3222_v33, 2139095040  ;;  %s1045_s21 = sadd.s32 %s2711_s8, %s1044_s15 }
 0x127   : > { %v2364_v58 = vmul.f32 0.41666666, %v2363_v17  ;;  %vm2308_vm15 = vcmp.ne.f32.partialorder %v3213_v34, %v3213_v34  ;;  %vm2366_vm0 = vcmp.lt.f32.partialorder %v3216_v11, 0  ;;  %vm2367_vm3 = vcmp.eq.f32.partialorder %v3216_v11, 0  ;;  %s1100_s29 = sadd.s32 85, %s2707_s6 }
 0x128   : > { %2431 = vpow2.f32 %v2222_v26  ;;  %vm2368_vm6 = vcmp.eq.f32.partialorder %v3216_v11, 1065353216  ;;  %vm2371_vm1 = vcmp.eq.f32.partialorder %v3225_v57, 2139095040  ;;  %vm2379_vm2 = vcmp.ne.f32.partialorder %v3216_v11, %v3216_v11 }
 0x129   : > { %2433 = vpow2.f32 %v2293_v42  ;;  %v898_v34 = vstv %s3352_s27  ;;  %v841_v1 = vstv %s3369_s14  ;;  %v929_v5 = vstv %s3438_s7  ;;  %s997_s14 = sadd.s32 %s2711_s8, %s996_s9  ;;  %s1029_s27 = sadd.s32 %s2711_s8, %s1028_s22 }
 0x12a   : > { %2435 = vpow2.f32 %v2364_v58  ;;  %v857_v46 = vstv %s3447_s2  ;;  %v937_v63 = vstv %s3466_s20  ;;  %v865_v51 = vstv %s3456_s24  ;;  %s1005_s2 = sadd.s32 %s2711_s8, %s1004_s18  ;;  %s3610_s19 = sld [smem:[#allocation4 + %s997_s14]] }
 0x12b   : > { %v945_v54 = vstv %s3472_s30  ;;  %s1019_s24 = sadd.s32 75, %s2707_s6  ;;  %s3649_s0 = sld [smem:[#allocation4 + %s1029_s27]] }
 0x12c   : > { %s1020_s28 = sadd.s32 %s2711_s8, %s1019_s24  ;;  %s1060_s18 = sadd.s32 80, %s2707_s6 }
 0x12d   : > { %s3644_s9 = sld [smem:[#allocation4 + %s1020_s28]]  ;;  %s1068_s14 = sadd.s32 81, %s2707_s6 }
 0x12e   : > { %v2432_v61 = vpop.eup %2431  ;;  %s3661_s7 = sld [smem:[#allocation4 + %s1045_s21]]  ;;  %s1061_s20 = sadd.s32 %s2711_s8, %s1060_s18 }
 0x12f   : > { %v2230_v4 = vsel %vm2224_vm4, 2143289344, %v2432_v61  ;;  %v2434_v7 = vpop.eup %2433  ;;  %vm746_vm4 = vcmp.le.f32.partialorder %v3205_v49, 0.0031308  ;;  %s1069_s30 = sadd.s32 %s2711_s8, %s1068_s14  ;;  %s1101_s27 = sadd.s32 %s2711_s8, %s1100_s29 }
 0x130   : > { %v2231_v20 = vsel %vm2225_vm7, 0, %v2230_v4  ;;  %v2301_v56 = vsel %vm2295_vm11, 2143289344, %v2434_v7  ;;  %v2436_v9 = vpop.eup %2435  ;;  %s1124_s21 = sadd.s32 88, %s2707_s6 }
 0x131   : > { %v2236_v29 = vsel %vm2229_vm9, 2139095040, %v2231_v20  ;;  %v2302_v28 = vsel %vm2296_vm12, 0, %v2301_v56  ;;  %v2372_v6 = vsel %vm2366_vm0, 2143289344, %v2436_v9  ;;  %s1125_s18 = sadd.s32 %s2711_s8, %s1124_s21 }
 0x132   : > { %v2240_v27 = vsel %vm2237_vm10, 2143289344, %v2236_v29  ;;  %v2307_v39 = vsel %vm2300_vm14, 2139095040, %v2302_v28  ;;  %v2373_v33 = vsel %vm2367_vm3, 0, %v2372_v6  ;;  %v873_v29 = vstv %s3488_s3  ;;  %s1017_s3 = sadd.s32 5, %s2716_s10 }
 0x133   : > { %v2241_v24 = vsel %vm2226_vm8, 1065353216, %v2240_v27  ;;  %v2311_v23 = vsel %vm2308_vm15, 2143289344, %v2307_v39  ;;  %v2378_v32 = vsel %vm2371_vm1, 2139095040, %v2373_v33  ;;  %s3640_s12 = sld [smem:[#allocation3 + %s1017_s3]]  ;;  %s1092_s3 = sadd.s32 84, %s2707_s6 }
 0x134   : > { %v743_v0 = vmul.f32 1.055, %v2241_v24  ;;  %v2312_v35 = vsel %vm2297_vm13, 1065353216, %v2311_v23  ;;  %v2382_v21 = vsel %vm2379_vm2, 2143289344, %v2378_v32  ;;  %s1093_s15 = sadd.s32 %s2711_s8, %s1092_s3 }
 0x135   : > { %v2383_v43 = vsel %vm2368_vm6, 1065353216, %v2382_v21  ;;  %v750_v25 = vmul.f32 1.055, %v2312_v35 }
 0x136   : > { %v1861_v60 = vadd.f32 -0.055, %v743_v0  ;;  %v757_v47 = vmul.f32 1.055, %v2383_v43  ;;  %v953_v43 = vstv %s3514_s1  ;;  %s1084_s1 = sadd.s32 83, %s2707_s6 }
 0x137   : > { %v1862_v22 = vadd.f32 -0.055, %v750_v25  ;;  %s1085_s24 = sadd.s32 %s2711_s8, %s1084_s1 }
 0x138   : > { %v3485_v57 = vsel %vm739_vm5, %v3383_v52, %v1861_v60  ;;  %vm753_vm5 = vcmp.le.f32.partialorder %v3207_v40, 0.0031308  ;;  %v1863_v4 = vadd.f32 -0.055, %v757_v47  ;;  %s3712_s28 = sld [smem:[#allocation4 + %s1085_s24]]  ;;  %s1214_s24 = sadd.s32 93, %s2707_s6 }
 0x139   : > { %v3496_v44 = vmul.f32 15.0, %v3485_v57  ;;  %v3541_v33 = vsel %vm746_vm4, %v3409_v55, %v1862_v22 }
 0x13a   : > { %v3554_v49 = vsel %vm753_vm5, %v3422_v2, %v1863_v4  ;;  %v3565_v47 = vmul.f32 15.0, %v3541_v33 }
 0x13b   : > { %v766_v45 = vmax.f32 %v3496_v44, 0.0  ;;  %v775_v11 = vmax.f32 %v3496_v44, 1.0  ;;  %v783_v14 = vmax.f32 %v3496_v44, 2.0  ;;  %v791_v48 = vmax.f32 %v3496_v44, 3.0 }
 0x13c   : > { %v799_v30 = vmax.f32 %v3496_v44, 4.0  ;;  %v807_v19 = vmax.f32 %v3496_v44, 5.0  ;;  %v815_v42 = vmax.f32 %v3496_v44, 6.0  ;;  %v823_v61 = vmax.f32 %v3496_v44, 7.0 }
 0x13d   : > { %v767_v50 = vmin.f32 %v766_v45, 1.0  ;;  %v776_v26 = vmin.f32 %v775_v11, 2.0  ;;  %v784_v53 = vmin.f32 %v783_v14, 3.0  ;;  %v792_v52 = vmin.f32 %v791_v48, 4.0 }
 0x13e   : > { %v800_v7 = vmin.f32 %v799_v30, 5.0  ;;  %v808_v20 = vmin.f32 %v807_v19, 6.0  ;;  %v831_v28 = vmax.f32 %v3496_v44, 8.0  ;;  %v839_v9 = vmax.f32 %v3496_v44, 9.0 }
 0x13f   : > { %v769_v17 = vmul.f32 %v768_v13, %v767_v50  ;;  %v778_v58 = vmul.f32 %v777_v41, %v776_v26  ;;  %v786_v27 = vmul.f32 %v785_v59, %v784_v53  ;;  %v816_v24 = vmin.f32 %v815_v42, 7.0 }
 0x140   : > { %v824_v39 = vmin.f32 %v823_v61, 8.0  ;;  %v847_v13 = vmax.f32 %v3496_v44, 10.0  ;;  %v855_v0 = vmax.f32 %v3496_v44, 11.0  ;;  %v863_v6 = vmax.f32 %v3496_v44, 12.0 }
 0x141   : > { %v771_v56 = vadd.f32 %v770_v8, %v769_v17  ;;  %v794_v8 = vmul.f32 %v793_v15, %v792_v52  ;;  %v871_v41 = vmax.f32 %v3496_v44, 13.0  ;;  %v832_v59 = vmin.f32 %v831_v28, 9.0 }
 0x142   : > { %v840_v15 = vmin.f32 %v839_v9, 10.0  ;;  %v848_v60 = vmin.f32 %v847_v13, 11.0  ;;  %v802_v35 = vmul.f32 %v801_v16, %v800_v7  ;;  %v856_v21 = vmin.f32 %v855_v0, 12.0 }
 0x143   : > { %v779_v23 = vadd.f32 %v778_v58, %v771_v56  ;;  %v810_v55 = vmul.f32 %v809_v10, %v808_v20  ;;  %v818_v16 = vmul.f32 %v817_v18, %v816_v24  ;;  %v826_v25 = vmul.f32 %v825_v3, %v824_v39 }
 0x144   : > { %v864_v11 = vmin.f32 %v863_v6, 13.0  ;;  %v872_v14 = vmin.f32 %v871_v41, 14.0  ;;  %v834_v40 = vmul.f32 %v833_v37, %v832_v59  ;;  %v3574_v2 = vmul.f32 %v841_v1, %v840_v15 }
 0x145   : > { %v787_v32 = vadd.f32 %v786_v27, %v779_v23  ;;  %v3578_v10 = vmul.f32 %v849_v31, %v848_v60  ;;  %v879_v18 = vmax.f32 %v3496_v44, 14.0  ;;  %v3585_v48 = vmul.f32 %v857_v46, %v856_v21 }
 0x146   : > { %v894_v30 = vmax.f32 %v3565_v47, 0.0  ;;  %v903_v37 = vmax.f32 %v3565_v47, 1.0  ;;  %v911_v1 = vmax.f32 %v3565_v47, 2.0  ;;  %v919_v44 = vmax.f32 %v3565_v47, 3.0 }
 0x147   : > { %v795_v45 = vadd.f32 %v794_v8, %v787_v32  ;;  %v927_v31 = vmax.f32 %v3565_v47, 4.0  ;;  %v935_v46 = vmax.f32 %v3565_v47, 5.0  ;;  %v3600_v50 = vmul.f32 %v865_v51, %v864_v11 }
 0x148   : > { %v895_v26 = vmin.f32 %v894_v30, 1.0  ;;  %v904_v53 = vmin.f32 %v903_v37, 2.0  ;;  %v3607_v22 = vmul.f32 %v873_v29, %v872_v14  ;;  %v880_v42 = vmin.f32 %v879_v18, 15.0 }
 0x149   : > { %v803_v3 = vadd.f32 %v802_v35, %v795_v45  ;;  %v881_v17 = vstv %s3535_s16  ;;  %v912_v58 = vmin.f32 %v911_v1, 3.0  ;;  %v920_v4 = vmin.f32 %v919_v44, 4.0  ;;  %s3621_s16 = sld [smem:[#allocation4 + %s1005_s2]] }
 0x14a   : > { %v897_v52 = vmul.f32 %v896_v36, %v895_v26  ;;  %v906_v61 = vmul.f32 %v905_v62, %v904_v53  ;;  %v928_v7 = vmin.f32 %v927_v31, 5.0  ;;  %v936_v20 = vmin.f32 %v935_v46, 6.0 }
 0x14b   : > { %v811_v19 = vadd.f32 %v810_v55, %v803_v3  ;;  %v943_v29 = vmax.f32 %v3565_v47, 6.0  ;;  %v961_v56 = vstv %s3548_s13  ;;  %v914_v62 = vmul.f32 %v913_v12, %v912_v58  ;;  %s1052_s13 = sadd.s32 79, %s2707_s6 }
 0x14c   : > { %v899_v36 = vadd.f32 %v898_v34, %v897_v52  ;;  %v951_v28 = vmax.f32 %v3565_v47, 7.0  ;;  %v959_v9 = vmax.f32 %v3565_v47, 8.0  ;;  %v967_v24 = vmax.f32 %v3565_v47, 9.0  ;;  %s1053_s11 = sadd.s32 %s2711_s8, %s1052_s13  ;;  %s3722_s13 = sld [smem:[#allocation4 + %s1093_s15]] }
 0x14d   : > { %v819_v51 = vadd.f32 %v818_v16, %v811_v19  ;;  %v975_v39 = vmax.f32 %v3565_v47, 10.0  ;;  %v983_v13 = vmax.f32 %v3565_v47, 11.0  ;;  %v922_v12 = vmul.f32 %v921_v38, %v920_v4 }
 0x14e   : > { %v907_v0 = vadd.f32 %v906_v61, %v899_v36  ;;  %v991_v23 = vmax.f32 %v3565_v47, 12.0  ;;  %v944_v8 = vmin.f32 %v943_v29, 7.0  ;;  %v952_v6 = vmin.f32 %v951_v28, 8.0 }
 0x14f   : > { %v827_v27 = vadd.f32 %v826_v25, %v819_v51  ;;  %v960_v41 = vmin.f32 %v959_v9, 9.0  ;;  %v969_v59 = vstv %s3567_s5  ;;  %v930_v38 = vmul.f32 %v929_v5, %v928_v7  ;;  %s3654_s5 = sld [smem:[#allocation4 + %s1037_s25]] }
 0x150   : > { %v915_v15 = vadd.f32 %v914_v62, %v907_v0  ;;  %v968_v60 = vmin.f32 %v967_v24, 10.0  ;;  %v976_v32 = vmin.f32 %v975_v39, 11.0  ;;  %v977_v21 = vstv %s3589_s23  ;;  %s3670_s23 = sld [smem:[#allocation4 + %s1053_s11]] }
 0x151   : > { %v835_v34 = vadd.f32 %v834_v40, %v827_v27  ;;  %v984_v55 = vmin.f32 %v983_v13, 12.0  ;;  %v992_v16 = vmin.f32 %v991_v23, 13.0  ;;  %v938_v5 = vmul.f32 %v937_v63, %v936_v20  ;;  %s3727_s25 = sld [smem:[#allocation4 + %s1101_s27]]  ;;  %s1215_s27 = sadd.s32 %s2711_s8, %s1214_s24 }
 0x152   : > { %v923_v25 = vadd.f32 %v922_v12, %v915_v15  ;;  %v985_v45 = vstv %s3596_s26  ;;  %v993_v11 = vstv %s3602_s4  ;;  %v3664_v14 = vmul.f32 %v881_v17, %v880_v42  ;;  %s1076_s26 = sadd.s32 82, %s2707_s6  ;;  %s3694_s4 = sld [smem:[#allocation4 + %s1061_s20]] }
 0x153   : > { %v843_v35 = vadd.f32 %v3574_v2, %v835_v34  ;;  %v946_v40 = vmul.f32 %v945_v54, %v944_v8  ;;  %v954_v2 = vmul.f32 %v953_v43, %v952_v6  ;;  %v962_v18 = vmul.f32 %v961_v56, %v960_v41  ;;  %s1077_s2 = sadd.s32 %s2711_s8, %s1076_s26  ;;  %s1189_s26 = sadd.s32 90, %s2707_s6 }
 0x154   : > { %v931_v3 = vadd.f32 %v930_v38, %v923_v25  ;;  %v970_v63 = vmul.f32 %v969_v59, %v968_v60  ;;  %v3672_v30 = vmul.f32 %v977_v21, %v976_v32  ;;  %v3675_v37 = vmul.f32 15.0, %v3554_v49  ;;  %s3706_s22 = sld [smem:[#allocation4 + %s1077_s2]]  ;;  %s1190_s1 = sadd.s32 %s2711_s8, %s1189_s26 }
 0x155   : > { %v851_v54 = vadd.f32 %v3578_v10, %v843_v35  ;;  %v3680_v1 = vmul.f32 %v985_v45, %v984_v55  ;;  %v3682_v43 = vmul.f32 %v993_v11, %v992_v16  ;;  %v999_v44 = vmax.f32 %v3565_v47, 13.0  ;;  %s3776_s3 = sld [smem:[#allocation4 + %s1190_s1]]  ;;  %s1270_s1 = sadd.s32 100, %s2707_s6 }
 0x156   : > { %v939_v31 = vadd.f32 %v938_v5, %v931_v3  ;;  %v1001_v46 = vstv %s3610_s19  ;;  %v1007_v19 = vmax.f32 %v3565_v47, 14.0  ;;  %v1022_v26 = vmax.f32 %v3675_v37, 0.0  ;;  %s3699_s19 = sld [smem:[#allocation4 + %s1069_s30]]  ;;  %s1198_s30 = sadd.s32 91, %s2707_s6 }
 0x157   : > { %v1024_v53 = vstv %s3644_s9  ;;  %v1026_v10 = vstv %s3640_s12  ;;  %v1031_v42 = vmax.f32 %v3675_v37, 1.0  ;;  %v1039_v17 = vmax.f32 %v3675_v37, 2.0  ;;  %s1116_s12 = sadd.s32 87, %s2707_s6  ;;  %s1199_s2 = sadd.s32 %s2711_s8, %s1198_s30 }
 0x158   : > { %v947_v58 = vadd.f32 %v946_v40, %v939_v31  ;;  %v1023_v51 = vmin.f32 %v1022_v26, 1.0  ;;  %v1033_v47 = vstv %s3649_s0  ;;  %v1047_v52 = vmax.f32 %v3675_v37, 3.0  ;;  %s1117_s0 = sadd.s32 %s2711_s8, %s1116_s12  ;;  %s3779_s29 = sld [smem:[#allocation4 + %s1199_s2]] }
 0x159   : > { %v1032_v61 = vmin.f32 %v1031_v42, 2.0  ;;  %v1040_v4 = vmin.f32 %v1039_v17, 3.0  ;;  %v1041_v7 = vstv %s3654_s5  ;;  %v1055_v20 = vmax.f32 %v3675_v37, 4.0  ;;  %s1132_s5 = sadd.s32 89, %s2707_s6  ;;  %s1271_s24 = sadd.s32 %s2711_s8, %s1270_s1 }
 0x15a   : > { %v859_v29 = vadd.f32 %v3585_v48, %v851_v54  ;;  %v955_v56 = vadd.f32 %v954_v2, %v947_v58  ;;  %v1025_v27 = vmul.f32 %v1024_v53, %v1023_v51  ;;  %v1048_v36 = vmin.f32 %v1047_v52, 4.0  ;;  %s1133_s14 = sadd.s32 %s2711_s8, %s1132_s5 }
 0x15b   : > { %v1009_v62 = vstv %s3621_s16  ;;  %v1034_v28 = vmul.f32 %v1033_v47, %v1032_v61  ;;  %v1049_v9 = vstv %s3661_s7  ;;  %v1056_v24 = vmin.f32 %v1055_v20, 5.0  ;;  %s1108_s16 = sadd.s32 86, %s2707_s6  ;;  %s3744_s7 = sld [smem:[#allocation4 + %s1117_s0]] }
 0x15c   : > { %v963_v39 = vadd.f32 %v962_v18, %v955_v56  ;;  %v1027_v13 = vadd.f32 %v1026_v10, %v1025_v27  ;;  %v1042_v34 = vmul.f32 %v1041_v7, %v1040_v4  ;;  %v1057_v0 = vstv %s3670_s23  ;;  %s1109_s9 = sadd.s32 %s2711_s8, %s1108_s16  ;;  %s1126_s23 = sld [smem:[#allocation4 + %s1125_s18]] }
 0x15d   : > { %v1000_v48 = vmin.f32 %v999_v44, 14.0  ;;  %v1008_v12 = vmin.f32 %v1007_v19, 15.0  ;;  %v1063_v23 = vmax.f32 %v3675_v37, 5.0  ;;  %v1071_v8 = vmax.f32 %v3675_v37, 6.0  ;;  %s3738_s11 = sld [smem:[#allocation4 + %s1109_s9]]  ;;  %s1238_s9 = sadd.s32 96, %s2707_s6 }
 0x15e   : > { %v867_v6 = vadd.f32 %v3600_v50, %v859_v29  ;;  %v971_v41 = vadd.f32 %v970_v63, %v963_v39  ;;  %v1035_v59 = vadd.f32 %v1034_v28, %v1027_v13  ;;  %v1050_v15 = vmul.f32 %v1049_v9, %v1048_v36  ;;  %s1134_s20 = sld [smem:[#allocation4 + %s1133_s14]]  ;;  %s1239_s5 = sadd.s32 %s2711_s8, %s1238_s9 }
 0x15f   : > { %v1058_v38 = vmul.f32 %v1057_v0, %v1056_v24  ;;  %v1064_v60 = vmin.f32 %v1063_v23, 6.0  ;;  %v1065_v32 = vstv %s3694_s4  ;;  %v1079_v35 = vmax.f32 %v3675_v37, 7.0  ;;  %s1206_s4 = sadd.s32 92, %s2707_s6 }
 0x160   : > { %v979_v21 = vadd.f32 %v3672_v30, %v971_v41  ;;  %v1043_v55 = vadd.f32 %v1042_v34, %v1035_v59  ;;  %v1072_v16 = vmin.f32 %v1071_v8, 7.0  ;;  %v1087_v50 = vmax.f32 %v3675_v37, 8.0 }
 0x161   : > { %v1002_v25 = vmul.f32 %v1001_v46, %v1000_v48  ;;  %v1010_v5 = vmul.f32 %v1009_v62, %v1008_v12  ;;  %v1073_v45 = vstv %s3699_s19  ;;  %v1080_v11 = vmin.f32 %v1079_v35, 8.0  ;;  %s1187_s19 = sadd.s32 6, %s2716_s10 }
 0x162   : > { %v987_v40 = vadd.f32 %v3680_v1, %v979_v21  ;;  %v1051_v2 = vadd.f32 %v1050_v15, %v1043_v55  ;;  %v1066_v18 = vmul.f32 %v1065_v32, %v1064_v60  ;;  %v1081_v3 = vstv %s3706_s22  ;;  %s1207_s22 = sadd.s32 %s2711_s8, %s1206_s4  ;;  %s3782_s15 = sld [smem:[#allocation3 + %s1187_s19]] }
 0x163   : > { %v875_v63 = vadd.f32 %v3607_v22, %v867_v6  ;;  %v1088_v30 = vmin.f32 %v1087_v50, 9.0  ;;  %v1095_v54 = vmax.f32 %v3675_v37, 9.0  ;;  %v1103_v44 = vmax.f32 %v3675_v37, 10.0  ;;  %s3785_s16 = sld [smem:[#allocation4 + %s1207_s22]]  ;;  %s1278_s19 = sadd.s32 101, %s2707_s6 }
 0x164   : > { %v995_v31 = vadd.f32 %v3682_v43, %v987_v40  ;;  %v1059_v46 = vadd.f32 %v1058_v38, %v1051_v2  ;;  %v1074_v1 = vmul.f32 %v1073_v45, %v1072_v16  ;;  %v1089_v19 = vstv %s3712_s28  ;;  %s1222_s28 = sadd.s32 94, %s2707_s6  ;;  %s1286_s22 = sadd.s32 102, %s2707_s6 }
 0x165   : > { %v1082_v26 = vmul.f32 %v1081_v3, %v1080_v11  ;;  %v1096_v10 = vmin.f32 %v1095_v54, 10.0  ;;  %v1111_v42 = vmax.f32 %v3675_v37, 11.0  ;;  %v883_v17 = vadd.f32 %v3664_v14, %v875_v63  ;;  %s1223_s12 = sadd.s32 %s2711_s8, %s1222_s28  ;;  %s3839_s28 = sld [smem:[#allocation4 + %s1271_s24]] }
 0x166   : > { %v1003_v22 = vadd.f32 %v1002_v25, %v995_v31  ;;  %v1067_v53 = vadd.f32 %v1066_v18, %v1059_v46  ;;  %v1090_v58 = vmul.f32 %v1089_v19, %v1088_v30  ;;  %v1097_v51 = vstv %s3722_s13  ;;  %s1230_s13 = sadd.s32 95, %s2707_s6  ;;  %s3798_s0 = sld [smem:[#allocation4 + %s1223_s12]] }
 0x167   : > { %v1104_v43 = vmin.f32 %v1103_v44, 11.0  ;;  %v1105_v61 = vstv %s3727_s25  ;;  %v1119_v4 = vmax.f32 %v3675_v37, 12.0  ;;  %v1098_v20 = vmul.f32 %v1097_v51, %v1096_v10  ;;  %s3791_s25 = sld [smem:[#allocation4 + %s1215_s27]]  ;;  %s1231_s21 = sadd.s32 %s2711_s8, %s1230_s13 }
 0x168   : > { %v1011_v47 = vadd.f32 %v1010_v5, %v1003_v22  ;;  %v1075_v52 = vadd.f32 %v1074_v1, %v1067_v53  ;;  %v1112_v29 = vmin.f32 %v1111_v42, 12.0  ;;  %v1127_v56 = vmax.f32 %v3675_v37, 13.0  ;;  %s3808_s18 = sld [smem:[#allocation4 + %s1231_s21]]  ;;  %s1287_s27 = sadd.s32 %s2711_s8, %s1286_s22 }
 0x169   : > { %v884_v27 = vmul.f32 %v883_v17, %v3485_v57  ;;  %v1106_v14 = vmul.f32 %v1105_v61, %v1104_v43  ;;  %v1113_v36 = vstv %s3738_s11  ;;  %v1120_v9 = vmin.f32 %v1119_v4, 13.0  ;;  %s1246_s11 = sadd.s32 97, %s2707_s6  ;;  %s1302_s13 = sadd.s32 104, %s2707_s6 }
 0x16a   : > { %v1083_v7 = vadd.f32 %v1082_v26, %v1075_v52  ;;  %v1012_v62 = vmul.f32 %v1011_v47, %v3541_v33  ;;  %v1135_v24 = vmax.f32 %v3675_v37, 14.0  ;;  %v1121_v39 = vstv %s3744_s7  ;;  %v2441_v37 = vld [vmem:[%s3184_s17] sm:$0x3]  ;;  %s1254_s7 = sadd.s32 98, %s2707_s6  ;;  %s1247_s14 = sadd.s32 %s2711_s8, %s1246_s11 }
 0x16b   : > { %v1114_v34 = vmul.f32 %v1113_v36, %v1112_v29  ;;  %v1128_v0 = vmin.f32 %v1127_v56, 14.0  ;;  %v885_v48 = vmax.f32 %v884_v27, 0.0  ;;  %v1129_v12 = vstv %s1126_s23  ;;  %s3815_s23 = sld [smem:[#allocation4 + %s1239_s5]]  ;;  %s1255_s26 = sadd.s32 %s2711_s8, %s1254_s7 }
 0x16c   : > { %v1091_v28 = vadd.f32 %v1090_v58, %v1083_v7  ;;  %v1013_v23 = vmax.f32 %v1012_v62, 0.0  ;;  %v1122_v6 = vmul.f32 %v1121_v39, %v1120_v9  ;;  %v1136_v41 = vmin.f32 %v1135_v24, 15.0  ;;  %s3821_s30 = sld [smem:[#allocation4 + %s1247_s14]]  ;;  %s1303_s9 = sadd.s32 %s2711_s8, %s1302_s13 }
 0x16d   : > { %v1137_v57 = vstv %s1134_s20  ;;  %v1130_v15 = vmul.f32 %v1129_v12, %v1128_v0  ;;  %v886_v38 = vmin.f32 %v885_v48, 1.0  ;;  %v2498_v19 = vmov 0.0   ;;  %s1262_s20 = sadd.s32 99, %s2707_s6  ;;  %s3827_s2 = sld [smem:[#allocation4 + %s1255_s26]] }
 0x16e   : > { %v1099_v13 = vadd.f32 %v1098_v20, %v1091_v28  ;;  %v1014_v33 = vmin.f32 %v1013_v23, 1.0  ;;  %v1138_v32 = vmul.f32 %v1137_v57, %v1136_v41  ;;  %v1194_v24 = vstv %s3776_s3  ;;  %s1263_s4 = sadd.s32 %s2711_s8, %s1262_s20  ;;  %s3861_s11 = sld [smem:[#allocation4 + %s1303_s9]] }
 0x16f   : > { %v887_v21 = vmul.f32 %v2441_v37, %v886_v38  ;;  %v1203_v39 = vstv %s3779_s29  ;;  %v1196_v12 = vstv %s3782_s15  ;;  %v1211_v23 = vstv %s3785_s16  ;;  %s3833_s3 = sld [smem:[#allocation4 + %s1263_s4]]  ;;  %s1279_s29 = sadd.s32 %s2711_s8, %s1278_s19 }
 0x170   : > { %v1107_v8 = vadd.f32 %v1106_v14, %v1099_v13  ;;  %v1015_v55 = vmul.f32 %v2441_v37, %v1014_v33  ;;  %s1294_s15 = sadd.s32 103, %s2707_s6  ;;  %s3845_s16 = sld [smem:[#allocation4 + %s1279_s29]] }
 0x171   : > { %v1144_v5 = vmax.f32 %v887_v21, 1e-09  ;;  %s1295_s12 = sadd.s32 %s2711_s8, %s1294_s15  ;;  %s1323_s7 = sadd.s32 106, %s2707_s6 }
 0x172   : > { %v1115_v59 = vadd.f32 %v1114_v34, %v1107_v8  ;;  %v1145_v45 = vmax.f32 %v1015_v55, 1e-09  ;;  %s3856_s21 = sld [smem:[#allocation4 + %s1295_s12]]  ;;  %s1331_s14 = sadd.s32 107, %s2707_s6 }
 0x173   : > { %s1339_s20 = sadd.s32 108, %s2707_s6  ;;  %s1332_s1 = sadd.s32 %s2711_s8, %s1331_s14 }
 0x174   : > { %v1123_v60 = vadd.f32 %v1122_v6, %v1115_v59  ;;  %v1147_v2 = vmax.f32 %v1144_v5, %v1145_v45  ;;  %v1149_v18 = vmin.f32 %v1144_v5, %v1145_v45  ;;  %v1169_v46 = vsub.f32 %v1144_v5, %v1145_v45  ;;  %s1347_s4 = sadd.s32 109, %s2707_s6  ;;  %s1355_s19 = sadd.s32 110, %s2707_s6 }
 0x175   : > { %v1219_v59 = vstv %s3791_s25  ;;  %s3851_s25 = sld [smem:[#allocation4 + %s1287_s27]]  ;;  %s1348_s29 = sadd.s32 %s2711_s8, %s1347_s4 }
 0x176   : > { %v1131_v35 = vadd.f32 %v1130_v15, %v1123_v60  ;;  %s3886_s22 = sld [smem:[#allocation4 + %s1332_s1]]  ;;  %s1356_s15 = sadd.s32 %s2711_s8, %s1355_s19 }
 0x177   : > { %s3894_s13 = sld [smem:[#allocation4 + %s1348_s29]]  ;;  %s1379_s12 = sadd.s32 113, %s2707_s6 }
 0x178   : > { %v1139_v16 = vadd.f32 %v1138_v32, %v1131_v35  ;;  %v1227_v32 = vstv %s3798_s0  ;;  %s1314_s0 = sadd.s32 105, %s2707_s6  ;;  %s1387_s9 = sadd.s32 114, %s2707_s6 }
 0x179   : > { %s1315_s5 = sadd.s32 %s2711_s8, %s1314_s0 }
 0x17a   : > { %v1140_v50 = vmul.f32 %v1139_v16, %v3554_v49  ;;  %v1235_v16 = vstv %s3808_s18  ;;  %s1312_s18 = sadd.s32 7, %s2716_s10 }
 0x17b   : > { %s3875_s26 = sld [smem:[#allocation3 + %s1312_s18]]  ;;  %s1388_s18 = sadd.s32 %s2711_s8, %s1387_s9 }
 0x17c   : > { %v1141_v25 = vmax.f32 %v1140_v50, 0.0  ;;  %s3920_s4 = sld [smem:[#allocation4 + %s1388_s18]]  ;;  %s4269_s9 = sadd.s32 9, %s2707_s6 }
 0x17e   : > { %v1142_v11 = vmin.f32 %v1141_v25, 1.0 }
 0x180   : > { %v1143_v40 = vmul.f32 %v2441_v37, %v1142_v11  ;;  %v1243_v11 = vstv %s3815_s23  ;;  %s3871_s23 = sld [smem:[#allocation4 + %s1315_s5]]  ;;  %s1395_s5 = sadd.s32 115, %s2707_s6 }
 0x181   : > { %s1396_s1 = sadd.s32 %s2711_s8, %s1395_s5  ;;  %s4270_s5 = sadd.s32 10, %s2707_s6 }
 0x182   : > { %v1146_v3 = vmax.f32 %v1143_v40, 1e-09  ;;  %s3933_s29 = sld [smem:[#allocation4 + %s1396_s1]]  ;;  %s4272_s1 = sadd.s32 12, %s2707_s6 }
 0x184   : > { %v3760_v63 = vmax.f32 %v1147_v2, %v1146_v3  ;;  %v1150_v30 = vmin.f32 %v1149_v18, %v1146_v3  ;;  %v1155_v31 = vsub.f32 %v1145_v45, %v1146_v3  ;;  %v1161_v49 = vsub.f32 %v1146_v3, %v1144_v5 }
 0x186   : > { %v1151_v54 = vsub.f32 %v3760_v63, %v1150_v30  ;;  %vm1157_vm7 = vcmp.eq.f32.partialorder %v1144_v5, %v3760_v63  ;;  %vm1164_vm8 = vcmp.eq.f32.partialorder %v1145_v45, %v3760_v63  ;;  %vm1172_vm9 = vcmp.eq.f32.partialorder %v1146_v3, %v3760_v63 }
 0x187   : > { %v1864_v26 = vsel %vm1157_vm7, 1.0, %v2498_v19  ;;  %v1865_v42 = vsel %vm1164_vm8, 1.0, %v2498_v19  ;;  %v1866_v17 = vsel %vm1172_vm9, 1.0, %v2498_v19  ;;  %v1251_v30 = vstv %s3821_s30  ;;  %s1324_s30 = sadd.s32 %s2711_s8, %s1323_s7  ;;  %s1403_s7 = sadd.s32 116, %s2707_s6 }
 0x188   : > { %v3763_v44 = vadd.f32 1e-10, %v1151_v54  ;;  %s3883_s24 = sld [smem:[#allocation4 + %s1324_s30]] }
 0x18a   : > { %2437 = vrcp.f32 %v3763_v44 }
 0x18b   : > { %2439 = vrcp.f32 %v3760_v63 }
 0x190   : > { %v2438_v1 = vpop.eup %2437 }
 0x191   : > { %v1156_v22 = vmul.f32 %v2438_v1, %v1155_v31  ;;  %v1162_v53 = vmul.f32 %v2438_v1, %v1161_v49  ;;  %v1170_v10 = vmul.f32 %v2438_v1, %v1169_v46  ;;  %v1259_v1 = vstv %s3827_s2  ;;  %s1340_s2 = sadd.s32 %s2711_s8, %s1339_s20  ;;  %s1411_s20 = sadd.s32 117, %s2707_s6 }
 0x192   : > { %s1412_s19 = sadd.s32 %s2711_s8, %s1411_s20  ;;  %s1427_s20 = sadd.s32 119, %s2707_s6 }
 0x193   : > { %v1160_v58 = vmul.f32 %v1864_v26, %v1156_v22  ;;  %v1163_v51 = vadd.f32 2.0, %v1162_v53  ;;  %v1171_v43 = vadd.f32 4.0, %v1170_v10  ;;  %v1267_v10 = vstv %s3833_s3  ;;  %s1363_s3 = sadd.s32 111, %s2707_s6 }
 0x194   : > { %s1364_s27 = sadd.s32 %s2711_s8, %s1363_s3  ;;  %s3929_s3 = sadd.s32 256, %s2711_s8 }
 0x195   : > { %v1167_v47 = vmul.f32 %v1865_v42, %v1163_v51  ;;  %v1175_v52 = vmul.f32 %v1866_v17, %v1171_v43  ;;  %v1275_v43 = vstv %s3839_s28  ;;  %s3889_s28 = sld [smem:[#allocation4 + %s1340_s2]]  ;;  %s1404_s2 = sadd.s32 %s2711_s8, %s1403_s7 }
 0x196   : > { %s1581_s18 = sadd.s32 %s3929_s3, %s4270_s5  ;;  %s1419_s7 = sadd.s32 118, %s2707_s6 }
 0x197   : > { %v1168_v61 = vadd.f32 %v1167_v47, %v1160_v58  ;;  %s1456_s5 = sadd.s32 122, %s2707_s6 }
 0x199   : > { %v1176_v4 = vadd.f32 %v1175_v52, %v1168_v61 }
 0x19b   : > { %v1177_v7 = vmul.f32 0.16666667, %v1176_v4 }
 0x19d   : > { %vm1178_vm10 = vcmp.lt.f32.partialorder %v1177_v7, 0.0  ;;  %v1179_v20 = vadd.f32 1.0, %v1177_v7 }
 0x19f   : > { %v1180_v29 = vsel %vm1178_vm10, %v1179_v20, %v1177_v7  ;;  %v1283_v7 = vstv %s3845_s16  ;;  %s1371_s16 = sadd.s32 112, %s2707_s6 }
 0x1a0   : > { %v1182_v56 = vmax.f32 %v1180_v29, 0.0  ;;  %s1372_s0 = sadd.s32 %s2711_s8, %s1371_s16  ;;  %s1557_s16 = sadd.s32 9, %s2716_s10 }
 0x1a1   : > { %s3911_s14 = sld [smem:[#allocation4 + %s1372_s0]]  ;;  %s1574_s0 = sadd.s32 %s3929_s3, %s4269_s9 }
 0x1a2   : > { %v3788_v27 = vmin.f32 %v1182_v56, 1.0  ;;  %s4274_s9 = sadd.s32 14, %s2707_s6 }
 0x1a4   : > { %v3795_v14 = vmul.f32 15.0, %v3788_v27 }
 0x1a6   : > { %v1192_v36 = vmax.f32 %v3795_v14, 0.0  ;;  %v1201_v62 = vmax.f32 %v3795_v14, 1.0  ;;  %v1209_v28 = vmax.f32 %v3795_v14, 2.0  ;;  %v1217_v9 = vmax.f32 %v3795_v14, 3.0 }
 0x1a7   : > { %v1225_v48 = vmax.f32 %v3795_v14, 4.0  ;;  %v1233_v57 = vmax.f32 %v3795_v14, 5.0  ;;  %v1241_v60 = vmax.f32 %v3795_v14, 6.0  ;;  %v1249_v55 = vmax.f32 %v3795_v14, 7.0 }
 0x1a8   : > { %v1193_v13 = vmin.f32 %v1192_v36, 1.0  ;;  %v1202_v34 = vmin.f32 %v1201_v62, 2.0  ;;  %v1210_v0 = vmin.f32 %v1209_v28, 3.0  ;;  %v1218_v41 = vmin.f32 %v1217_v9, 4.0 }
 0x1a9   : > { %v1226_v33 = vmin.f32 %v1225_v48, 5.0  ;;  %v1234_v21 = vmin.f32 %v1233_v57, 6.0  ;;  %v1242_v5 = vmin.f32 %v1241_v60, 7.0  ;;  %v1257_v45 = vmax.f32 %v3795_v14, 8.0 }
 0x1aa   : > { %v1195_v8 = vmul.f32 %v1194_v24, %v1193_v13  ;;  %v1204_v6 = vmul.f32 %v1203_v39, %v1202_v34  ;;  %v1212_v38 = vmul.f32 %v1211_v23, %v1210_v0  ;;  %v1220_v37 = vmul.f32 %v1219_v59, %v1218_v41 }
 0x1ab   : > { %v1228_v25 = vmul.f32 %v1227_v32, %v1226_v33  ;;  %v1236_v2 = vmul.f32 %v1235_v16, %v1234_v21  ;;  %v1250_v18 = vmin.f32 %v1249_v55, 8.0  ;;  %v1265_v3 = vmax.f32 %v3795_v14, 9.0  ;;  %v2440_v16 = vpop.eup %2439 }
 0x1ac   : > { %v1197_v15 = vadd.f32 %v1196_v12, %v1195_v8  ;;  %v1244_v31 = vmul.f32 %v1243_v11, %v1242_v5  ;;  %v1258_v49 = vmin.f32 %v1257_v45, 9.0  ;;  %v1273_v46 = vmax.f32 %v3795_v14, 10.0 }
 0x1ad   : > { %v1252_v26 = vmul.f32 %v1251_v30, %v1250_v18  ;;  %v1266_v22 = vmin.f32 %v1265_v3, 10.0  ;;  %v1281_v53 = vmax.f32 %v3795_v14, 11.0  ;;  %v1289_v51 = vmax.f32 %v3795_v14, 12.0 }
 0x1ae   : > { %v1205_v35 = vadd.f32 %v1204_v6, %v1197_v15  ;;  %v1260_v17 = vmul.f32 %v1259_v1, %v1258_v49  ;;  %v1274_v58 = vmin.f32 %v1273_v46, 11.0  ;;  %v1297_v4 = vmax.f32 %v3795_v14, 13.0 }
 0x1af   : > { %v1268_v52 = vmul.f32 %v1267_v10, %v1266_v22  ;;  %v1282_v61 = vmin.f32 %v1281_v53, 12.0  ;;  %v1290_v56 = vmin.f32 %v1289_v51, 13.0  ;;  %v1305_v36 = vmax.f32 %v3795_v14, 14.0 }
 0x1b0   : > { %v1213_v50 = vadd.f32 %v1212_v38, %v1205_v35  ;;  %v1276_v29 = vmul.f32 %v1275_v43, %v1274_v58  ;;  %v1291_v62 = vstv %s3851_s25  ;;  %v1298_v24 = vmin.f32 %v1297_v4, 14.0  ;;  %s3897_s25 = sld [smem:[#allocation4 + %s1356_s15]] }
 0x1b1   : > { %v1284_v9 = vmul.f32 %v1283_v7, %v1282_v61  ;;  %v1299_v39 = vstv %s3856_s21  ;;  %v1292_v13 = vmul.f32 %v1291_v62, %v1290_v56  ;;  %v1306_v34 = vmin.f32 %v1305_v36, 15.0  ;;  %s3900_s21 = sld [smem:[#allocation4 + %s1364_s27]] }
 0x1b2   : > { %v1221_v40 = vadd.f32 %v1220_v37, %v1213_v50  ;;  %v1307_v0 = vstv %s3861_s11  ;;  %v1300_v12 = vmul.f32 %v1299_v39, %v1298_v24  ;;  %s1380_s11 = sadd.s32 %s2711_s8, %s1379_s12  ;;  %v1319_v60 = vstv %s3871_s23  ;;  %s3936_s15 = sld [smem:[#allocation4 + %s1404_s2]] }
 0x1b3   : > { %v1308_v8 = vmul.f32 %v1307_v0, %v1306_v34  ;;  %s3917_s30 = sld [smem:[#allocation4 + %s1380_s11]]  ;;  %v1328_v32 = vstv %s3883_s24  ;;  %v1321_v50 = vstv %s3875_s26  ;;  %s4267_s24 = sadd.s32 7, %s2707_s6  ;;  %v1344_v3 = vstv %s3889_s28 }
 0x1b4   : > { %v1229_v54 = vadd.f32 %v1228_v25, %v1221_v40  ;;  %v1336_v25 = vstv %s3886_s22  ;;  %s3942_s23 = sld [smem:[#allocation4 + %s1412_s19]]  ;;  %s1559_s27 = sadd.s32 %s3929_s3, %s4267_s24  ;;  %v3954_v30 = vmul.f32 %v2440_v16, %v3763_v44  ;;  %v1352_v46 = vstv %s3894_s13 }
 0x1b5   : > { %s4268_s26 = sadd.s32 8, %s2707_s6  ;;  %s3956_s12 = sld [smem:[#allocation4 + %s1559_s27]]  ;;  %v1392_v51 = vstv %s3920_s4 }
 0x1b6   : > { %v1237_v19 = vadd.f32 %v1236_v2, %v1229_v54  ;;  %s1567_s22 = sadd.s32 %s3929_s3, %s4268_s26  ;;  %s3966_s11 = sld [smem:[#allocation3 + %s1557_s16]] }
 0x1b7   : > { %s3964_s28 = sld [smem:[#allocation4 + %s1567_s22]]  ;;  %s1595_s4 = sadd.s32 %s3929_s3, %s4272_s1 }
 0x1b8   : > { %v1245_v42 = vadd.f32 %v1244_v31, %v1237_v19  ;;  %v1360_v19 = vstv %s3897_s25  ;;  %s3975_s13 = sld [smem:[#allocation4 + %s1574_s0]]  ;;  %v1408_v61 = vstv %s3936_s15  ;;  %s4271_s25 = sadd.s32 11, %s2707_s6 }
 0x1b9   : > { %v1384_v58 = vstv %s3917_s30  ;;  %s1420_s2 = sadd.s32 %s2711_s8, %s1419_s7  ;;  %s1428_s19 = sadd.s32 %s2711_s8, %s1427_s20 }
 0x1ba   : > { %v1253_v47 = vadd.f32 %v1252_v26, %v1245_v42  ;;  %v1368_v26 = vstv %s3900_s21  ;;  %v1376_v42 = vstv %s3911_s14  ;;  %s1588_s21 = sadd.s32 %s3929_s3, %s4271_s25  ;;  %s3986_s14 = sld [smem:[#allocation4 + %s1581_s18]] }
 0x1bb   : > { %s3995_s30 = sld [smem:[#allocation4 + %s1588_s21]]  ;;  %s4273_s27 = sadd.s32 13, %s2707_s6 }
 0x1bc   : > { %v1261_v20 = vadd.f32 %v1260_v17, %v1253_v47  ;;  %s4009_s24 = sld [smem:[#allocation4 + %s1420_s2]]  ;;  %s1602_s26 = sadd.s32 %s3929_s3, %s4273_s27 }
 0x1bd   : > { %s4017_s22 = sld [smem:[#allocation4 + %s1428_s19]]  ;;  %s1439_s16 = sadd.s32 120, %s2707_s6 }
 0x1be   : > { %v1269_v28 = vadd.f32 %v1268_v52, %v1261_v20  ;;  %v1400_v52 = vstv %s3933_s29  ;;  %s4007_s29 = sld [smem:[#allocation4 + %s1595_s4]]  ;;  %s1609_s0 = sadd.s32 %s3929_s3, %s4274_s9 }
 0x1bf   : > { %s4037_s18 = sld [smem:[#allocation4 + %s1609_s0]]  ;;  %s1437_s25 = sadd.s32 8, %s2716_s10 }
 0x1c0   : > { %v1277_v14 = vadd.f32 %v1276_v29, %v1269_v28  ;;  %v1416_v29 = vstv %s3942_s23  ;;  %v3990_v28 = vmul.f32 15.0, %v3760_v63  ;;  %s1464_s20 = sadd.s32 123, %s2707_s6  ;;  %s4056_s23 = sld [smem:[#allocation3 + %s1437_s25]] }
 0x1c1   : > { %s1465_s19 = sadd.s32 %s2711_s8, %s1464_s20  ;;  %s4277_s27 = sadd.s32 17, %s2707_s6 }
 0x1c2   : > { %v1285_v48 = vadd.f32 %v1284_v9, %v1277_v14  ;;  %v1561_v34 = vmax.f32 %v3990_v28, 0.0  ;;  %v1569_v0 = vmax.f32 %v3990_v28, 1.0  ;;  %s4278_s9 = sadd.s32 18, %s2707_s6 }
 0x1c3   : > { %s1637_s0 = sadd.s32 %s3929_s3, %s4278_s9 }
 0x1c4   : > { %v1293_v23 = vadd.f32 %v1292_v13, %v1285_v48  ;;  %v1576_v48 = vmax.f32 %v3990_v28, 2.0 }
 0x1c6   : > { %v1301_v6 = vadd.f32 %v1300_v12, %v1293_v23 }
 0x1c8   : > { %v1309_v41 = vadd.f32 %v1308_v8, %v1301_v6  ;;  %v1563_v8 = vstv %s3956_s12  ;;  %v1571_v6 = vstv %s3964_s28  ;;  %s4023_s12 = sld [smem:[#allocation4 + %s1602_s26]]  ;;  %s1440_s28 = sadd.s32 %s2711_s8, %s1439_s16 }
 0x1c9   : > { %s4045_s21 = sld [smem:[#allocation4 + %s1440_s28]]  ;;  %s1630_s26 = sadd.s32 %s3929_s3, %s4277_s27 }
 0x1ca   : > { %v3906_v57 = vmul.f32 %v1309_v41, %v3788_v27  ;;  %s1480_s16 = sadd.s32 125, %s2707_s6 }
 0x1cc   : > { %v3915_v59 = vmul.f32 15.0, %v3906_v57 }
 0x1ce   : > { %v1317_v27 = vmax.f32 %v3915_v59, 0.0  ;;  %v1326_v15 = vmax.f32 %v3915_v59, 1.0  ;;  %v1334_v38 = vmax.f32 %v3915_v59, 2.0  ;;  %v1342_v33 = vmax.f32 %v3915_v59, 3.0 }
 0x1cf   : > { %v1350_v55 = vmax.f32 %v3915_v59, 4.0  ;;  %v1358_v5 = vmax.f32 %v3915_v59, 5.0  ;;  %v1366_v45 = vmax.f32 %v3915_v59, 6.0  ;;  %v1374_v18 = vmax.f32 %v3915_v59, 7.0 }
 0x1d0   : > { %v1318_v35 = vmin.f32 %v1317_v27, 1.0  ;;  %v1327_v37 = vmin.f32 %v1326_v15, 2.0  ;;  %v1335_v21 = vmin.f32 %v1334_v38, 3.0  ;;  %v1343_v2 = vmin.f32 %v1342_v33, 4.0 }
 0x1d1   : > { %v1351_v49 = vmin.f32 %v1350_v55, 5.0  ;;  %v1359_v1 = vmin.f32 %v1358_v5, 6.0  ;;  %v1367_v53 = vmin.f32 %v1366_v45, 7.0  ;;  %v1375_v10 = vmin.f32 %v1374_v18, 8.0 }
 0x1d2   : > { %v1320_v11 = vmul.f32 %v1319_v60, %v1318_v35  ;;  %v1329_v40 = vmul.f32 %v1328_v32, %v1327_v37  ;;  %v1337_v31 = vmul.f32 %v1336_v25, %v1335_v21  ;;  %v1345_v22 = vmul.f32 %v1344_v3, %v1343_v2 }
 0x1d3   : > { %v1382_v17 = vmax.f32 %v3915_v59, 8.0  ;;  %v1353_v47 = vmul.f32 %v1352_v46, %v1351_v49  ;;  %v1361_v4 = vmul.f32 %v1360_v19, %v1359_v1  ;;  %v1390_v7 = vmax.f32 %v3915_v59, 9.0 }
 0x1d4   : > { %v1322_v54 = vadd.f32 %v1321_v50, %v1320_v11  ;;  %v1398_v20 = vmax.f32 %v3915_v59, 10.0  ;;  %v1369_v36 = vmul.f32 %v1368_v26, %v1367_v53  ;;  %v1377_v62 = vmul.f32 %v1376_v42, %v1375_v10 }
 0x1d5   : > { %v1383_v9 = vmin.f32 %v1382_v17, 9.0  ;;  %v1406_v24 = vmax.f32 %v3915_v59, 11.0  ;;  %v1414_v39 = vmax.f32 %v3915_v59, 12.0  ;;  %v1422_v14 = vmax.f32 %v3915_v59, 13.0 }
 0x1d6   : > { %v1330_v44 = vadd.f32 %v1329_v40, %v1322_v54  ;;  %v1391_v12 = vmin.f32 %v1390_v7, 10.0  ;;  %v1399_v23 = vmin.f32 %v1398_v20, 11.0  ;;  %v1562_v27 = vmin.f32 %v1561_v34, 1.0 }
 0x1d7   : > { %v1570_v15 = vmin.f32 %v1569_v0, 2.0  ;;  %v1577_v38 = vmin.f32 %v1576_v48, 3.0  ;;  %v1407_v33 = vmin.f32 %v1406_v24, 12.0  ;;  %v1565_v60 = vstv %s3966_s11  ;;  %s1448_s11 = sadd.s32 121, %s2707_s6 }
 0x1d8   : > { %v1338_v43 = vadd.f32 %v1337_v31, %v1330_v44  ;;  %v1578_v32 = vstv %s3975_s13  ;;  %v1583_v35 = vmax.f32 %v3990_v28, 3.0  ;;  %v1385_v21 = vmul.f32 %v1384_v58, %v1383_v9  ;;  %s4275_s13 = sadd.s32 15, %s2707_s6  ;;  %s1449_s7 = sadd.s32 %s2711_s8, %s1448_s11 }
 0x1d9   : > { %v1564_v55 = vmul.f32 %v1563_v8, %v1562_v27  ;;  %v1572_v16 = vmul.f32 %v1571_v6, %v1570_v15  ;;  %v1393_v50 = vmul.f32 %v1392_v51, %v1391_v12  ;;  %v1585_v5 = vstv %s3986_s14  ;;  %s1616_s15 = sadd.s32 %s3929_s3, %s4275_s13  ;;  %s1457_s14 = sadd.s32 %s2711_s8, %s1456_s5 }
 0x1da   : > { %v1346_v56 = vadd.f32 %v1345_v22, %v1338_v43  ;;  %v1584_v25 = vmin.f32 %v1583_v35, 4.0  ;;  %v1590_v45 = vmax.f32 %v3990_v28, 4.0  ;;  %v1579_v2 = vmul.f32 %v1578_v32, %v1577_v38  ;;  %s4054_s10 = sld [smem:[#allocation4 + %s1616_s15]]  ;;  %s1481_s5 = sadd.s32 %s2711_s8, %s1480_s16 }
 0x1db   : > { %v1566_v40 = vadd.f32 %v1565_v60, %v1564_v55  ;;  %v1597_v18 = vmax.f32 %v3990_v28, 5.0  ;;  %v1415_v3 = vmin.f32 %v1414_v39, 13.0  ;;  %v1430_v54 = vmax.f32 %v3915_v59, 14.0  ;;  %s4062_s4 = sld [smem:[#allocation4 + %s1449_s7]]  ;;  %s4279_s7 = sadd.s32 19, %s2707_s6 }
 0x1dc   : > { %v1354_v13 = vadd.f32 %v1353_v47, %v1346_v56  ;;  %v1591_v31 = vmin.f32 %v1590_v45, 5.0  ;;  %v1592_v49 = vstv %s3995_s30  ;;  %v1401_v1 = vmul.f32 %v1400_v52, %v1399_v23  ;;  %s4276_s30 = sadd.s32 16, %s2707_s6  ;;  %s4064_s2 = sld [smem:[#allocation4 + %s1457_s14]] }
 0x1dd   : > { %v1573_v19 = vadd.f32 %v1572_v16, %v1566_v40  ;;  %v1586_v26 = vmul.f32 %v1585_v5, %v1584_v25  ;;  %v1409_v44 = vmul.f32 %v1408_v61, %v1407_v33  ;;  %v1423_v22 = vmin.f32 %v1422_v14, 14.0  ;;  %s1623_s1 = sadd.s32 %s3929_s3, %s4276_s30  ;;  %s4085_s11 = sld [smem:[#allocation4 + %s1630_s26]] }
 0x1de   : > { %v1362_v41 = vadd.f32 %v1361_v4, %v1354_v13  ;;  %v1598_v59 = vmin.f32 %v1597_v18, 6.0  ;;  %v1604_v53 = vmax.f32 %v3990_v28, 6.0  ;;  %v1593_v17 = vmul.f32 %v1592_v49, %v1591_v31  ;;  %s4092_s15 = sld [smem:[#allocation4 + %s1637_s0]]  ;;  %s1644_s14 = sadd.s32 %s3929_s3, %s4279_s7 }
 0x1df   : > { %v1580_v42 = vadd.f32 %v1579_v2, %v1573_v19  ;;  %v1599_v58 = vstv %s4007_s29  ;;  %v1184_v51 = vmax.f32 %v3954_v30, 0.0  ;;  %v1424_v43 = vstv %s4009_s24  ;;  %s4068_s29 = sld [smem:[#allocation4 + %s1623_s1]]  ;;  %s1472_s24 = sadd.s32 124, %s2707_s6 }
 0x1e0   : > { %v1370_v37 = vadd.f32 %v1369_v36, %v1362_v41  ;;  %v1417_v52 = vmul.f32 %v1416_v29, %v1415_v3  ;;  %v1431_v61 = vmin.f32 %v1430_v54, 15.0  ;;  %v1432_v7 = vstv %s4017_s22  ;;  %s4075_s22 = sld [smem:[#allocation4 + %s1465_s19]]  ;;  %s1473_s28 = sadd.s32 %s2711_s8, %s1472_s24 }
 0x1e1   : > { %v1587_v4 = vadd.f32 %v1586_v26, %v1580_v42  ;;  %v1600_v20 = vmul.f32 %v1599_v58, %v1598_v59  ;;  %v1605_v56 = vmin.f32 %v1604_v53, 7.0  ;;  %v1611_v30 = vmax.f32 %v3990_v28, 7.0  ;;  %s4098_s25 = sld [smem:[#allocation4 + %s1473_s28]]  ;;  %s1506_s30 = sadd.s32 %s3929_s3, %s2707_s6 }
 0x1e2   : > { %v1378_v11 = vadd.f32 %v1377_v62, %v1370_v37  ;;  %v1425_v62 = vmul.f32 %v1424_v43, %v1423_v22  ;;  %v1606_v9 = vstv %s4023_s12  ;;  %v1433_v39 = vmul.f32 %v1432_v7, %v1431_v61  ;;  %s1488_s12 = sadd.s32 126, %s2707_s6  ;;  %s4103_s20 = sld [smem:[#allocation4 + %s1481_s5]] }
 0x1e3   : > { %v1594_v29 = vadd.f32 %v1593_v17, %v1587_v4  ;;  %v1618_v14 = vmax.f32 %v3990_v28, 8.0  ;;  %v1607_v34 = vmul.f32 %v1606_v9, %v1605_v56  ;;  %v1612_v0 = vmin.f32 %v1611_v30, 8.0  ;;  %s1489_s13 = sadd.s32 %s2711_s8, %s1488_s12  ;;  %s4125_s19 = sld [smem:[#allocation4 + %s1506_s30]] }
 0x1e4   : > { %v1386_v46 = vadd.f32 %v1385_v21, %v1378_v11  ;;  %v1185_v48 = vmin.f32 %v1184_v51, 1.0  ;;  %v1613_v23 = vstv %s4037_s18  ;;  %v1620_v15 = vstv %s4054_s10  ;;  %s1496_s18 = sadd.s32 127, %s2707_s6  ;;  %s4282_s24 = sadd.s32 2, %s2707_s6 }
 0x1e5   : > { %v1601_v13 = vadd.f32 %v1600_v20, %v1594_v29  ;;  %v1619_v6 = vmin.f32 %v1618_v14, 9.0  ;;  %v1614_v27 = vmul.f32 %v1613_v23, %v1612_v0  ;;  %v1625_v38 = vmax.f32 %v3990_v28, 9.0  ;;  %s1497_s10 = sadd.s32 %s2711_s8, %s1496_s18  ;;  %s4120_s8 = sld [smem:[#allocation4 + %s1644_s14]] }
 0x1e6   : > { %v1394_v10 = vadd.f32 %v1393_v50, %v1386_v46  ;;  %v1444_v32 = vstv %s4045_s21  ;;  %v1627_v55 = vstv %s4068_s29  ;;  %v1632_v16 = vmax.f32 %v3990_v28, 10.0  ;;  %s4112_s21 = sld [smem:[#allocation4 + %s1489_s13]]  ;;  %s1520_s27 = sadd.s32 %s3929_s3, %s4282_s24 }
 0x1e7   : > { %v1608_v41 = vadd.f32 %v1607_v34, %v1601_v13  ;;  %v1621_v35 = vmul.f32 %v1620_v15, %v1619_v6  ;;  %v1626_v21 = vmin.f32 %v1625_v38, 10.0  ;;  %v1446_v11 = vstv %s4056_s23  ;;  %s4123_s1 = sld [smem:[#allocation4 + %s1497_s10]]  ;;  %s4280_s23 = sadd.s32 20, %s2707_s6 }
 0x1e8   : > { %v1402_v47 = vadd.f32 %v1401_v1, %v1394_v10  ;;  %v1453_v40 = vstv %s4062_s4  ;;  %v1461_v2 = vstv %s4064_s2  ;;  %v1639_v18 = vmax.f32 %v3990_v28, 11.0  ;;  %s1651_s4 = sadd.s32 %s3929_s3, %s4280_s23  ;;  %s4281_s2 = sadd.s32 1, %s2707_s6 }
 0x1e9   : > { %v1615_v37 = vadd.f32 %v1614_v27, %v1608_v41  ;;  %v1628_v1 = vmul.f32 %v1627_v55, %v1626_v21  ;;  %v1633_v19 = vmin.f32 %v1632_v16, 11.0  ;;  %v1634_v26 = vstv %s4085_s11  ;;  %s1513_s29 = sadd.s32 %s3929_s3, %s4281_s2  ;;  %s4145_s26 = sld [smem:[#allocation4 + %s1651_s4]] }
 0x1ea   : > { %v1410_v36 = vadd.f32 %v1409_v44, %v1402_v47  ;;  %v1469_v10 = vstv %s4075_s22  ;;  %v1640_v42 = vmin.f32 %v1639_v18, 12.0  ;;  %v1641_v17 = vstv %s4092_s15  ;;  %s4283_s22 = sadd.s32 21, %s2707_s6  ;;  %s4151_s12 = sld [smem:[#allocation4 + %s1513_s29]] }
 0x1eb   : > { %v1622_v46 = vadd.f32 %v1621_v35, %v1615_v37  ;;  %v1646_v58 = vmax.f32 %v3990_v28, 12.0  ;;  %v1477_v61 = vstv %s4098_s25  ;;  %v1485_v4 = vstv %s4103_s20  ;;  %s1658_s16 = sadd.s32 %s3929_s3, %s4283_s22  ;;  %s4154_s9 = sld [smem:[#allocation4 + %s1520_s27]] }
 0x1ec   : > { %v1418_v24 = vadd.f32 %v1417_v52, %v1410_v36  ;;  %v1635_v20 = vmul.f32 %v1634_v26, %v1633_v19  ;;  %v1642_v9 = vmul.f32 %v1641_v17, %v1640_v42  ;;  %s4284_s0 = sadd.s32 3, %s2707_s6  ;;  %v1653_v0 = vmax.f32 %v3990_v28, 13.0  ;;  %s4163_s11 = sld [smem:[#allocation4 + %s1658_s16]] }
 0x1ed   : > { %s1527_s28 = sadd.s32 %s3929_s3, %s4284_s0  ;;  %v1501_v23 = vstv %s4123_s1  ;;  %s4285_s5 = sadd.s32 4, %s2707_s6  ;;  %v1660_v37 = vmax.f32 %v3990_v28, 14.0 }
 0x1ee   : > { %v1426_v12 = vadd.f32 %v1425_v62, %v1418_v24  ;;  %v1629_v62 = vadd.f32 %v1628_v1, %v1622_v46  ;;  %v1647_v24 = vmin.f32 %v1646_v58, 13.0  ;;  %s1534_s18 = sadd.s32 %s3929_s3, %s4285_s5  ;;  %s4170_s13 = sld [smem:[#allocation4 + %s1527_s28]] }
 0x1ef   : > { %s4286_s15 = sadd.s32 5, %s2707_s6  ;;  %s4176_s7 = sld [smem:[#allocation4 + %s1534_s18]]  ;;  %v1661_v46 = vmin.f32 %v1660_v37, 15.0 }
 0x1f0   : > { %v1434_v8 = vadd.f32 %v1433_v39, %v1426_v12  ;;  %v1648_v39 = vstv %s4120_s8  ;;  %v1636_v15 = vadd.f32 %v1635_v20, %v1629_v62  ;;  %s1541_s25 = sadd.s32 %s3929_s3, %s4286_s15  ;;  %s4287_s14 = sadd.s32 6, %s2707_s6  ;;  %v1517_v28 = vstv %s4151_s12 }
 0x1f1   : > { %v1649_v35 = vmul.f32 %v1648_v39, %v1647_v24  ;;  %s1548_s20 = sadd.s32 %s3929_s3, %s4287_s14  ;;  %s4185_s10 = sld [smem:[#allocation4 + %s1541_s25]]  ;;  %v1524_v1 = vstv %s4154_s9 }
 0x1f2   : > { %v4087_v33 = vmul.f32 %v1434_v8, %v1185_v48  ;;  %v1493_v48 = vstv %s4112_s21  ;;  %v1510_v8 = vstv %s4125_s19  ;;  %v1643_v16 = vadd.f32 %v1642_v9, %v1636_v15  ;;  %s1549_s21 = sld [smem:[#allocation4 + %s1548_s20]] }
 0x1f3   : > { %v1662_v19 = vstv %s4163_s11  ;;  %s4288_s6 = sld [smem:[#allocation10_spill]] }
 0x1f4   : > { %v4095_v60 = vmul.f32 15.0, %v4087_v33  ;;  %s4291_s1 = sld [smem:[#allocation13_spill]] }
 0x1f6   : > { %v1442_v50 = vmax.f32 %v4095_v60, 0.0  ;;  %v1451_v25 = vmax.f32 %v4095_v60, 1.0  ;;  %v1459_v5 = vmax.f32 %v4095_v60, 2.0  ;;  %v1467_v45 = vmax.f32 %v4095_v60, 3.0 }
 0x1f7   : > { %v1475_v49 = vmax.f32 %v4095_v60, 4.0  ;;  %v1483_v53 = vmax.f32 %v4095_v60, 5.0  ;;  %v1491_v52 = vmax.f32 %v4095_v60, 6.0  ;;  %v1499_v7 = vmax.f32 %v4095_v60, 7.0 }
 0x1f8   : > { %v1443_v3 = vmin.f32 %v1442_v50, 1.0  ;;  %v1452_v54 = vmin.f32 %v1451_v25, 2.0  ;;  %v1460_v31 = vmin.f32 %v1459_v5, 3.0  ;;  %v1468_v59 = vmin.f32 %v1467_v45, 4.0 }
 0x1f9   : > { %v1476_v47 = vmin.f32 %v1475_v49, 5.0  ;;  %v1484_v36 = vmin.f32 %v1483_v53, 6.0  ;;  %v1508_v29 = vmax.f32 %v4095_v60, 8.0  ;;  %v1492_v34 = vmin.f32 %v1491_v52, 7.0 }
 0x1fa   : > { %v1445_v44 = vmul.f32 %v1444_v32, %v1443_v3  ;;  %v1454_v22 = vmul.f32 %v1453_v40, %v1452_v54  ;;  %v1462_v43 = vmul.f32 %v1461_v2, %v1460_v31  ;;  %v1470_v30 = vmul.f32 %v1469_v10, %v1468_v59 }
 0x1fb   : > { %v1478_v13 = vmul.f32 %v1477_v61, %v1476_v47  ;;  %v1500_v12 = vmin.f32 %v1499_v7, 8.0  ;;  %v1486_v41 = vmul.f32 %v1485_v4, %v1484_v36  ;;  %v1515_v27 = vmax.f32 %v4095_v60, 9.0 }
 0x1fc   : > { %v1447_v51 = vadd.f32 %v1446_v11, %v1445_v44  ;;  %v1509_v38 = vmin.f32 %v1508_v29, 9.0  ;;  %v1522_v32 = vmax.f32 %v4095_v60, 10.0  ;;  %v1494_v55 = vmul.f32 %v1493_v48, %v1492_v34 }
 0x1fd   : > { %v1654_v50 = vmin.f32 %v1653_v0, 14.0  ;;  %v1655_v25 = vstv %s4145_s26  ;;  %v1502_v45 = vmul.f32 %v1501_v23, %v1500_v12  ;;  %v1516_v11 = vmin.f32 %v1515_v27, 10.0  ;;  %v4197_v0 = vld [vmem:[%s3184_s17] sm:$0x3]  ;;  %s4289_s17 = sld [smem:[#allocation9_spill]] }
 0x1fe   : > { %v1455_v56 = vadd.f32 %v1454_v22, %v1447_v51  ;;  %v1529_v40 = vmax.f32 %v4095_v60, 11.0  ;;  %v1511_v2 = vmul.f32 %v1510_v8, %v1509_v38  ;;  %v1523_v18 = vmin.f32 %v1522_v32, 11.0 }
 0x1ff   : > { %v1536_v3 = vmax.f32 %v4095_v60, 12.0  ;;  %v1650_v31 = vadd.f32 %v1649_v35, %v1643_v16  ;;  %v1656_v49 = vmul.f32 %v1655_v25, %v1654_v50  ;;  %v1518_v44 = vmul.f32 %v1517_v28, %v1516_v11 }
 0x200   : > { %v1463_v14 = vadd.f32 %v1462_v43, %v1455_v56  ;;  %v1530_v22 = vmin.f32 %v1529_v40, 12.0  ;;  %v1543_v59 = vmax.f32 %v4095_v60, 13.0  ;;  %v1531_v53 = vstv %s4170_s13 }
 0x201   : > { %v1537_v10 = vmin.f32 %v1536_v3, 13.0  ;;  %v1550_v42 = vmax.f32 %v4095_v60, 14.0  ;;  %v1525_v58 = vmul.f32 %v1524_v1, %v1523_v18  ;;  %v1657_v51 = vadd.f32 %v1656_v49, %v1650_v31 }
 0x202   : > { %v1471_v6 = vadd.f32 %v1470_v30, %v1463_v14  ;;  %v1663_v43 = vmul.f32 %v1662_v19, %v1661_v46  ;;  %v1538_v47 = vstv %s4176_s7  ;;  %v1532_v61 = vmul.f32 %v1531_v53, %v1530_v22 }
 0x203   : > { %v1544_v4 = vmin.f32 %v1543_v59, 14.0  ;;  %v1666_v7 = vmax.f32 %v3906_v57, 0.0  ;;  %v1545_v20 = vstv %s4185_s10  ;;  %v1539_v30 = vmul.f32 %v1538_v47, %v1537_v10  ;;  %s4290_s3 = smul.u32 6, %s4289_s17 }
 0x204   : > { %v1479_v21 = vadd.f32 %v1478_v13, %v1471_v6  ;;  %v1551_v36 = vmin.f32 %v1550_v42, 15.0  ;;  %v1664_v62 = vadd.f32 %v1663_v43, %v1657_v51  ;;  %v1552_v29 = vstv %s1549_s21 }
 0x205   : > { %v1546_v24 = vmul.f32 %v1545_v20, %v1544_v4  ;;  %v1667_v60 = vmin.f32 %v1666_v7, 1.0  ;;  %v2443_v20 = vld [vmem:[%s4288_s6] sm:$0x3]  ;;  %s220_s19 = scalar_lea.vmem %s4291_s1, %s4290_s3 }
 0x206   : > { %v1487_v5 = vadd.f32 %v1486_v41, %v1479_v21  ;;  %v1553_v14 = vmul.f32 %v1552_v29, %v1551_v36  ;;  %v1665_v13 = vmul.f32 %v1664_v62, %v3760_v63  ;;  %v2444_v62 = vld [vmem:[%s4288_s6 + $0x2] sm:$0x3] }
 0x207   : > { %v1668_v48 = vmul.f32 %v4197_v0, %v1667_v60 }
 0x208   : > { %v1495_v54 = vadd.f32 %v1494_v55, %v1487_v5  ;;  %v1672_v57 = vmax.f32 %v1665_v13, 0.0 }
 0x209   : > { %v1675_v8 = vmul.f32 360.0, %v1668_v48 }
 0x20a   : > { %v1503_v26 = vadd.f32 %v1502_v45, %v1495_v54  ;;  %v1673_v41 = vmin.f32 %v1672_v57, 1.0 }
 0x20b   : > { %v1868_v15 = vadd.f32 -60.0, %v1675_v8  ;;  %v1869_v38 = vadd.f32 -240.0, %v1675_v8  ;;  %v1870_v63 = vadd.f32 -180.0, %v1675_v8  ;;  %v1871_v37 = vadd.f32 -120.0, %v1675_v8 }
 0x20c   : > { %v1512_v17 = vadd.f32 %v1511_v2, %v1503_v26  ;;  %v1674_v35 = vmul.f32 %v4197_v0, %v1673_v41  ;;  %v1872_v21 = vadd.f32 -300.0, %v1675_v8  ;;  %v1691_v5 = vmax.f32 %v1675_v8, 0.0 }
 0x20d   : > { %v1682_v16 = vmax.f32 %v1868_v15, 0.0  ;;  %v1687_v50 = vmax.f32 %v1869_v38, 0.0  ;;  %v1696_v45 = vmax.f32 %v1870_v63, 0.0 }
 0x20e   : > { %v1519_v52 = vadd.f32 %v1518_v44, %v1512_v17  ;;  %v1706_v11 = vmax.f32 %v1872_v21, 0.0  ;;  %v1692_v3 = vmin.f32 %v1691_v5, 60.0 }
 0x20f   : > { %v1683_v2 = vmin.f32 %v1682_v16, 60.0  ;;  %v1688_v28 = vmin.f32 %v1687_v50, 60.0  ;;  %v1697_v54 = vmin.f32 %v1696_v45, 60.0 }
 0x210   : > { %v1526_v56 = vadd.f32 %v1525_v58, %v1519_v52  ;;  %v1707_v49 = vmin.f32 %v1706_v11, 60.0 }
 0x212   : > { %v1533_v9 = vadd.f32 %v1532_v61, %v1526_v56 }
 0x214   : > { %v1540_v39 = vadd.f32 %v1539_v30, %v1533_v9  ;;  %v1721_v30 = vlaneseq  ;;  %v2445_v9 = vld [vmem:[%s4288_s6 + $0x4] sm:$0x3] }
 0x216   : > { %v1547_v34 = vadd.f32 %v1546_v24, %v1540_v39  ;;  %vm1723_vm11 = vcmp.lt.s32.totalorder %v1721_v30, 256 }
 0x218   : > { %v1554_v12 = vadd.f32 %v1553_v14, %v1547_v34 }
 0x21a   : > { %v1555_v23 = vmul.f32 %v1554_v12, %v4087_v33  ;;  %v1701_v33 = vmax.f32 %v1871_v37, 0.0 }
 0x21c   : > { %v1669_v6 = vmax.f32 %v1555_v23, 0.0  ;;  %v1702_v31 = vmin.f32 %v1701_v33, 60.0 }
 0x21e   : > { %v1670_v27 = vmin.f32 %v1669_v6, 1.0 }
 0x220   : > { %v1671_v32 = vmul.f32 %v4197_v0, %v1670_v27 }
 0x222   : > { %v1676_v55 = vsub.f32 1.0, %v1671_v32 }
 0x224   : > { %v1677_v25 = vmul.f32 %v1676_v55, %v1674_v35 }
 0x226   : > { %v1678_v40 = vsub.f32 %v1677_v25, %v1674_v35 }
 0x228   : > { %v1679_v18 = vmul.f32 0.016666668, %v1678_v40 }
 0x22a   : > { %v1680_v46 = vsub.f32 0.0, %v1679_v18  ;;  %v1684_v1 = vmul.f32 %v1683_v2, %v1679_v18  ;;  %v1689_v19 = vmul.f32 %v1688_v28, %v1679_v18 }
 0x22c   : > { %v1685_v26 = vadd.f32 %v1684_v1, %v1674_v35  ;;  %v1693_v44 = vmul.f32 %v1692_v3, %v1680_v46  ;;  %v1698_v22 = vmul.f32 %v1697_v54, %v1680_v46  ;;  %v1703_v59 = vmul.f32 %v1702_v31, %v1680_v46 }
 0x22d   : > { %v1708_v53 = vmul.f32 %v1707_v49, %v1680_v46 }
 0x22e   : > { %v1690_v10 = vsub.f32 %v1685_v26, %v1689_v19  ;;  %v1694_v42 = vadd.f32 %v1693_v44, %v1677_v25  ;;  %v1704_v17 = vadd.f32 %v1703_v59, %v1677_v25 }
 0x230   : > { %v1699_v58 = vsub.f32 %v1694_v42, %v1698_v22  ;;  %v1709_v51 = vsub.f32 %v1704_v17, %v1708_v53  ;;  %v1710_v43 = vmax.f32 %v1690_v10, 0.0 }
 0x232   : > { %v1711_v47 = vmin.f32 %v1710_v43, 1.0  ;;  %v1712_v52 = vmax.f32 %v1699_v58, 0.0  ;;  %v1714_v61 = vmax.f32 %v1709_v51, 0.0 }
 0x234   : > { %v1713_v4 = vmin.f32 %v1712_v52, 1.0  ;;  %v1715_v7 = vmin.f32 %v1714_v61, 1.0  ;;  %v1716_v56 = vadd.f32 %v2443_v20, %v1711_v47 }
 0x236   : > { %v1717_v36 = vmax.f32 %v1716_v56, 0.0  ;;  %v1726_v29 = vadd.f32 %v2444_v62, %v1713_v4  ;;  %v1732_v24 = vadd.f32 %v2445_v9, %v1715_v7 }
 0x238   : > { %v1718_v60 = vmin.f32 %v1717_v36, 1.0  ;;  %v1727_v39 = vmax.f32 %v1726_v29, 0.0  ;;  %v1733_v14 = vmax.f32 %v1732_v24, 0.0 }
 0x23a   : > { %v1719_v13 = vmul.f32 %v4197_v0, %v1718_v60  ;;  %v1728_v34 = vmin.f32 %v1727_v39, 1.0  ;;  %v1734_v48 = vmin.f32 %v1733_v14, 1.0 }
 0x23c   : > { %1725 = vst.msk [vmem:[%s220_s19] sm:$0x3] %vm1723_vm11, %v1719_v13  ;;  %v1729_v12 = vmul.f32 %v4197_v0, %v1728_v34  ;;  %v1735_v57 = vmul.f32 %v4197_v0, %v1734_v48 }
 0x23e   : > { %1873 = vst.msk [vmem:[%s220_s19 + $0x2] sm:$0x3] %vm1723_vm11, %v1729_v12 }
 0x23f   : > { %1874 = vst.msk [vmem:[%s220_s19 + $0x4] sm:$0x3] %vm1723_vm11, %v1735_v57 }
 0x240 PF: > { %s4292_s23 = sld [smem:[#allocation7_spill]] }
 0x241   : > { %s4294_s24 = sld [smem:[#allocation8_spill]] }
 0x246   : > { %s27_s25 = sadd.s32 1, %s4292_s23   ;;  %s4293_s23 = sld [smem:[#allocation6_spill]] }
 0x247   : > { %p24_p5 = scmp.ge.s32.totalorder %s27_s25, 4  }
 0x249   :  { %26 = sbr.rel (!%p24_p5) target bundleno = 11 (0xb), region = 68 }

</bundles_post_ra>
